<compile_context>
chip_gen: v7x
topology: tpu7x:2x2x1
jax: 0.10.0
libtpu: 0.0.40
codegen_flags: <defaults>
</compile_context>

<pallas_src>
import functools

import jax
import jax.numpy as jnp
from jax import lax
from jax.experimental import pallas as pl
from jax.experimental.pallas import tpu as pltpu

_LN_EPS = 1e-5       # torch.nn.LayerNorm default eps
_ORTHO_EPS = 1e-8    # matches the module's `+ 1e-08`

# ---- stacked-parameter layout (built once in prepare_params) -----------------
# matrix stack  W[i] : [D, D]  (pre-transposed so the kernel always does  x @ W)
M_A1_WQ, M_A1_WK, M_A1_WV, M_A1_WO = 0, 1, 2, 3
M_A2_WQ, M_A2_WK, M_A2_WV, M_A2_WO = 4, 5, 6, 7
M_SD_W1A, M_SD_W1B, M_SD_W2 = 8, 9, 10
M_UX_W, M_UY_W = 11, 12
_N_MATS = 13
# vector stack  V[i] : [D]     (biases / LayerNorm affine params, kept in f32)
V_XP_B, V_XP_G, V_XP_BE = 0, 1, 2
V_YP_B, V_YP_G, V_YP_BE = 3, 4, 5
V_A1_BQ, V_A1_BK, V_A1_BV, V_A1_BO = 6, 7, 8, 9
V_A2_BQ, V_A2_BK, V_A2_BV, V_A2_BO = 10, 11, 12, 13
V_SD_B1, V_SD_G1, V_SD_BE1 = 14, 15, 16
V_SD_B2, V_SD_G2, V_SD_BE2 = 17, 18, 19
V_UX_B, V_UY_B = 20, 21
_N_VECS = 22


# ----------------------------- in-kernel helpers ------------------------------
def _gelu(x):
    # exact (erf-based) GELU — matches torch.nn.GELU() default
    return 0.5 * x * (1.0 + lax.erf(x * 0.7071067811865476))


def _layernorm(x, gamma, beta):
    mu = jnp.mean(x, axis=-1, keepdims=True)
    var = jnp.mean((x - mu) ** 2, axis=-1, keepdims=True)
    return (x - mu) * lax.rsqrt(var + _LN_EPS) * gamma + beta


# ------------------------------- fused kernel ---------------------------------
def _fused_kernel(x_ref, y_ref, xpw_ref, ypw_ref, w_ref, v_ref, alpha_ref,
                  o_ref, xgy_ref, ygx_ref, *opt_scratch,
                  num_heads, head_dim, seq_len, rows_per_block, compute_dtype):
    """One (Bb*N)-row block per grid step: processors -> 2x cross-MHA -> synergy."""
    H, hd, N, Bb = num_heads, head_dim, seq_len, rows_per_block
    D = H * hd
    ctx_ref = opt_scratch[0] if opt_scratch else None   # only when head_dim % 128 == 0

    def mm(a, b):
        return jnp.dot(a, b, preferred_element_type=jnp.float32)

    def vec(i):                   # [1, D] bias / LN row (broadcasts over the rows)
        return v_ref[i:i + 1, :]

    cast = lambda a: a.astype(compute_dtype)

    xf = cast(x_ref[...])         # [R, Dx]  (cast once; no-op in the f32 path)
    yf = cast(y_ref[...])         # [R, Dy]

    # ---- x/y processors: Linear -> LayerNorm -> GELU --------------------------
    px = _gelu(_layernorm(mm(xf, xpw_ref[...]) + vec(V_XP_B), vec(V_XP_G), vec(V_XP_BE)))
    py = _gelu(_layernorm(mm(yf, ypw_ref[...]) + vec(V_YP_B), vec(V_YP_G), vec(V_YP_BE)))
    px_c, py_c = cast(px), cast(py)            # cast once; reused by 4-5 matmuls each

    # ---- multi-head cross attention (eval mode, dropout = identity) -----------
    def mha(q_in, kv_in, m0, v0, dst_ref):
        # 1/sqrt(head_dim) is pre-folded into Wq / bq (prepare_params).
        q = cast(mm(q_in, w_ref[m0 + 0]) + vec(v0 + 0))     # [R, D]
        k = cast(mm(kv_in, w_ref[m0 + 1]) + vec(v0 + 1))
        v = cast(mm(kv_in, w_ref[m0 + 2]) + vec(v0 + 2))
        wo = w_ref[m0 + 3]                                   # [D, D]
        for b in range(Bb):                 # static unroll over rows in this block
            r0 = b * N
            acc = None
            # static unroll over heads (typical H <= 8).
            # TODO(synk): switch to lax.fori_loop + VMEM accumulator for very large H.
            for h in range(H):
                lo = h * hd
                q_bh = q[r0:r0 + N, lo:lo + hd]
                k_bh = k[r0:r0 + N, lo:lo + hd]
                v_bh = v[r0:r0 + N, lo:lo + hd]
                # scores = q_bh @ k_bh.T without materializing a transpose
                s = lax.dot_general(q_bh, k_bh, (((1,), (1,)), ((), ())),
                                    preferred_element_type=jnp.float32)   # [N, N]
                s = s - jnp.max(s, axis=-1, keepdims=True)
                p = jnp.exp(s)
                p = p * (1.0 / jnp.sum(p, axis=-1, keepdims=True))        # recip-mul
                oh = mm(cast(p), v_bh)                                     # [N, hd]
                if ctx_ref is not None:
                    # lane-aligned context assembly (head_dim % 128 == 0 only)
                    ctx_ref[r0:r0 + N, lo:lo + hd] = cast(oh)
                else:
                    # fold output projection into the head loop (no lane concat)
                    contrib = mm(cast(oh), wo[lo:lo + hd, :])              # [N, D]
                    acc = contrib if acc is None else acc + contrib
            if ctx_ref is None:
                dst_ref[r0:r0 + N, :] = acc
        if ctx_ref is not None:
            dst_ref[...] = mm(ctx_ref[...], wo)      # single full-K output projection

    mha(px_c, py_c, M_A1_WQ, V_A1_BQ, xgy_ref)   # x_to_y_attention(q=px, k/v=py)
    mha(py_c, px_c, M_A2_WQ, V_A2_BQ, ygx_ref)   # y_to_x_attention(q=py, k/v=px)
    xgy = xgy_ref[...] + vec(V_A1_BO)
    ygx = ygx_ref[...] + vec(V_A2_BO)

    # ---- synergy detector: Linear(2D->D) -> LN -> GELU -> [Dropout] -> Linear -> LN
    # cat([xgy, ygx], -1) @ W1.T  ==  xgy @ W1[:, :D].T + ygx @ W1[:, D:].T
    h1 = mm(cast(xgy), w_ref[M_SD_W1A]) + mm(cast(ygx), w_ref[M_SD_W1B]) + vec(V_SD_B1)
    h1 = _gelu(_layernorm(h1, vec(V_SD_G1), vec(V_SD_BE1)))
    raw = _layernorm(mm(cast(h1), w_ref[M_SD_W2]) + vec(V_SD_B2), vec(V_SD_G2), vec(V_SD_BE2))

    # ---- orthogonalization against the unique (marginal) components -----------
    mx = mm(px_c, w_ref[M_UX_W]) + vec(V_UX_B)
    my = mm(py_c, w_ref[M_UY_W]) + vec(V_UY_B)

    alpha = alpha_ref[0]                                   # sigmoid(ortho), SMEM scalar
    dx = jnp.sum(raw * mx, axis=-1, keepdims=True)
    inv_nx = 1.0 / (jnp.sum(mx * mx, axis=-1, keepdims=True) + _ORTHO_EPS)   # [R,1]
    s1 = raw - (alpha * dx * inv_nx) * mx
    dy = jnp.sum(s1 * my, axis=-1, keepdims=True)
    inv_ny = 1.0 / (jnp.sum(my * my, axis=-1, keepdims=True) + _ORTHO_EPS)   # [R,1]
    o_ref[...] = (s1 - (alpha * dy * inv_ny) * my).astype(o_ref.dtype)


# --------------------------- host-side preparation ----------------------------
def prepare_params(p, num_heads, compute_dtype=jnp.float32):
    """One-time prep: transpose weights to [D_in, D_out], fold 1/sqrt(head_dim) into
    Wq/bq, split sd_w1, stack everything, and compute sigmoid(ortho) on device."""
    D = p["xp_w"].shape[0]
    assert D % num_heads == 0
    scale = 1.0 / ((D // num_heads) ** 0.5)
    mats = [p["a1_wq"].T * scale, p["a1_wk"].T, p["a1_wv"].T, p["a1_wo"].T,
            p["a2_wq"].T * scale, p["a2_wk"].T, p["a2_wv"].T, p["a2_wo"].T,
            p["sd_w1"][:, :D].T, p["sd_w1"][:, D:].T, p["sd_w2"].T,
            p["ux_w"].T, p["uy_w"].T]
    vecs = [p["xp_b"], p["xp_g"], p["xp_be"],
            p["yp_b"], p["yp_g"], p["yp_be"],
            p["a1_bq"] * scale, p["a1_bk"], p["a1_bv"], p["a1_bo"],
            p["a2_bq"] * scale, p["a2_bk"], p["a2_bv"], p["a2_bo"],
            p["sd_b1"], p["sd_g1"], p["sd_be1"],
            p["sd_b2"], p["sd_g2"], p["sd_be2"],
            p["ux_b"], p["uy_b"]]
    assert len(mats) == _N_MATS and len(vecs) == _N_VECS
    return {
        "xp_w_t": p["xp_w"].T.astype(compute_dtype),        # [Dx, D]
        "yp_w_t": p["yp_w"].T.astype(compute_dtype),        # [Dy, D]
        "w_stack": jnp.stack(mats).astype(compute_dtype),   # [13, D, D]
        "v_stack": jnp.stack(vecs).astype(jnp.float32),     # [22, D]
        "alpha": jax.nn.sigmoid(p["ortho"]).reshape(1).astype(jnp.float32),
    }


# --------------------------- VMEM / blocking heuristics ------------------------
def _pad(v, m):
    return ((int(v) + m - 1) // m) * m


def _tile_bytes(rows, cols, dtype):
    it = jnp.dtype(dtype).itemsize
    sub = 16 if it == 2 else 8
    return _pad(rows, sub) * _pad(cols, 128) * it


def _vmem_physical_bytes():
    try:
        cap = int(getattr(pltpu.get_tpu_info(), "vmem_capacity_bytes"))
        if cap > 0:
            return cap
    except Exception:
        pass
    return 64 << 20   # v7x per-core physical — safe lower bound across generations


def _estimate_vmem_bytes(rows, N, Dx, Dy, D, in_dtype, cdt, use_ctx):
    # weights: single-buffered (pl.Buffered(1), constant index_map)
    wb = (_tile_bytes(Dx, D, cdt) + _tile_bytes(Dy, D, cdt)
          + _N_MATS * _tile_bytes(D, D, cdt) + _tile_bytes(_N_VECS, D, jnp.float32))
    # pipelined x/y/out blocks: double-buffered
    io = 2 * (_tile_bytes(rows, Dx, in_dtype) + _tile_bytes(rows, Dy, in_dtype)
              + _tile_bytes(rows, D, jnp.float32))
    # VMEM scratch (xgy / ygx [+ ctx])
    sc = 2 * _tile_bytes(rows, D, jnp.float32) + (_tile_bytes(rows, D, cdt) if use_ctx else 0)
    # live in-kernel f32 temporaries (px, py, q, k, v, xgy, ygx, h1, raw, mx, my, s1,
    # compute-dtype copies, per-head scores) — conservative upper bound.
    tmp = 24 * _tile_bytes(rows, D, jnp.float32) + 4 * _tile_bytes(N, N, jnp.float32)
    return wb + io + sc + tmp


def _pick_rows_per_block(B, N, Dx, Dy, D, in_dtype, cdt, use_ctx, budget,
                         target_rows=256):
    """Largest Bb (batch rows per grid step) s.t. B % Bb == 0, the block is
    sublane-friendly, Bb*N is near the MXU M-target, and the VMEM estimate fits."""
    bb = max(1, min(B, max(1, target_rows // max(N, 1))))
    while bb > 1 and (
            B % bb != 0
            or ((bb * N) % 8 != 0 and bb != B)
            or _estimate_vmem_bytes(bb * N, N, Dx, Dy, D, in_dtype, cdt, use_ctx) > budget):
        bb -= 1
    return bb


# ------------------------------- fused forward --------------------------------
def fused_forward(kp, x, y, num_heads):
    """Single fused pallas_call over grid=(B//Bb,) — Bb batch rows per grid step."""
    B, N, Dx = x.shape
    Dy = y.shape[2]
    D = kp["w_stack"].shape[-1]
    assert D % num_heads == 0
    head_dim = D // num_heads
    cdt = kp["w_stack"].dtype
    use_ctx = (head_dim % 128 == 0)        # lane-aligned ctx-assembly path

    phys = _vmem_physical_bytes()
    budget = max(phys - (12 << 20), 24 << 20)   # headroom for compiler-internal scratch
    Bb = _pick_rows_per_block(B, N, Dx, Dy, D, x.dtype, cdt, use_ctx, budget)
    R = Bb * N

    est = _estimate_vmem_bytes(R, N, Dx, Dy, D, x.dtype, cdt, use_ctx)
    vmem_limit = int(min(budget, max(32 << 20, est + (8 << 20))))

    kernel = functools.partial(
        _fused_kernel, num_heads=num_heads, head_dim=head_dim, seq_len=N,
        rows_per_block=Bb, compute_dtype=cdt)

    # Flatten batch*tokens so all non-attention matmuls see M = Bb*N rows.
    xf = x.reshape(B * N, Dx)
    yf = y.reshape(B * N, Dy)

    scratch = [pltpu.VMEM((R, D), jnp.float32),        # xgy (pre-output-bias)
               pltpu.VMEM((R, D), jnp.float32)]        # ygx (pre-output-bias)
    if use_ctx:
        scratch.append(pltpu.VMEM((R, D), cdt))        # per-head context assembly

    def wspec(shape, imap):                            # constant weight block: 1 buffer
        return pl.BlockSpec(shape, imap, pipeline_mode=pl.Buffered(1))

    out2d = pl.pallas_call(
        kernel,
        out_shape=jax.ShapeDtypeStruct((B * N, D), jnp.float32),
        grid=(B // Bb,),
        in_specs=[
            pl.BlockSpec((R, Dx), lambda i: (i, 0)),                    # x rows
            pl.BlockSpec((R, Dy), lambda i: (i, 0)),                    # y rows
            wspec(kp["xp_w_t"].shape, lambda i: (0, 0)),                # x-processor W
            wspec(kp["yp_w_t"].shape, lambda i: (0, 0)),                # y-processor W
            wspec(kp["w_stack"].shape, lambda i: (0, 0, 0)),            # stacked DxD weights
            wspec(kp["v_stack"].shape, lambda i: (0, 0)),               # stacked biases/LN
            pl.BlockSpec(memory_space=pltpu.MemorySpace.SMEM),          # alpha scalar
        ],
        out_specs=pl.BlockSpec((R, D), lambda i: (i, 0)),
        scratch_shapes=scratch,
        compiler_params=pltpu.CompilerParams(
            dimension_semantics=("parallel",),     # independent row blocks -> megacore
            vmem_limit_bytes=vmem_limit),
    )(xf, yf, kp["xp_w_t"], kp["yp_w_t"], kp["w_stack"], kp["v_stack"], kp["alpha"])
    return out2d.reshape(B, N, D)


def base_pairwise_fusion_forward(p, x, y, num_heads, compute_dtype=jnp.float32):
    """Convenience: one-time prep (transposes/stacking/scale-fold) + fused kernel."""
    return fused_forward(prepare_params(p, num_heads, compute_dtype), x, y, num_heads)


# ------------------------------- parameters -----------------------------------
def init_params(key, mx, my, D):
    ks = iter(jax.random.split(key, 32))
    nrm = lambda shape: (0.1 * jax.random.normal(next(ks), shape)).astype(jnp.float32)
    ones = lambda n: jnp.ones((n,), jnp.float32)
    zeros = lambda n: jnp.zeros((n,), jnp.float32)
    p = {
        "xp_w": nrm((D, mx)), "xp_b": nrm((D,)), "xp_g": ones(D), "xp_be": zeros(D),
        "yp_w": nrm((D, my)), "yp_b": nrm((D,)), "yp_g": ones(D), "yp_be": zeros(D),
        "sd_w1": nrm((D, 2 * D)), "sd_b1": nrm((D,)), "sd_g1": ones(D), "sd_be1": zeros(D),
        "sd_w2": nrm((D, D)), "sd_b2": nrm((D,)), "sd_g2": ones(D), "sd_be2": zeros(D),
        "ux_w": nrm((D, D)), "ux_b": nrm((D,)),
        "uy_w": nrm((D, D)), "uy_b": nrm((D,)),
        "ortho": jnp.float32(0.3),
    }
    for prefix in ("a1", "a2"):   # x_to_y_attention, y_to_x_attention
        p[f"{prefix}_wq"] = nrm((D, D)); p[f"{prefix}_wk"] = nrm((D, D))
        p[f"{prefix}_wv"] = nrm((D, D)); p[f"{prefix}_wo"] = nrm((D, D))
        p[f"{prefix}_bq"] = nrm((D,)); p[f"{prefix}_bk"] = nrm((D,))
        p[f"{prefix}_bv"] = nrm((D,)); p[f"{prefix}_bo"] = nrm((D,))
    return p


# ----------------------------- pure-JAX reference ------------------------------
def reference_forward(p, x, y, num_heads):
    lin = lambda a, w, b: a @ w.T + b
    gelu = lambda a: jax.nn.gelu(a, approximate=False)

    def ln(a, g, be):
        mu = a.mean(-1, keepdims=True)
        var = ((a - mu) ** 2).mean(-1, keepdims=True)
        return (a - mu) / jnp.sqrt(var + _LN_EPS) * g + be

    px = gelu(ln(lin(x, p["xp_w"], p["xp_b"]), p["xp_g"], p["xp_be"]))
    py = gelu(ln(lin(y, p["yp_w"], p["yp_b"]), p["yp_g"], p["yp_be"]))

    def attn(qi, kvi, pre):
        B, N, D = qi.shape
        H = num_heads
        hd = D // H
        q = lin(qi, p[f"{pre}_wq"], p[f"{pre}_bq"]).reshape(B, N, H, hd).transpose(0, 2, 1, 3)
        k = lin(kvi, p[f"{pre}_wk"], p[f"{pre}_bk"]).reshape(B, N, H, hd).transpose(0, 2, 1, 3)
        v = lin(kvi, p[f"{pre}_wv"], p[f"{pre}_bv"]).reshape(B, N, H, hd).transpose(0, 2, 1, 3)
        s = jnp.einsum("bhqd,bhkd->bhqk", q, k) / (hd ** 0.5)
        pr = jax.nn.softmax(s, axis=-1)
        o = jnp.einsum("bhqk,bhkd->bhqd", pr, v).transpose(0, 2, 1, 3).reshape(B, N, D)
        return lin(o, p[f"{pre}_wo"], p[f"{pre}_bo"])

    xgy = attn(px, py, "a1")
    ygx = attn(py, px, "a2")
    inter = jnp.concatenate([xgy, ygx], axis=-1)
    h = gelu(ln(lin(inter, p["sd_w1"], p["sd_b1"]), p["sd_g1"], p["sd_be1"]))
    raw = ln(lin(h, p["sd_w2"], p["sd_b2"]), p["sd_g2"], p["sd_be2"])
    mx = lin(px, p["ux_w"], p["ux_b"])
    my = lin(py, p["uy_w"], p["uy_b"])
    alpha = jax.nn.sigmoid(p["ortho"])
    s1 = raw - alpha * jnp.sum(raw * mx, -1, keepdims=True) * mx / (jnp.sum(mx * mx, -1, keepdims=True) + _ORTHO_EPS)
    s2 = s1 - alpha * jnp.sum(s1 * my, -1, keepdims=True) * my / (jnp.sum(my * my, -1, keepdims=True) + _ORTHO_EPS)
    return s2


if __name__ == "__main__":
    B, N = 2, 8
    modality_x_dim, modality_y_dim = 24, 40
    fusion_dim, num_heads = 32, 4

    key = jax.random.PRNGKey(0)
    kparams, kx, ky = jax.random.split(key, 3)
    params = init_params(kparams, modality_x_dim, modality_y_dim, fusion_dim)
    x = jax.random.normal(kx, (B, N, modality_x_dim), jnp.float32)
    y = jax.random.normal(ky, (B, N, modality_y_dim), jnp.float32)

    # One-time host-side prep (transposes / split / stacking / scale folding).
    kp32 = prepare_params(params, num_heads, compute_dtype=jnp.float32)

    fwd = jax.jit(fused_forward, static_argnames=("num_heads",))
    out = jax.block_until_ready(fwd(kp32, x, y, num_heads=num_heads))

    ref = reference_forward(params, x, y, num_heads)
    assert out.shape == (B, N, fusion_dim)
    err32 = float(jnp.max(jnp.abs(out - ref)))
    assert jnp.allclose(out, ref, atol=2e-4, rtol=2e-4), f"f32 max abs err = {err32}"

    # bf16 MXU path (f32 accumulation; LN/softmax/ortho stats in f32) — loose
    # tolerance check against the f32 reference (LayerNorms amplify bf16 rounding).
    kp16 = prepare_params(params, num_heads, compute_dtype=jnp.bfloat16)
    out16 = jax.block_until_ready(fwd(kp16, x, y, num_heads=num_heads))
    assert out16.shape == (B, N, fusion_dim)
    err16 = float(jnp.max(jnp.abs(out16.astype(jnp.float32) - ref)))
    assert err16 < 1e-1, f"bf16 max abs err = {err16}"

    print("KERNEL_OK")
</pallas_src>

<mosaic_0001>
module attributes {stable_mosaic.version = 11 : i64} {
  func.func @_fused_kernel(%arg0: i32, %arg1: memref<16x24xf32, #tpu.memory_space<vmem>>, %arg2: memref<16x40xf32, #tpu.memory_space<vmem>>, %arg3: memref<24x32xf32, #tpu.memory_space<vmem>>, %arg4: memref<40x32xf32, #tpu.memory_space<vmem>>, %arg5: memref<13x32x32xf32, #tpu.memory_space<vmem>>, %arg6: memref<22x32xf32, #tpu.memory_space<vmem>>, %arg7: memref<1xf32, #tpu.memory_space<smem>>, %arg8: memref<16x32xf32, #tpu.memory_space<vmem>>, %arg9: memref<16x32xf32, #tpu.memory_space<vmem>>, %arg10: memref<16x32xf32, #tpu.memory_space<vmem>>) attributes {dimension_semantics = [#tpu.dimension_semantics<parallel>], iteration_bounds = array<i64: 1>, scalar_prefetch = 0 : i64, scratch_operands = 2 : i64, tpu.core_type = #tpu.core_type<tc>, window_params = [{transform_indices = @transform_0, window_bounds = array<i64: 16, 24>}, {transform_indices = @transform_1, window_bounds = array<i64: 16, 40>}, {pipeline_mode = #tpu.pipeline_mode<synchronous>, transform_indices = @transform_2, window_bounds = array<i64: 24, 32>}, {pipeline_mode = #tpu.pipeline_mode<synchronous>, transform_indices = @transform_3, window_bounds = array<i64: 40, 32>}, {pipeline_mode = #tpu.pipeline_mode<synchronous>, transform_indices = @transform_4, window_bounds = array<i64: 13, 32, 32>}, {pipeline_mode = #tpu.pipeline_mode<synchronous>, transform_indices = @transform_5, window_bounds = array<i64: 22, 32>}, {transform_indices = @transform_6, window_bounds = array<i64: 1>}, {transform_indices = @transform_7, window_bounds = array<i64: 16, 32>}]} {
    %c0 = arith.constant 0 : index
    %c0_0 = arith.constant 0 : index
    %0 = vector.load %arg1[%c0, %c0_0] : memref<16x24xf32, #tpu.memory_space<vmem>>, vector<16x24xf32>
    %c0_1 = arith.constant 0 : index
    %c0_2 = arith.constant 0 : index
    %1 = vector.load %arg2[%c0_1, %c0_2] : memref<16x40xf32, #tpu.memory_space<vmem>>, vector<16x40xf32>
    %c0_3 = arith.constant 0 : index
    %c0_4 = arith.constant 0 : index
    %2 = vector.load %arg3[%c0_3, %c0_4] : memref<24x32xf32, #tpu.memory_space<vmem>>, vector<24x32xf32>
    %cst = arith.constant dense<0.000000e+00> : vector<16x32xf32>
    %3 = tpu.matmul %0, %2, %cst {dimension_numbers = #tpu.dot_dimension_numbers<[1], [0], [0], [1], [0, 0, 1, 1], [], []>} : vector<16x24xf32>, vector<24x32xf32>, vector<16x32xf32> -> vector<16x32xf32>
    %c0_5 = arith.constant 0 : index
    %c0_6 = arith.constant 0 : index
    %4 = vector.load %arg6[%c0_5, %c0_6] : memref<22x32xf32, #tpu.memory_space<vmem>>, vector<1x32xf32>
    %5 = vector.broadcast %4 : vector<1x32xf32> to vector<16x32xf32>
    %6 = arith.addf %3, %5 : vector<16x32xf32>
    %c1 = arith.constant 1 : index
    %c0_7 = arith.constant 0 : index
    %7 = vector.load %arg6[%c1, %c0_7] : memref<22x32xf32, #tpu.memory_space<vmem>>, vector<1x32xf32>
    %c2 = arith.constant 2 : index
    %c0_8 = arith.constant 0 : index
    %8 = vector.load %arg6[%c2, %c0_8] : memref<22x32xf32, #tpu.memory_space<vmem>>, vector<1x32xf32>
    %cst_9 = arith.constant dense<0.000000e+00> : vector<16xf32>
    %9 = vector.multi_reduction <add>, %6, %cst_9 [1] : vector<16x32xf32> to vector<16xf32>
    %10 = vector.shape_cast %9 : vector<16xf32> to vector<16x1xf32>
    %cst_10 = arith.constant 3.200000e+01 : f32
    %11 = vector.broadcast %cst_10 : f32 to vector<16x1xf32>
    %12 = arith.divf %10, %11 : vector<16x1xf32>
    %13 = vector.broadcast %12 : vector<16x1xf32> to vector<16x32xf32>
    %14 = arith.subf %6, %13 : vector<16x32xf32>
    %15 = arith.mulf %14, %14 : vector<16x32xf32>
    %cst_11 = arith.constant dense<0.000000e+00> : vector<16xf32>
    %16 = vector.multi_reduction <add>, %15, %cst_11 [1] : vector<16x32xf32> to vector<16xf32>
    %17 = vector.shape_cast %16 : vector<16xf32> to vector<16x1xf32>
    %cst_12 = arith.constant 3.200000e+01 : f32
    %18 = vector.broadcast %cst_12 : f32 to vector<16x1xf32>
    %19 = arith.divf %17, %18 : vector<16x1xf32>
    %20 = vector.broadcast %12 : vector<16x1xf32> to vector<16x32xf32>
    %21 = arith.subf %6, %20 : vector<16x32xf32>
    %cst_13 = arith.constant 9.99999974E-6 : f32
    %22 = vector.broadcast %cst_13 : f32 to vector<16x1xf32>
    %23 = arith.addf %19, %22 : vector<16x1xf32>
    %24 = math.rsqrt %23 : vector<16x1xf32>
    %25 = vector.broadcast %24 : vector<16x1xf32> to vector<16x32xf32>
    %26 = arith.mulf %21, %25 : vector<16x32xf32>
    %27 = vector.broadcast %7 : vector<1x32xf32> to vector<16x32xf32>
    %28 = arith.mulf %26, %27 : vector<16x32xf32>
    %29 = vector.broadcast %8 : vector<1x32xf32> to vector<16x32xf32>
    %30 = arith.addf %28, %29 : vector<16x32xf32>
    %cst_14 = arith.constant 5.000000e-01 : f32
    %31 = vector.broadcast %cst_14 : f32 to vector<16x32xf32>
    %32 = arith.mulf %31, %30 : vector<16x32xf32>
    %cst_15 = arith.constant 0.707106769 : f32
    %33 = vector.broadcast %cst_15 : f32 to vector<16x32xf32>
    %34 = arith.mulf %30, %33 : vector<16x32xf32>
    %35 = math.erf %34 : vector<16x32xf32>
    %cst_16 = arith.constant 1.000000e+00 : f32
    %36 = vector.broadcast %cst_16 : f32 to vector<16x32xf32>
    %37 = arith.addf %36, %35 : vector<16x32xf32>
    %38 = arith.mulf %32, %37 : vector<16x32xf32>
    %c0_17 = arith.constant 0 : index
    %c0_18 = arith.constant 0 : index
    %39 = vector.load %arg4[%c0_17, %c0_18] : memref<40x32xf32, #tpu.memory_space<vmem>>, vector<40x32xf32>
    %cst_19 = arith.constant dense<0.000000e+00> : vector<16x32xf32>
    %40 = tpu.matmul %1, %39, %cst_19 {dimension_numbers = #tpu.dot_dimension_numbers<[1], [0], [0], [1], [0, 0, 1, 1], [], []>} : vector<16x40xf32>, vector<40x32xf32>, vector<16x32xf32> -> vector<16x32xf32>
    %c3 = arith.constant 3 : index
    %c0_20 = arith.constant 0 : index
    %41 = vector.load %arg6[%c3, %c0_20] : memref<22x32xf32, #tpu.memory_space<vmem>>, vector<1x32xf32>
    %42 = vector.broadcast %41 : vector<1x32xf32> to vector<16x32xf32>
    %43 = arith.addf %40, %42 : vector<16x32xf32>
    %c4 = arith.constant 4 : index
    %c0_21 = arith.constant 0 : index
    %44 = vector.load %arg6[%c4, %c0_21] : memref<22x32xf32, #tpu.memory_space<vmem>>, vector<1x32xf32>
    %c5 = arith.constant 5 : index
    %c0_22 = arith.constant 0 : index
    %45 = vector.load %arg6[%c5, %c0_22] : memref<22x32xf32, #tpu.memory_space<vmem>>, vector<1x32xf32>
    %cst_23 = arith.constant dense<0.000000e+00> : vector<16xf32>
    %46 = vector.multi_reduction <add>, %43, %cst_23 [1] : vector<16x32xf32> to vector<16xf32>
    %47 = vector.shape_cast %46 : vector<16xf32> to vector<16x1xf32>
    %cst_24 = arith.constant 3.200000e+01 : f32
    %48 = vector.broadcast %cst_24 : f32 to vector<16x1xf32>
    %49 = arith.divf %47, %48 : vector<16x1xf32>
    %50 = vector.broadcast %49 : vector<16x1xf32> to vector<16x32xf32>
    %51 = arith.subf %43, %50 : vector<16x32xf32>
    %52 = arith.mulf %51, %51 : vector<16x32xf32>
    %cst_25 = arith.constant dense<0.000000e+00> : vector<16xf32>
    %53 = vector.multi_reduction <add>, %52, %cst_25 [1] : vector<16x32xf32> to vector<16xf32>
    %54 = vector.shape_cast %53 : vector<16xf32> to vector<16x1xf32>
    %cst_26 = arith.constant 3.200000e+01 : f32
    %55 = vector.broadcast %cst_26 : f32 to vector<16x1xf32>
    %56 = arith.divf %54, %55 : vector<16x1xf32>
    %57 = vector.broadcast %49 : vector<16x1xf32> to vector<16x32xf32>
    %58 = arith.subf %43, %57 : vector<16x32xf32>
    %cst_27 = arith.constant 9.99999974E-6 : f32
    %59 = vector.broadcast %cst_27 : f32 to vector<16x1xf32>
    %60 = arith.addf %56, %59 : vector<16x1xf32>
    %61 = math.rsqrt %60 : vector<16x1xf32>
    %62 = vector.broadcast %61 : vector<16x1xf32> to vector<16x32xf32>
    %63 = arith.mulf %58, %62 : vector<16x32xf32>
    %64 = vector.broadcast %44 : vector<1x32xf32> to vector<16x32xf32>
    %65 = arith.mulf %63, %64 : vector<16x32xf32>
    %66 = vector.broadcast %45 : vector<1x32xf32> to vector<16x32xf32>
    %67 = arith.addf %65, %66 : vector<16x32xf32>
    %cst_28 = arith.constant 5.000000e-01 : f32
    %68 = vector.broadcast %cst_28 : f32 to vector<16x32xf32>
    %69 = arith.mulf %68, %67 : vector<16x32xf32>
    %cst_29 = arith.constant 0.707106769 : f32
    %70 = vector.broadcast %cst_29 : f32 to vector<16x32xf32>
    %71 = arith.mulf %67, %70 : vector<16x32xf32>
    %72 = math.erf %71 : vector<16x32xf32>
    %cst_30 = arith.constant 1.000000e+00 : f32
    %73 = vector.broadcast %cst_30 : f32 to vector<16x32xf32>
    %74 = arith.addf %73, %72 : vector<16x32xf32>
    %75 = arith.mulf %69, %74 : vector<16x32xf32>
    %c0_31 = arith.constant 0 : index
    %c0_32 = arith.constant 0 : index
    %c0_33 = arith.constant 0 : index
    %76 = vector.load %arg5[%c0_31, %c0_32, %c0_33] : memref<13x32x32xf32, #tpu.memory_space<vmem>>, vector<1x32x32xf32>
    %77 = vector.shape_cast %76 : vector<1x32x32xf32> to vector<32x32xf32>
    %cst_34 = arith.constant dense<0.000000e+00> : vector<16x32xf32>
    %78 = tpu.matmul %38, %77, %cst_34 {dimension_numbers = #tpu.dot_dimension_numbers<[1], [0], [0], [1], [0, 0, 1, 1], [], []>} : vector<16x32xf32>, vector<32x32xf32>, vector<16x32xf32> -> vector<16x32xf32>
    %c6 = arith.constant 6 : index
    %c0_35 = arith.constant 0 : index
    %79 = vector.load %arg6[%c6, %c0_35] : memref<22x32xf32, #tpu.memory_space<vmem>>, vector<1x32xf32>
    %80 = vector.broadcast %79 : vector<1x32xf32> to vector<16x32xf32>
    %81 = arith.addf %78, %80 : vector<16x32xf32>
    %c1_36 = arith.constant 1 : index
    %c0_37 = arith.constant 0 : index
    %c0_38 = arith.constant 0 : index
    %82 = vector.load %arg5[%c1_36, %c0_37, %c0_38] : memref<13x32x32xf32, #tpu.memory_space<vmem>>, vector<1x32x32xf32>
    %83 = vector.shape_cast %82 : vector<1x32x32xf32> to vector<32x32xf32>
    %cst_39 = arith.constant dense<0.000000e+00> : vector<16x32xf32>
    %84 = tpu.matmul %75, %83, %cst_39 {dimension_numbers = #tpu.dot_dimension_numbers<[1], [0], [0], [1], [0, 0, 1, 1], [], []>} : vector<16x32xf32>, vector<32x32xf32>, vector<16x32xf32> -> vector<16x32xf32>
    %c7 = arith.constant 7 : index
    %c0_40 = arith.constant 0 : index
    %85 = vector.load %arg6[%c7, %c0_40] : memref<22x32xf32, #tpu.memory_space<vmem>>, vector<1x32xf32>
    %86 = vector.broadcast %85 : vector<1x32xf32> to vector<16x32xf32>
    %87 = arith.addf %84, %86 : vector<16x32xf32>
    %c2_41 = arith.constant 2 : index
    %c0_42 = arith.constant 0 : index
    %c0_43 = arith.constant 0 : index
    %88 = vector.load %arg5[%c2_41, %c0_42, %c0_43] : memref<13x32x32xf32, #tpu.memory_space<vmem>>, vector<1x32x32xf32>
    %89 = vector.shape_cast %88 : vector<1x32x32xf32> to vector<32x32xf32>
    %cst_44 = arith.constant dense<0.000000e+00> : vector<16x32xf32>
    %90 = tpu.matmul %75, %89, %cst_44 {dimension_numbers = #tpu.dot_dimension_numbers<[1], [0], [0], [1], [0, 0, 1, 1], [], []>} : vector<16x32xf32>, vector<32x32xf32>, vector<16x32xf32> -> vector<16x32xf32>
    %c8 = arith.constant 8 : index
    %c0_45 = arith.constant 0 : index
    %91 = vector.load %arg6[%c8, %c0_45] : memref<22x32xf32, #tpu.memory_space<vmem>>, vector<1x32xf32>
    %92 = vector.broadcast %91 : vector<1x32xf32> to vector<16x32xf32>
    %93 = arith.addf %90, %92 : vector<16x32xf32>
    %c3_46 = arith.constant 3 : index
    %c0_47 = arith.constant 0 : index
    %c0_48 = arith.constant 0 : index
    %94 = vector.load %arg5[%c3_46, %c0_47, %c0_48] : memref<13x32x32xf32, #tpu.memory_space<vmem>>, vector<1x32x32xf32>
    %95 = vector.shape_cast %94 : vector<1x32x32xf32> to vector<32x32xf32>
    %96 = vector.extract_strided_slice %81 {offsets = [0, 0], sizes = [8, 8], strides = [1, 1]} : vector<16x32xf32> to vector<8x8xf32>
    %97 = vector.extract_strided_slice %87 {offsets = [0, 0], sizes = [8, 8], strides = [1, 1]} : vector<16x32xf32> to vector<8x8xf32>
    %98 = vector.extract_strided_slice %93 {offsets = [0, 0], sizes = [8, 8], strides = [1, 1]} : vector<16x32xf32> to vector<8x8xf32>
    %cst_49 = arith.constant dense<0.000000e+00> : vector<8x8xf32>
    %99 = tpu.matmul %96, %97, %cst_49 {dimension_numbers = #tpu.dot_dimension_numbers<[1], [1], [0], [0], [0, 0, 1, 0], [], []>} : vector<8x8xf32>, vector<8x8xf32>, vector<8x8xf32> -> vector<8x8xf32>
    %cst_50 = arith.constant dense<0xFF800000> : vector<8xf32>
    %100 = vector.multi_reduction <maximumf>, %99, %cst_50 [1] : vector<8x8xf32> to vector<8xf32>
    %101 = vector.shape_cast %100 : vector<8xf32> to vector<8x1xf32>
    %102 = vector.broadcast %101 : vector<8x1xf32> to vector<8x8xf32>
    %103 = arith.subf %99, %102 : vector<8x8xf32>
    %104 = math.exp %103 : vector<8x8xf32>
    %cst_51 = arith.constant dense<0.000000e+00> : vector<8xf32>
    %105 = vector.multi_reduction <add>, %104, %cst_51 [1] : vector<8x8xf32> to vector<8xf32>
    %106 = vector.shape_cast %105 : vector<8xf32> to vector<8x1xf32>
    %cst_52 = arith.constant 1.000000e+00 : f32
    %107 = vector.broadcast %cst_52 : f32 to vector<8x1xf32>
    %108 = arith.divf %107, %106 : vector<8x1xf32>
    %109 = vector.broadcast %108 : vector<8x1xf32> to vector<8x8xf32>
    %110 = arith.mulf %104, %109 : vector<8x8xf32>
    %cst_53 = arith.constant dense<0.000000e+00> : vector<8x8xf32>
    %111 = tpu.matmul %110, %98, %cst_53 {dimension_numbers = #tpu.dot_dimension_numbers<[1], [0], [0], [1], [0, 0, 1, 1], [], []>} : vector<8x8xf32>, vector<8x8xf32>, vector<8x8xf32> -> vector<8x8xf32>
    %112 = vector.extract_strided_slice %95 {offsets = [0, 0], sizes = [8, 32], strides = [1, 1]} : vector<32x32xf32> to vector<8x32xf32>
    %cst_54 = arith.constant dense<0.000000e+00> : vector<8x32xf32>
    %113 = tpu.matmul %111, %112, %cst_54 {dimension_numbers = #tpu.dot_dimension_numbers<[1], [0], [0], [1], [0, 0, 1, 1], [], []>} : vector<8x8xf32>, vector<8x32xf32>, vector<8x32xf32> -> vector<8x32xf32>
    %114 = vector.extract_strided_slice %81 {offsets = [0, 8], sizes = [8, 8], strides = [1, 1]} : vector<16x32xf32> to vector<8x8xf32>
    %115 = vector.extract_strided_slice %87 {offsets = [0, 8], sizes = [8, 8], strides = [1, 1]} : vector<16x32xf32> to vector<8x8xf32>
    %116 = vector.extract_strided_slice %93 {offsets = [0, 8], sizes = [8, 8], strides = [1, 1]} : vector<16x32xf32> to vector<8x8xf32>
    %cst_55 = arith.constant dense<0.000000e+00> : vector<8x8xf32>
    %117 = tpu.matmul %114, %115, %cst_55 {dimension_numbers = #tpu.dot_dimension_numbers<[1], [1], [0], [0], [0, 0, 1, 0], [], []>} : vector<8x8xf32>, vector<8x8xf32>, vector<8x8xf32> -> vector<8x8xf32>
    %cst_56 = arith.constant dense<0xFF800000> : vector<8xf32>
    %118 = vector.multi_reduction <maximumf>, %117, %cst_56 [1] : vector<8x8xf32> to vector<8xf32>
    %119 = vector.shape_cast %118 : vector<8xf32> to vector<8x1xf32>
    %120 = vector.broadcast %119 : vector<8x1xf32> to vector<8x8xf32>
    %121 = arith.subf %117, %120 : vector<8x8xf32>
    %122 = math.exp %121 : vector<8x8xf32>
    %cst_57 = arith.constant dense<0.000000e+00> : vector<8xf32>
    %123 = vector.multi_reduction <add>, %122, %cst_57 [1] : vector<8x8xf32> to vector<8xf32>
    %124 = vector.shape_cast %123 : vector<8xf32> to vector<8x1xf32>
    %cst_58 = arith.constant 1.000000e+00 : f32
    %125 = vector.broadcast %cst_58 : f32 to vector<8x1xf32>
    %126 = arith.divf %125, %124 : vector<8x1xf32>
    %127 = vector.broadcast %126 : vector<8x1xf32> to vector<8x8xf32>
    %128 = arith.mulf %122, %127 : vector<8x8xf32>
    %cst_59 = arith.constant dense<0.000000e+00> : vector<8x8xf32>
    %129 = tpu.matmul %128, %116, %cst_59 {dimension_numbers = #tpu.dot_dimension_numbers<[1], [0], [0], [1], [0, 0, 1, 1], [], []>} : vector<8x8xf32>, vector<8x8xf32>, vector<8x8xf32> -> vector<8x8xf32>
    %130 = vector.extract_strided_slice %95 {offsets = [8, 0], sizes = [8, 32], strides = [1, 1]} : vector<32x32xf32> to vector<8x32xf32>
    %cst_60 = arith.constant dense<0.000000e+00> : vector<8x32xf32>
    %131 = tpu.matmul %129, %130, %cst_60 {dimension_numbers = #tpu.dot_dimension_numbers<[1], [0], [0], [1], [0, 0, 1, 1], [], []>} : vector<8x8xf32>, vector<8x32xf32>, vector<8x32xf32> -> vector<8x32xf32>
    %132 = arith.addf %113, %131 : vector<8x32xf32>
    %133 = vector.extract_strided_slice %81 {offsets = [0, 16], sizes = [8, 8], strides = [1, 1]} : vector<16x32xf32> to vector<8x8xf32>
    %134 = vector.extract_strided_slice %87 {offsets = [0, 16], sizes = [8, 8], strides = [1, 1]} : vector<16x32xf32> to vector<8x8xf32>
    %135 = vector.extract_strided_slice %93 {offsets = [0, 16], sizes = [8, 8], strides = [1, 1]} : vector<16x32xf32> to vector<8x8xf32>
    %cst_61 = arith.constant dense<0.000000e+00> : vector<8x8xf32>
    %136 = tpu.matmul %133, %134, %cst_61 {dimension_numbers = #tpu.dot_dimension_numbers<[1], [1], [0], [0], [0, 0, 1, 0], [], []>} : vector<8x8xf32>, vector<8x8xf32>, vector<8x8xf32> -> vector<8x8xf32>
    %cst_62 = arith.constant dense<0xFF800000> : vector<8xf32>
    %137 = vector.multi_reduction <maximumf>, %136, %cst_62 [1] : vector<8x8xf32> to vector<8xf32>
    %138 = vector.shape_cast %137 : vector<8xf32> to vector<8x1xf32>
    %139 = vector.broadcast %138 : vector<8x1xf32> to vector<8x8xf32>
    %140 = arith.subf %136, %139 : vector<8x8xf32>
    %141 = math.exp %140 : vector<8x8xf32>
    %cst_63 = arith.constant dense<0.000000e+00> : vector<8xf32>
    %142 = vector.multi_reduction <add>, %141, %cst_63 [1] : vector<8x8xf32> to vector<8xf32>
    %143 = vector.shape_cast %142 : vector<8xf32> to vector<8x1xf32>
    %cst_64 = arith.constant 1.000000e+00 : f32
    %144 = vector.broadcast %cst_64 : f32 to vector<8x1xf32>
    %145 = arith.divf %144, %143 : vector<8x1xf32>
    %146 = vector.broadcast %145 : vector<8x1xf32> to vector<8x8xf32>
    %147 = arith.mulf %141, %146 : vector<8x8xf32>
    %cst_65 = arith.constant dense<0.000000e+00> : vector<8x8xf32>
    %148 = tpu.matmul %147, %135, %cst_65 {dimension_numbers = #tpu.dot_dimension_numbers<[1], [0], [0], [1], [0, 0, 1, 1], [], []>} : vector<8x8xf32>, vector<8x8xf32>, vector<8x8xf32> -> vector<8x8xf32>
    %149 = vector.extract_strided_slice %95 {offsets = [16, 0], sizes = [8, 32], strides = [1, 1]} : vector<32x32xf32> to vector<8x32xf32>
    %cst_66 = arith.constant dense<0.000000e+00> : vector<8x32xf32>
    %150 = tpu.matmul %148, %149, %cst_66 {dimension_numbers = #tpu.dot_dimension_numbers<[1], [0], [0], [1], [0, 0, 1, 1], [], []>} : vector<8x8xf32>, vector<8x32xf32>, vector<8x32xf32> -> vector<8x32xf32>
    %151 = arith.addf %132, %150 : vector<8x32xf32>
    %152 = vector.extract_strided_slice %81 {offsets = [0, 24], sizes = [8, 8], strides = [1, 1]} : vector<16x32xf32> to vector<8x8xf32>
    %153 = vector.extract_strided_slice %87 {offsets = [0, 24], sizes = [8, 8], strides = [1, 1]} : vector<16x32xf32> to vector<8x8xf32>
    %154 = vector.extract_strided_slice %93 {offsets = [0, 24], sizes = [8, 8], strides = [1, 1]} : vector<16x32xf32> to vector<8x8xf32>
    %cst_67 = arith.constant dense<0.000000e+00> : vector<8x8xf32>
    %155 = tpu.matmul %152, %153, %cst_67 {dimension_numbers = #tpu.dot_dimension_numbers<[1], [1], [0], [0], [0, 0, 1, 0], [], []>} : vector<8x8xf32>, vector<8x8xf32>, vector<8x8xf32> -> vector<8x8xf32>
    %cst_68 = arith.constant dense<0xFF800000> : vector<8xf32>
    %156 = vector.multi_reduction <maximumf>, %155, %cst_68 [1] : vector<8x8xf32> to vector<8xf32>
    %157 = vector.shape_cast %156 : vector<8xf32> to vector<8x1xf32>
    %158 = vector.broadcast %157 : vector<8x1xf32> to vector<8x8xf32>
    %159 = arith.subf %155, %158 : vector<8x8xf32>
    %160 = math.exp %159 : vector<8x8xf32>
    %cst_69 = arith.constant dense<0.000000e+00> : vector<8xf32>
    %161 = vector.multi_reduction <add>, %160, %cst_69 [1] : vector<8x8xf32> to vector<8xf32>
    %162 = vector.shape_cast %161 : vector<8xf32> to vector<8x1xf32>
    %cst_70 = arith.constant 1.000000e+00 : f32
    %163 = vector.broadcast %cst_70 : f32 to vector<8x1xf32>
    %164 = arith.divf %163, %162 : vector<8x1xf32>
    %165 = vector.broadcast %164 : vector<8x1xf32> to vector<8x8xf32>
    %166 = arith.mulf %160, %165 : vector<8x8xf32>
    %cst_71 = arith.constant dense<0.000000e+00> : vector<8x8xf32>
    %167 = tpu.matmul %166, %154, %cst_71 {dimension_numbers = #tpu.dot_dimension_numbers<[1], [0], [0], [1], [0, 0, 1, 1], [], []>} : vector<8x8xf32>, vector<8x8xf32>, vector<8x8xf32> -> vector<8x8xf32>
    %168 = vector.extract_strided_slice %95 {offsets = [24, 0], sizes = [8, 32], strides = [1, 1]} : vector<32x32xf32> to vector<8x32xf32>
    %cst_72 = arith.constant dense<0.000000e+00> : vector<8x32xf32>
    %169 = tpu.matmul %167, %168, %cst_72 {dimension_numbers = #tpu.dot_dimension_numbers<[1], [0], [0], [1], [0, 0, 1, 1], [], []>} : vector<8x8xf32>, vector<8x32xf32>, vector<8x32xf32> -> vector<8x32xf32>
    %170 = arith.addf %151, %169 : vector<8x32xf32>
    %c0_73 = arith.constant 0 : index
    %c0_74 = arith.constant 0 : index
    %171 = vector.load %arg9[%c0_73, %c0_74] : memref<16x32xf32, #tpu.memory_space<vmem>>, vector<8x32xf32>
    tpu.vector_store %arg9[%c0_73, %c0_74], %170 {strides = array<i32>} : memref<16x32xf32, #tpu.memory_space<vmem>>, vector<8x32xf32>,
    %172 = vector.extract_strided_slice %81 {offsets = [8, 0], sizes = [8, 8], strides = [1, 1]} : vector<16x32xf32> to vector<8x8xf32>
    %173 = vector.extract_strided_slice %87 {offsets = [8, 0], sizes = [8, 8], strides = [1, 1]} : vector<16x32xf32> to vector<8x8xf32>
    %174 = vector.extract_strided_slice %93 {offsets = [8, 0], sizes = [8, 8], strides = [1, 1]} : vector<16x32xf32> to vector<8x8xf32>
    %cst_75 = arith.constant dense<0.000000e+00> : vector<8x8xf32>
    %175 = tpu.matmul %172, %173, %cst_75 {dimension_numbers = #tpu.dot_dimension_numbers<[1], [1], [0], [0], [0, 0, 1, 0], [], []>} : vector<8x8xf32>, vector<8x8xf32>, vector<8x8xf32> -> vector<8x8xf32>
    %cst_76 = arith.constant dense<0xFF800000> : vector<8xf32>
    %176 = vector.multi_reduction <maximumf>, %175, %cst_76 [1] : vector<8x8xf32> to vector<8xf32>
    %177 = vector.shape_cast %176 : vector<8xf32> to vector<8x1xf32>
    %178 = vector.broadcast %177 : vector<8x1xf32> to vector<8x8xf32>
    %179 = arith.subf %175, %178 : vector<8x8xf32>
    %180 = math.exp %179 : vector<8x8xf32>
    %cst_77 = arith.constant dense<0.000000e+00> : vector<8xf32>
    %181 = vector.multi_reduction <add>, %180, %cst_77 [1] : vector<8x8xf32> to vector<8xf32>
    %182 = vector.shape_cast %181 : vector<8xf32> to vector<8x1xf32>
    %cst_78 = arith.constant 1.000000e+00 : f32
    %183 = vector.broadcast %cst_78 : f32 to vector<8x1xf32>
    %184 = arith.divf %183, %182 : vector<8x1xf32>
    %185 = vector.broadcast %184 : vector<8x1xf32> to vector<8x8xf32>
    %186 = arith.mulf %180, %185 : vector<8x8xf32>
    %cst_79 = arith.constant dense<0.000000e+00> : vector<8x8xf32>
    %187 = tpu.matmul %186, %174, %cst_79 {dimension_numbers = #tpu.dot_dimension_numbers<[1], [0], [0], [1], [0, 0, 1, 1], [], []>} : vector<8x8xf32>, vector<8x8xf32>, vector<8x8xf32> -> vector<8x8xf32>
    %188 = vector.extract_strided_slice %95 {offsets = [0, 0], sizes = [8, 32], strides = [1, 1]} : vector<32x32xf32> to vector<8x32xf32>
    %cst_80 = arith.constant dense<0.000000e+00> : vector<8x32xf32>
    %189 = tpu.matmul %187, %188, %cst_80 {dimension_numbers = #tpu.dot_dimension_numbers<[1], [0], [0], [1], [0, 0, 1, 1], [], []>} : vector<8x8xf32>, vector<8x32xf32>, vector<8x32xf32> -> vector<8x32xf32>
    %190 = vector.extract_strided_slice %81 {offsets = [8, 8], sizes = [8, 8], strides = [1, 1]} : vector<16x32xf32> to vector<8x8xf32>
    %191 = vector.extract_strided_slice %87 {offsets = [8, 8], sizes = [8, 8], strides = [1, 1]} : vector<16x32xf32> to vector<8x8xf32>
    %192 = vector.extract_strided_slice %93 {offsets = [8, 8], sizes = [8, 8], strides = [1, 1]} : vector<16x32xf32> to vector<8x8xf32>
    %cst_81 = arith.constant dense<0.000000e+00> : vector<8x8xf32>
    %193 = tpu.matmul %190, %191, %cst_81 {dimension_numbers = #tpu.dot_dimension_numbers<[1], [1], [0], [0], [0, 0, 1, 0], [], []>} : vector<8x8xf32>, vector<8x8xf32>, vector<8x8xf32> -> vector<8x8xf32>
    %cst_82 = arith.constant dense<0xFF800000> : vector<8xf32>
    %194 = vector.multi_reduction <maximumf>, %193, %cst_82 [1] : vector<8x8xf32> to vector<8xf32>
    %195 = vector.shape_cast %194 : vector<8xf32> to vector<8x1xf32>
    %196 = vector.broadcast %195 : vector<8x1xf32> to vector<8x8xf32>
    %197 = arith.subf %193, %196 : vector<8x8xf32>
    %198 = math.exp %197 : vector<8x8xf32>
    %cst_83 = arith.constant dense<0.000000e+00> : vector<8xf32>
    %199 = vector.multi_reduction <add>, %198, %cst_83 [1] : vector<8x8xf32> to vector<8xf32>
    %200 = vector.shape_cast %199 : vector<8xf32> to vector<8x1xf32>
    %cst_84 = arith.constant 1.000000e+00 : f32
    %201 = vector.broadcast %cst_84 : f32 to vector<8x1xf32>
    %202 = arith.divf %201, %200 : vector<8x1xf32>
    %203 = vector.broadcast %202 : vector<8x1xf32> to vector<8x8xf32>
    %204 = arith.mulf %198, %203 : vector<8x8xf32>
    %cst_85 = arith.constant dense<0.000000e+00> : vector<8x8xf32>
    %205 = tpu.matmul %204, %192, %cst_85 {dimension_numbers = #tpu.dot_dimension_numbers<[1], [0], [0], [1], [0, 0, 1, 1], [], []>} : vector<8x8xf32>, vector<8x8xf32>, vector<8x8xf32> -> vector<8x8xf32>
    %206 = vector.extract_strided_slice %95 {offsets = [8, 0], sizes = [8, 32], strides = [1, 1]} : vector<32x32xf32> to vector<8x32xf32>
    %cst_86 = arith.constant dense<0.000000e+00> : vector<8x32xf32>
    %207 = tpu.matmul %205, %206, %cst_86 {dimension_numbers = #tpu.dot_dimension_numbers<[1], [0], [0], [1], [0, 0, 1, 1], [], []>} : vector<8x8xf32>, vector<8x32xf32>, vector<8x32xf32> -> vector<8x32xf32>
    %208 = arith.addf %189, %207 : vector<8x32xf32>
    %209 = vector.extract_strided_slice %81 {offsets = [8, 16], sizes = [8, 8], strides = [1, 1]} : vector<16x32xf32> to vector<8x8xf32>
    %210 = vector.extract_strided_slice %87 {offsets = [8, 16], sizes = [8, 8], strides = [1, 1]} : vector<16x32xf32> to vector<8x8xf32>
    %211 = vector.extract_strided_slice %93 {offsets = [8, 16], sizes = [8, 8], strides = [1, 1]} : vector<16x32xf32> to vector<8x8xf32>
    %cst_87 = arith.constant dense<0.000000e+00> : vector<8x8xf32>
    %212 = tpu.matmul %209, %210, %cst_87 {dimension_numbers = #tpu.dot_dimension_numbers<[1], [1], [0], [0], [0, 0, 1, 0], [], []>} : vector<8x8xf32>, vector<8x8xf32>, vector<8x8xf32> -> vector<8x8xf32>
    %cst_88 = arith.constant dense<0xFF800000> : vector<8xf32>
    %213 = vector.multi_reduction <maximumf>, %212, %cst_88 [1] : vector<8x8xf32> to vector<8xf32>
    %214 = vector.shape_cast %213 : vector<8xf32> to vector<8x1xf32>
    %215 = vector.broadcast %214 : vector<8x1xf32> to vector<8x8xf32>
    %216 = arith.subf %212, %215 : vector<8x8xf32>
    %217 = math.exp %216 : vector<8x8xf32>
    %cst_89 = arith.constant dense<0.000000e+00> : vector<8xf32>
    %218 = vector.multi_reduction <add>, %217, %cst_89 [1] : vector<8x8xf32> to vector<8xf32>
    %219 = vector.shape_cast %218 : vector<8xf32> to vector<8x1xf32>
    %cst_90 = arith.constant 1.000000e+00 : f32
    %220 = vector.broadcast %cst_90 : f32 to vector<8x1xf32>
    %221 = arith.divf %220, %219 : vector<8x1xf32>
    %222 = vector.broadcast %221 : vector<8x1xf32> to vector<8x8xf32>
    %223 = arith.mulf %217, %222 : vector<8x8xf32>
    %cst_91 = arith.constant dense<0.000000e+00> : vector<8x8xf32>
    %224 = tpu.matmul %223, %211, %cst_91 {dimension_numbers = #tpu.dot_dimension_numbers<[1], [0], [0], [1], [0, 0, 1, 1], [], []>} : vector<8x8xf32>, vector<8x8xf32>, vector<8x8xf32> -> vector<8x8xf32>
    %225 = vector.extract_strided_slice %95 {offsets = [16, 0], sizes = [8, 32], strides = [1, 1]} : vector<32x32xf32> to vector<8x32xf32>
    %cst_92 = arith.constant dense<0.000000e+00> : vector<8x32xf32>
    %226 = tpu.matmul %224, %225, %cst_92 {dimension_numbers = #tpu.dot_dimension_numbers<[1], [0], [0], [1], [0, 0, 1, 1], [], []>} : vector<8x8xf32>, vector<8x32xf32>, vector<8x32xf32> -> vector<8x32xf32>
    %227 = arith.addf %208, %226 : vector<8x32xf32>
    %228 = vector.extract_strided_slice %81 {offsets = [8, 24], sizes = [8, 8], strides = [1, 1]} : vector<16x32xf32> to vector<8x8xf32>
    %229 = vector.extract_strided_slice %87 {offsets = [8, 24], sizes = [8, 8], strides = [1, 1]} : vector<16x32xf32> to vector<8x8xf32>
    %230 = vector.extract_strided_slice %93 {offsets = [8, 24], sizes = [8, 8], strides = [1, 1]} : vector<16x32xf32> to vector<8x8xf32>
    %cst_93 = arith.constant dense<0.000000e+00> : vector<8x8xf32>
    %231 = tpu.matmul %228, %229, %cst_93 {dimension_numbers = #tpu.dot_dimension_numbers<[1], [1], [0], [0], [0, 0, 1, 0], [], []>} : vector<8x8xf32>, vector<8x8xf32>, vector<8x8xf32> -> vector<8x8xf32>
    %cst_94 = arith.constant dense<0xFF800000> : vector<8xf32>
    %232 = vector.multi_reduction <maximumf>, %231, %cst_94 [1] : vector<8x8xf32> to vector<8xf32>
    %233 = vector.shape_cast %232 : vector<8xf32> to vector<8x1xf32>
    %234 = vector.broadcast %233 : vector<8x1xf32> to vector<8x8xf32>
    %235 = arith.subf %231, %234 : vector<8x8xf32>
    %236 = math.exp %235 : vector<8x8xf32>
    %cst_95 = arith.constant dense<0.000000e+00> : vector<8xf32>
    %237 = vector.multi_reduction <add>, %236, %cst_95 [1] : vector<8x8xf32> to vector<8xf32>
    %238 = vector.shape_cast %237 : vector<8xf32> to vector<8x1xf32>
    %cst_96 = arith.constant 1.000000e+00 : f32
    %239 = vector.broadcast %cst_96 : f32 to vector<8x1xf32>
    %240 = arith.divf %239, %238 : vector<8x1xf32>
    %241 = vector.broadcast %240 : vector<8x1xf32> to vector<8x8xf32>
    %242 = arith.mulf %236, %241 : vector<8x8xf32>
    %cst_97 = arith.constant dense<0.000000e+00> : vector<8x8xf32>
    %243 = tpu.matmul %242, %230, %cst_97 {dimension_numbers = #tpu.dot_dimension_numbers<[1], [0], [0], [1], [0, 0, 1, 1], [], []>} : vector<8x8xf32>, vector<8x8xf32>, vector<8x8xf32> -> vector<8x8xf32>
    %244 = vector.extract_strided_slice %95 {offsets = [24, 0], sizes = [8, 32], strides = [1, 1]} : vector<32x32xf32> to vector<8x32xf32>
    %cst_98 = arith.constant dense<0.000000e+00> : vector<8x32xf32>
    %245 = tpu.matmul %243, %244, %cst_98 {dimension_numbers = #tpu.dot_dimension_numbers<[1], [0], [0], [1], [0, 0, 1, 1], [], []>} : vector<8x8xf32>, vector<8x32xf32>, vector<8x32xf32> -> vector<8x32xf32>
    %246 = arith.addf %227, %245 : vector<8x32xf32>
    %c8_99 = arith.constant 8 : index
    %c0_100 = arith.constant 0 : index
    %247 = vector.load %arg9[%c8_99, %c0_100] : memref<16x32xf32, #tpu.memory_space<vmem>>, vector<8x32xf32>
    tpu.vector_store %arg9[%c8_99, %c0_100], %246 {strides = array<i32>} : memref<16x32xf32, #tpu.memory_space<vmem>>, vector<8x32xf32>,
    %c4_101 = arith.constant 4 : index
    %c0_102 = arith.constant 0 : index
    %c0_103 = arith.constant 0 : index
    %248 = vector.load %arg5[%c4_101, %c0_102, %c0_103] : memref<13x32x32xf32, #tpu.memory_space<vmem>>, vector<1x32x32xf32>
    %249 = vector.shape_cast %248 : vector<1x32x32xf32> to vector<32x32xf32>
    %cst_104 = arith.constant dense<0.000000e+00> : vector<16x32xf32>
    %250 = tpu.matmul %75, %249, %cst_104 {dimension_numbers = #tpu.dot_dimension_numbers<[1], [0], [0], [1], [0, 0, 1, 1], [], []>} : vector<16x32xf32>, vector<32x32xf32>, vector<16x32xf32> -> vector<16x32xf32>
    %c10 = arith.constant 10 : index
    %c0_105 = arith.constant 0 : index
    %251 = vector.load %arg6[%c10, %c0_105] : memref<22x32xf32, #tpu.memory_space<vmem>>, vector<1x32xf32>
    %252 = vector.broadcast %251 : vector<1x32xf32> to vector<16x32xf32>
    %253 = arith.addf %250, %252 : vector<16x32xf32>
    %c5_106 = arith.constant 5 : index
    %c0_107 = arith.constant 0 : index
    %c0_108 = arith.constant 0 : index
    %254 = vector.load %arg5[%c5_106, %c0_107, %c0_108] : memref<13x32x32xf32, #tpu.memory_space<vmem>>, vector<1x32x32xf32>
    %255 = vector.shape_cast %254 : vector<1x32x32xf32> to vector<32x32xf32>
    %cst_109 = arith.constant dense<0.000000e+00> : vector<16x32xf32>
    %256 = tpu.matmul %38, %255, %cst_109 {dimension_numbers = #tpu.dot_dimension_numbers<[1], [0], [0], [1], [0, 0, 1, 1], [], []>} : vector<16x32xf32>, vector<32x32xf32>, vector<16x32xf32> -> vector<16x32xf32>
    %c11 = arith.constant 11 : index
    %c0_110 = arith.constant 0 : index
    %257 = vector.load %arg6[%c11, %c0_110] : memref<22x32xf32, #tpu.memory_space<vmem>>, vector<1x32xf32>
    %258 = vector.broadcast %257 : vector<1x32xf32> to vector<16x32xf32>
    %259 = arith.addf %256, %258 : vector<16x32xf32>
    %c6_111 = arith.constant 6 : index
    %c0_112 = arith.constant 0 : index
    %c0_113 = arith.constant 0 : index
    %260 = vector.load %arg5[%c6_111, %c0_112, %c0_113] : memref<13x32x32xf32, #tpu.memory_space<vmem>>, vector<1x32x32xf32>
    %261 = vector.shape_cast %260 : vector<1x32x32xf32> to vector<32x32xf32>
    %cst_114 = arith.constant dense<0.000000e+00> : vector<16x32xf32>
    %262 = tpu.matmul %38, %261, %cst_114 {dimension_numbers = #tpu.dot_dimension_numbers<[1], [0], [0], [1], [0, 0, 1, 1], [], []>} : vector<16x32xf32>, vector<32x32xf32>, vector<16x32xf32> -> vector<16x32xf32>
    %c12 = arith.constant 12 : index
    %c0_115 = arith.constant 0 : index
    %263 = vector.load %arg6[%c12, %c0_115] : memref<22x32xf32, #tpu.memory_space<vmem>>, vector<1x32xf32>
    %264 = vector.broadcast %263 : vector<1x32xf32> to vector<16x32xf32>
    %265 = arith.addf %262, %264 : vector<16x32xf32>
    %c7_116 = arith.constant 7 : index
    %c0_117 = arith.constant 0 : index
    %c0_118 = arith.constant 0 : index
    %266 = vector.load %arg5[%c7_116, %c0_117, %c0_118] : memref<13x32x32xf32, #tpu.memory_space<vmem>>, vector<1x32x32xf32>
    %267 = vector.shape_cast %266 : vector<1x32x32xf32> to vector<32x32xf32>
    %268 = vector.extract_strided_slice %253 {offsets = [0, 0], sizes = [8, 8], strides = [1, 1]} : vector<16x32xf32> to vector<8x8xf32>
    %269 = vector.extract_strided_slice %259 {offsets = [0, 0], sizes = [8, 8], strides = [1, 1]} : vector<16x32xf32> to vector<8x8xf32>
    %270 = vector.extract_strided_slice %265 {offsets = [0, 0], sizes = [8, 8], strides = [1, 1]} : vector<16x32xf32> to vector<8x8xf32>
    %cst_119 = arith.constant dense<0.000000e+00> : vector<8x8xf32>
    %271 = tpu.matmul %268, %269, %cst_119 {dimension_numbers = #tpu.dot_dimension_numbers<[1], [1], [0], [0], [0, 0, 1, 0], [], []>} : vector<8x8xf32>, vector<8x8xf32>, vector<8x8xf32> -> vector<8x8xf32>
    %cst_120 = arith.constant dense<0xFF800000> : vector<8xf32>
    %272 = vector.multi_reduction <maximumf>, %271, %cst_120 [1] : vector<8x8xf32> to vector<8xf32>
    %273 = vector.shape_cast %272 : vector<8xf32> to vector<8x1xf32>
    %274 = vector.broadcast %273 : vector<8x1xf32> to vector<8x8xf32>
    %275 = arith.subf %271, %274 : vector<8x8xf32>
    %276 = math.exp %275 : vector<8x8xf32>
    %cst_121 = arith.constant dense<0.000000e+00> : vector<8xf32>
    %277 = vector.multi_reduction <add>, %276, %cst_121 [1] : vector<8x8xf32> to vector<8xf32>
    %278 = vector.shape_cast %277 : vector<8xf32> to vector<8x1xf32>
    %cst_122 = arith.constant 1.000000e+00 : f32
    %279 = vector.broadcast %cst_122 : f32 to vector<8x1xf32>
    %280 = arith.divf %279, %278 : vector<8x1xf32>
    %281 = vector.broadcast %280 : vector<8x1xf32> to vector<8x8xf32>
    %282 = arith.mulf %276, %281 : vector<8x8xf32>
    %cst_123 = arith.constant dense<0.000000e+00> : vector<8x8xf32>
    %283 = tpu.matmul %282, %270, %cst_123 {dimension_numbers = #tpu.dot_dimension_numbers<[1], [0], [0], [1], [0, 0, 1, 1], [], []>} : vector<8x8xf32>, vector<8x8xf32>, vector<8x8xf32> -> vector<8x8xf32>
    %284 = vector.extract_strided_slice %267 {offsets = [0, 0], sizes = [8, 32], strides = [1, 1]} : vector<32x32xf32> to vector<8x32xf32>
    %cst_124 = arith.constant dense<0.000000e+00> : vector<8x32xf32>
    %285 = tpu.matmul %283, %284, %cst_124 {dimension_numbers = #tpu.dot_dimension_numbers<[1], [0], [0], [1], [0, 0, 1, 1], [], []>} : vector<8x8xf32>, vector<8x32xf32>, vector<8x32xf32> -> vector<8x32xf32>
    %286 = vector.extract_strided_slice %253 {offsets = [0, 8], sizes = [8, 8], strides = [1, 1]} : vector<16x32xf32> to vector<8x8xf32>
    %287 = vector.extract_strided_slice %259 {offsets = [0, 8], sizes = [8, 8], strides = [1, 1]} : vector<16x32xf32> to vector<8x8xf32>
    %288 = vector.extract_strided_slice %265 {offsets = [0, 8], sizes = [8, 8], strides = [1, 1]} : vector<16x32xf32> to vector<8x8xf32>
    %cst_125 = arith.constant dense<0.000000e+00> : vector<8x8xf32>
    %289 = tpu.matmul %286, %287, %cst_125 {dimension_numbers = #tpu.dot_dimension_numbers<[1], [1], [0], [0], [0, 0, 1, 0], [], []>} : vector<8x8xf32>, vector<8x8xf32>, vector<8x8xf32> -> vector<8x8xf32>
    %cst_126 = arith.constant dense<0xFF800000> : vector<8xf32>
    %290 = vector.multi_reduction <maximumf>, %289, %cst_126 [1] : vector<8x8xf32> to vector<8xf32>
    %291 = vector.shape_cast %290 : vector<8xf32> to vector<8x1xf32>
    %292 = vector.broadcast %291 : vector<8x1xf32> to vector<8x8xf32>
    %293 = arith.subf %289, %292 : vector<8x8xf32>
    %294 = math.exp %293 : vector<8x8xf32>
    %cst_127 = arith.constant dense<0.000000e+00> : vector<8xf32>
    %295 = vector.multi_reduction <add>, %294, %cst_127 [1] : vector<8x8xf32> to vector<8xf32>
    %296 = vector.shape_cast %295 : vector<8xf32> to vector<8x1xf32>
    %cst_128 = arith.constant 1.000000e+00 : f32
    %297 = vector.broadcast %cst_128 : f32 to vector<8x1xf32>
    %298 = arith.divf %297, %296 : vector<8x1xf32>
    %299 = vector.broadcast %298 : vector<8x1xf32> to vector<8x8xf32>
    %300 = arith.mulf %294, %299 : vector<8x8xf32>
    %cst_129 = arith.constant dense<0.000000e+00> : vector<8x8xf32>
    %301 = tpu.matmul %300, %288, %cst_129 {dimension_numbers = #tpu.dot_dimension_numbers<[1], [0], [0], [1], [0, 0, 1, 1], [], []>} : vector<8x8xf32>, vector<8x8xf32>, vector<8x8xf32> -> vector<8x8xf32>
    %302 = vector.extract_strided_slice %267 {offsets = [8, 0], sizes = [8, 32], strides = [1, 1]} : vector<32x32xf32> to vector<8x32xf32>
    %cst_130 = arith.constant dense<0.000000e+00> : vector<8x32xf32>
    %303 = tpu.matmul %301, %302, %cst_130 {dimension_numbers = #tpu.dot_dimension_numbers<[1], [0], [0], [1], [0, 0, 1, 1], [], []>} : vector<8x8xf32>, vector<8x32xf32>, vector<8x32xf32> -> vector<8x32xf32>
    %304 = arith.addf %285, %303 : vector<8x32xf32>
    %305 = vector.extract_strided_slice %253 {offsets = [0, 16], sizes = [8, 8], strides = [1, 1]} : vector<16x32xf32> to vector<8x8xf32>
    %306 = vector.extract_strided_slice %259 {offsets = [0, 16], sizes = [8, 8], strides = [1, 1]} : vector<16x32xf32> to vector<8x8xf32>
    %307 = vector.extract_strided_slice %265 {offsets = [0, 16], sizes = [8, 8], strides = [1, 1]} : vector<16x32xf32> to vector<8x8xf32>
    %cst_131 = arith.constant dense<0.000000e+00> : vector<8x8xf32>
    %308 = tpu.matmul %305, %306, %cst_131 {dimension_numbers = #tpu.dot_dimension_numbers<[1], [1], [0], [0], [0, 0, 1, 0], [], []>} : vector<8x8xf32>, vector<8x8xf32>, vector<8x8xf32> -> vector<8x8xf32>
    %cst_132 = arith.constant dense<0xFF800000> : vector<8xf32>
    %309 = vector.multi_reduction <maximumf>, %308, %cst_132 [1] : vector<8x8xf32> to vector<8xf32>
    %310 = vector.shape_cast %309 : vector<8xf32> to vector<8x1xf32>
    %311 = vector.broadcast %310 : vector<8x1xf32> to vector<8x8xf32>
    %312 = arith.subf %308, %311 : vector<8x8xf32>
    %313 = math.exp %312 : vector<8x8xf32>
    %cst_133 = arith.constant dense<0.000000e+00> : vector<8xf32>
    %314 = vector.multi_reduction <add>, %313, %cst_133 [1] : vector<8x8xf32> to vector<8xf32>
    %315 = vector.shape_cast %314 : vector<8xf32> to vector<8x1xf32>
    %cst_134 = arith.constant 1.000000e+00 : f32
    %316 = vector.broadcast %cst_134 : f32 to vector<8x1xf32>
    %317 = arith.divf %316, %315 : vector<8x1xf32>
    %318 = vector.broadcast %317 : vector<8x1xf32> to vector<8x8xf32>
    %319 = arith.mulf %313, %318 : vector<8x8xf32>
    %cst_135 = arith.constant dense<0.000000e+00> : vector<8x8xf32>
    %320 = tpu.matmul %319, %307, %cst_135 {dimension_numbers = #tpu.dot_dimension_numbers<[1], [0], [0], [1], [0, 0, 1, 1], [], []>} : vector<8x8xf32>, vector<8x8xf32>, vector<8x8xf32> -> vector<8x8xf32>
    %321 = vector.extract_strided_slice %267 {offsets = [16, 0], sizes = [8, 32], strides = [1, 1]} : vector<32x32xf32> to vector<8x32xf32>
    %cst_136 = arith.constant dense<0.000000e+00> : vector<8x32xf32>
    %322 = tpu.matmul %320, %321, %cst_136 {dimension_numbers = #tpu.dot_dimension_numbers<[1], [0], [0], [1], [0, 0, 1, 1], [], []>} : vector<8x8xf32>, vector<8x32xf32>, vector<8x32xf32> -> vector<8x32xf32>
    %323 = arith.addf %304, %322 : vector<8x32xf32>
    %324 = vector.extract_strided_slice %253 {offsets = [0, 24], sizes = [8, 8], strides = [1, 1]} : vector<16x32xf32> to vector<8x8xf32>
    %325 = vector.extract_strided_slice %259 {offsets = [0, 24], sizes = [8, 8], strides = [1, 1]} : vector<16x32xf32> to vector<8x8xf32>
    %326 = vector.extract_strided_slice %265 {offsets = [0, 24], sizes = [8, 8], strides = [1, 1]} : vector<16x32xf32> to vector<8x8xf32>
    %cst_137 = arith.constant dense<0.000000e+00> : vector<8x8xf32>
    %327 = tpu.matmul %324, %325, %cst_137 {dimension_numbers = #tpu.dot_dimension_numbers<[1], [1], [0], [0], [0, 0, 1, 0], [], []>} : vector<8x8xf32>, vector<8x8xf32>, vector<8x8xf32> -> vector<8x8xf32>
    %cst_138 = arith.constant dense<0xFF800000> : vector<8xf32>
    %328 = vector.multi_reduction <maximumf>, %327, %cst_138 [1] : vector<8x8xf32> to vector<8xf32>
    %329 = vector.shape_cast %328 : vector<8xf32> to vector<8x1xf32>
    %330 = vector.broadcast %329 : vector<8x1xf32> to vector<8x8xf32>
    %331 = arith.subf %327, %330 : vector<8x8xf32>
    %332 = math.exp %331 : vector<8x8xf32>
    %cst_139 = arith.constant dense<0.000000e+00> : vector<8xf32>
    %333 = vector.multi_reduction <add>, %332, %cst_139 [1] : vector<8x8xf32> to vector<8xf32>
    %334 = vector.shape_cast %333 : vector<8xf32> to vector<8x1xf32>
    %cst_140 = arith.constant 1.000000e+00 : f32
    %335 = vector.broadcast %cst_140 : f32 to vector<8x1xf32>
    %336 = arith.divf %335, %334 : vector<8x1xf32>
    %337 = vector.broadcast %336 : vector<8x1xf32> to vector<8x8xf32>
    %338 = arith.mulf %332, %337 : vector<8x8xf32>
    %cst_141 = arith.constant dense<0.000000e+00> : vector<8x8xf32>
    %339 = tpu.matmul %338, %326, %cst_141 {dimension_numbers = #tpu.dot_dimension_numbers<[1], [0], [0], [1], [0, 0, 1, 1], [], []>} : vector<8x8xf32>, vector<8x8xf32>, vector<8x8xf32> -> vector<8x8xf32>
    %340 = vector.extract_strided_slice %267 {offsets = [24, 0], sizes = [8, 32], strides = [1, 1]} : vector<32x32xf32> to vector<8x32xf32>
    %cst_142 = arith.constant dense<0.000000e+00> : vector<8x32xf32>
    %341 = tpu.matmul %339, %340, %cst_142 {dimension_numbers = #tpu.dot_dimension_numbers<[1], [0], [0], [1], [0, 0, 1, 1], [], []>} : vector<8x8xf32>, vector<8x32xf32>, vector<8x32xf32> -> vector<8x32xf32>
    %342 = arith.addf %323, %341 : vector<8x32xf32>
    %c0_143 = arith.constant 0 : index
    %c0_144 = arith.constant 0 : index
    %343 = vector.load %arg10[%c0_143, %c0_144] : memref<16x32xf32, #tpu.memory_space<vmem>>, vector<8x32xf32>
    tpu.vector_store %arg10[%c0_143, %c0_144], %342 {strides = array<i32>} : memref<16x32xf32, #tpu.memory_space<vmem>>, vector<8x32xf32>,
    %344 = vector.extract_strided_slice %253 {offsets = [8, 0], sizes = [8, 8], strides = [1, 1]} : vector<16x32xf32> to vector<8x8xf32>
    %345 = vector.extract_strided_slice %259 {offsets = [8, 0], sizes = [8, 8], strides = [1, 1]} : vector<16x32xf32> to vector<8x8xf32>
    %346 = vector.extract_strided_slice %265 {offsets = [8, 0], sizes = [8, 8], strides = [1, 1]} : vector<16x32xf32> to vector<8x8xf32>
    %cst_145 = arith.constant dense<0.000000e+00> : vector<8x8xf32>
    %347 = tpu.matmul %344, %345, %cst_145 {dimension_numbers = #tpu.dot_dimension_numbers<[1], [1], [0], [0], [0, 0, 1, 0], [], []>} : vector<8x8xf32>, vector<8x8xf32>, vector<8x8xf32> -> vector<8x8xf32>
    %cst_146 = arith.constant dense<0xFF800000> : vector<8xf32>
    %348 = vector.multi_reduction <maximumf>, %347, %cst_146 [1] : vector<8x8xf32> to vector<8xf32>
    %349 = vector.shape_cast %348 : vector<8xf32> to vector<8x1xf32>
    %350 = vector.broadcast %349 : vector<8x1xf32> to vector<8x8xf32>
    %351 = arith.subf %347, %350 : vector<8x8xf32>
    %352 = math.exp %351 : vector<8x8xf32>
    %cst_147 = arith.constant dense<0.000000e+00> : vector<8xf32>
    %353 = vector.multi_reduction <add>, %352, %cst_147 [1] : vector<8x8xf32> to vector<8xf32>
    %354 = vector.shape_cast %353 : vector<8xf32> to vector<8x1xf32>
    %cst_148 = arith.constant 1.000000e+00 : f32
    %355 = vector.broadcast %cst_148 : f32 to vector<8x1xf32>
    %356 = arith.divf %355, %354 : vector<8x1xf32>
    %357 = vector.broadcast %356 : vector<8x1xf32> to vector<8x8xf32>
    %358 = arith.mulf %352, %357 : vector<8x8xf32>
    %cst_149 = arith.constant dense<0.000000e+00> : vector<8x8xf32>
    %359 = tpu.matmul %358, %346, %cst_149 {dimension_numbers = #tpu.dot_dimension_numbers<[1], [0], [0], [1], [0, 0, 1, 1], [], []>} : vector<8x8xf32>, vector<8x8xf32>, vector<8x8xf32> -> vector<8x8xf32>
    %360 = vector.extract_strided_slice %267 {offsets = [0, 0], sizes = [8, 32], strides = [1, 1]} : vector<32x32xf32> to vector<8x32xf32>
    %cst_150 = arith.constant dense<0.000000e+00> : vector<8x32xf32>
    %361 = tpu.matmul %359, %360, %cst_150 {dimension_numbers = #tpu.dot_dimension_numbers<[1], [0], [0], [1], [0, 0, 1, 1], [], []>} : vector<8x8xf32>, vector<8x32xf32>, vector<8x32xf32> -> vector<8x32xf32>
    %362 = vector.extract_strided_slice %253 {offsets = [8, 8], sizes = [8, 8], strides = [1, 1]} : vector<16x32xf32> to vector<8x8xf32>
    %363 = vector.extract_strided_slice %259 {offsets = [8, 8], sizes = [8, 8], strides = [1, 1]} : vector<16x32xf32> to vector<8x8xf32>
    %364 = vector.extract_strided_slice %265 {offsets = [8, 8], sizes = [8, 8], strides = [1, 1]} : vector<16x32xf32> to vector<8x8xf32>
    %cst_151 = arith.constant dense<0.000000e+00> : vector<8x8xf32>
    %365 = tpu.matmul %362, %363, %cst_151 {dimension_numbers = #tpu.dot_dimension_numbers<[1], [1], [0], [0], [0, 0, 1, 0], [], []>} : vector<8x8xf32>, vector<8x8xf32>, vector<8x8xf32> -> vector<8x8xf32>
    %cst_152 = arith.constant dense<0xFF800000> : vector<8xf32>
    %366 = vector.multi_reduction <maximumf>, %365, %cst_152 [1] : vector<8x8xf32> to vector<8xf32>
    %367 = vector.shape_cast %366 : vector<8xf32> to vector<8x1xf32>
    %368 = vector.broadcast %367 : vector<8x1xf32> to vector<8x8xf32>
    %369 = arith.subf %365, %368 : vector<8x8xf32>
    %370 = math.exp %369 : vector<8x8xf32>
    %cst_153 = arith.constant dense<0.000000e+00> : vector<8xf32>
    %371 = vector.multi_reduction <add>, %370, %cst_153 [1] : vector<8x8xf32> to vector<8xf32>
    %372 = vector.shape_cast %371 : vector<8xf32> to vector<8x1xf32>
    %cst_154 = arith.constant 1.000000e+00 : f32
    %373 = vector.broadcast %cst_154 : f32 to vector<8x1xf32>
    %374 = arith.divf %373, %372 : vector<8x1xf32>
    %375 = vector.broadcast %374 : vector<8x1xf32> to vector<8x8xf32>
    %376 = arith.mulf %370, %375 : vector<8x8xf32>
    %cst_155 = arith.constant dense<0.000000e+00> : vector<8x8xf32>
    %377 = tpu.matmul %376, %364, %cst_155 {dimension_numbers = #tpu.dot_dimension_numbers<[1], [0], [0], [1], [0, 0, 1, 1], [], []>} : vector<8x8xf32>, vector<8x8xf32>, vector<8x8xf32> -> vector<8x8xf32>
    %378 = vector.extract_strided_slice %267 {offsets = [8, 0], sizes = [8, 32], strides = [1, 1]} : vector<32x32xf32> to vector<8x32xf32>
    %cst_156 = arith.constant dense<0.000000e+00> : vector<8x32xf32>
    %379 = tpu.matmul %377, %378, %cst_156 {dimension_numbers = #tpu.dot_dimension_numbers<[1], [0], [0], [1], [0, 0, 1, 1], [], []>} : vector<8x8xf32>, vector<8x32xf32>, vector<8x32xf32> -> vector<8x32xf32>
    %380 = arith.addf %361, %379 : vector<8x32xf32>
    %381 = vector.extract_strided_slice %253 {offsets = [8, 16], sizes = [8, 8], strides = [1, 1]} : vector<16x32xf32> to vector<8x8xf32>
    %382 = vector.extract_strided_slice %259 {offsets = [8, 16], sizes = [8, 8], strides = [1, 1]} : vector<16x32xf32> to vector<8x8xf32>
    %383 = vector.extract_strided_slice %265 {offsets = [8, 16], sizes = [8, 8], strides = [1, 1]} : vector<16x32xf32> to vector<8x8xf32>
    %cst_157 = arith.constant dense<0.000000e+00> : vector<8x8xf32>
    %384 = tpu.matmul %381, %382, %cst_157 {dimension_numbers = #tpu.dot_dimension_numbers<[1], [1], [0], [0], [0, 0, 1, 0], [], []>} : vector<8x8xf32>, vector<8x8xf32>, vector<8x8xf32> -> vector<8x8xf32>
    %cst_158 = arith.constant dense<0xFF800000> : vector<8xf32>
    %385 = vector.multi_reduction <maximumf>, %384, %cst_158 [1] : vector<8x8xf32> to vector<8xf32>
    %386 = vector.shape_cast %385 : vector<8xf32> to vector<8x1xf32>
    %387 = vector.broadcast %386 : vector<8x1xf32> to vector<8x8xf32>
    %388 = arith.subf %384, %387 : vector<8x8xf32>
    %389 = math.exp %388 : vector<8x8xf32>
    %cst_159 = arith.constant dense<0.000000e+00> : vector<8xf32>
    %390 = vector.multi_reduction <add>, %389, %cst_159 [1] : vector<8x8xf32> to vector<8xf32>
    %391 = vector.shape_cast %390 : vector<8xf32> to vector<8x1xf32>
    %cst_160 = arith.constant 1.000000e+00 : f32
    %392 = vector.broadcast %cst_160 : f32 to vector<8x1xf32>
    %393 = arith.divf %392, %391 : vector<8x1xf32>
    %394 = vector.broadcast %393 : vector<8x1xf32> to vector<8x8xf32>
    %395 = arith.mulf %389, %394 : vector<8x8xf32>
    %cst_161 = arith.constant dense<0.000000e+00> : vector<8x8xf32>
    %396 = tpu.matmul %395, %383, %cst_161 {dimension_numbers = #tpu.dot_dimension_numbers<[1], [0], [0], [1], [0, 0, 1, 1], [], []>} : vector<8x8xf32>, vector<8x8xf32>, vector<8x8xf32> -> vector<8x8xf32>
    %397 = vector.extract_strided_slice %267 {offsets = [16, 0], sizes = [8, 32], strides = [1, 1]} : vector<32x32xf32> to vector<8x32xf32>
    %cst_162 = arith.constant dense<0.000000e+00> : vector<8x32xf32>
    %398 = tpu.matmul %396, %397, %cst_162 {dimension_numbers = #tpu.dot_dimension_numbers<[1], [0], [0], [1], [0, 0, 1, 1], [], []>} : vector<8x8xf32>, vector<8x32xf32>, vector<8x32xf32> -> vector<8x32xf32>
    %399 = arith.addf %380, %398 : vector<8x32xf32>
    %400 = vector.extract_strided_slice %253 {offsets = [8, 24], sizes = [8, 8], strides = [1, 1]} : vector<16x32xf32> to vector<8x8xf32>
    %401 = vector.extract_strided_slice %259 {offsets = [8, 24], sizes = [8, 8], strides = [1, 1]} : vector<16x32xf32> to vector<8x8xf32>
    %402 = vector.extract_strided_slice %265 {offsets = [8, 24], sizes = [8, 8], strides = [1, 1]} : vector<16x32xf32> to vector<8x8xf32>
    %cst_163 = arith.constant dense<0.000000e+00> : vector<8x8xf32>
    %403 = tpu.matmul %400, %401, %cst_163 {dimension_numbers = #tpu.dot_dimension_numbers<[1], [1], [0], [0], [0, 0, 1, 0], [], []>} : vector<8x8xf32>, vector<8x8xf32>, vector<8x8xf32> -> vector<8x8xf32>
    %cst_164 = arith.constant dense<0xFF800000> : vector<8xf32>
    %404 = vector.multi_reduction <maximumf>, %403, %cst_164 [1] : vector<8x8xf32> to vector<8xf32>
    %405 = vector.shape_cast %404 : vector<8xf32> to vector<8x1xf32>
    %406 = vector.broadcast %405 : vector<8x1xf32> to vector<8x8xf32>
    %407 = arith.subf %403, %406 : vector<8x8xf32>
    %408 = math.exp %407 : vector<8x8xf32>
    %cst_165 = arith.constant dense<0.000000e+00> : vector<8xf32>
    %409 = vector.multi_reduction <add>, %408, %cst_165 [1] : vector<8x8xf32> to vector<8xf32>
    %410 = vector.shape_cast %409 : vector<8xf32> to vector<8x1xf32>
    %cst_166 = arith.constant 1.000000e+00 : f32
    %411 = vector.broadcast %cst_166 : f32 to vector<8x1xf32>
    %412 = arith.divf %411, %410 : vector<8x1xf32>
    %413 = vector.broadcast %412 : vector<8x1xf32> to vector<8x8xf32>
    %414 = arith.mulf %408, %413 : vector<8x8xf32>
    %cst_167 = arith.constant dense<0.000000e+00> : vector<8x8xf32>
    %415 = tpu.matmul %414, %402, %cst_167 {dimension_numbers = #tpu.dot_dimension_numbers<[1], [0], [0], [1], [0, 0, 1, 1], [], []>} : vector<8x8xf32>, vector<8x8xf32>, vector<8x8xf32> -> vector<8x8xf32>
    %416 = vector.extract_strided_slice %267 {offsets = [24, 0], sizes = [8, 32], strides = [1, 1]} : vector<32x32xf32> to vector<8x32xf32>
    %cst_168 = arith.constant dense<0.000000e+00> : vector<8x32xf32>
    %417 = tpu.matmul %415, %416, %cst_168 {dimension_numbers = #tpu.dot_dimension_numbers<[1], [0], [0], [1], [0, 0, 1, 1], [], []>} : vector<8x8xf32>, vector<8x32xf32>, vector<8x32xf32> -> vector<8x32xf32>
    %418 = arith.addf %399, %417 : vector<8x32xf32>
    %c8_169 = arith.constant 8 : index
    %c0_170 = arith.constant 0 : index
    %419 = vector.load %arg10[%c8_169, %c0_170] : memref<16x32xf32, #tpu.memory_space<vmem>>, vector<8x32xf32>
    tpu.vector_store %arg10[%c8_169, %c0_170], %418 {strides = array<i32>} : memref<16x32xf32, #tpu.memory_space<vmem>>, vector<8x32xf32>,
    %c0_171 = arith.constant 0 : index
    %c0_172 = arith.constant 0 : index
    %420 = vector.load %arg9[%c0_171, %c0_172] : memref<16x32xf32, #tpu.memory_space<vmem>>, vector<16x32xf32>
    %c9 = arith.constant 9 : index
    %c0_173 = arith.constant 0 : index
    %421 = vector.load %arg6[%c9, %c0_173] : memref<22x32xf32, #tpu.memory_space<vmem>>, vector<1x32xf32>
    %422 = vector.broadcast %421 : vector<1x32xf32> to vector<16x32xf32>
    %423 = arith.addf %420, %422 : vector<16x32xf32>
    %c0_174 = arith.constant 0 : index
    %c0_175 = arith.constant 0 : index
    %424 = vector.load %arg10[%c0_174, %c0_175] : memref<16x32xf32, #tpu.memory_space<vmem>>, vector<16x32xf32>
    %c13 = arith.constant 13 : index
    %c0_176 = arith.constant 0 : index
    %425 = vector.load %arg6[%c13, %c0_176] : memref<22x32xf32, #tpu.memory_space<vmem>>, vector<1x32xf32>
    %426 = vector.broadcast %425 : vector<1x32xf32> to vector<16x32xf32>
    %427 = arith.addf %424, %426 : vector<16x32xf32>
    %c8_177 = arith.constant 8 : index
    %c0_178 = arith.constant 0 : index
    %c0_179 = arith.constant 0 : index
    %428 = vector.load %arg5[%c8_177, %c0_178, %c0_179] : memref<13x32x32xf32, #tpu.memory_space<vmem>>, vector<1x32x32xf32>
    %429 = vector.shape_cast %428 : vector<1x32x32xf32> to vector<32x32xf32>
    %cst_180 = arith.constant dense<0.000000e+00> : vector<16x32xf32>
    %430 = tpu.matmul %423, %429, %cst_180 {dimension_numbers = #tpu.dot_dimension_numbers<[1], [0], [0], [1], [0, 0, 1, 1], [], []>} : vector<16x32xf32>, vector<32x32xf32>, vector<16x32xf32> -> vector<16x32xf32>
    %c9_181 = arith.constant 9 : index
    %c0_182 = arith.constant 0 : index
    %c0_183 = arith.constant 0 : index
    %431 = vector.load %arg5[%c9_181, %c0_182, %c0_183] : memref<13x32x32xf32, #tpu.memory_space<vmem>>, vector<1x32x32xf32>
    %432 = vector.shape_cast %431 : vector<1x32x32xf32> to vector<32x32xf32>
    %cst_184 = arith.constant dense<0.000000e+00> : vector<16x32xf32>
    %433 = tpu.matmul %427, %432, %cst_184 {dimension_numbers = #tpu.dot_dimension_numbers<[1], [0], [0], [1], [0, 0, 1, 1], [], []>} : vector<16x32xf32>, vector<32x32xf32>, vector<16x32xf32> -> vector<16x32xf32>
    %434 = arith.addf %430, %433 : vector<16x32xf32>
    %c14 = arith.constant 14 : index
    %c0_185 = arith.constant 0 : index
    %435 = vector.load %arg6[%c14, %c0_185] : memref<22x32xf32, #tpu.memory_space<vmem>>, vector<1x32xf32>
    %436 = vector.broadcast %435 : vector<1x32xf32> to vector<16x32xf32>
    %437 = arith.addf %434, %436 : vector<16x32xf32>
    %c15 = arith.constant 15 : index
    %c0_186 = arith.constant 0 : index
    %438 = vector.load %arg6[%c15, %c0_186] : memref<22x32xf32, #tpu.memory_space<vmem>>, vector<1x32xf32>
    %c16 = arith.constant 16 : index
    %c0_187 = arith.constant 0 : index
    %439 = vector.load %arg6[%c16, %c0_187] : memref<22x32xf32, #tpu.memory_space<vmem>>, vector<1x32xf32>
    %cst_188 = arith.constant dense<0.000000e+00> : vector<16xf32>
    %440 = vector.multi_reduction <add>, %437, %cst_188 [1] : vector<16x32xf32> to vector<16xf32>
    %441 = vector.shape_cast %440 : vector<16xf32> to vector<16x1xf32>
    %cst_189 = arith.constant 3.200000e+01 : f32
    %442 = vector.broadcast %cst_189 : f32 to vector<16x1xf32>
    %443 = arith.divf %441, %442 : vector<16x1xf32>
    %444 = vector.broadcast %443 : vector<16x1xf32> to vector<16x32xf32>
    %445 = arith.subf %437, %444 : vector<16x32xf32>
    %446 = arith.mulf %445, %445 : vector<16x32xf32>
    %cst_190 = arith.constant dense<0.000000e+00> : vector<16xf32>
    %447 = vector.multi_reduction <add>, %446, %cst_190 [1] : vector<16x32xf32> to vector<16xf32>
    %448 = vector.shape_cast %447 : vector<16xf32> to vector<16x1xf32>
    %cst_191 = arith.constant 3.200000e+01 : f32
    %449 = vector.broadcast %cst_191 : f32 to vector<16x1xf32>
    %450 = arith.divf %448, %449 : vector<16x1xf32>
    %451 = vector.broadcast %443 : vector<16x1xf32> to vector<16x32xf32>
    %452 = arith.subf %437, %451 : vector<16x32xf32>
    %cst_192 = arith.constant 9.99999974E-6 : f32
    %453 = vector.broadcast %cst_192 : f32 to vector<16x1xf32>
    %454 = arith.addf %450, %453 : vector<16x1xf32>
    %455 = math.rsqrt %454 : vector<16x1xf32>
    %456 = vector.broadcast %455 : vector<16x1xf32> to vector<16x32xf32>
    %457 = arith.mulf %452, %456 : vector<16x32xf32>
    %458 = vector.broadcast %438 : vector<1x32xf32> to vector<16x32xf32>
    %459 = arith.mulf %457, %458 : vector<16x32xf32>
    %460 = vector.broadcast %439 : vector<1x32xf32> to vector<16x32xf32>
    %461 = arith.addf %459, %460 : vector<16x32xf32>
    %cst_193 = arith.constant 5.000000e-01 : f32
    %462 = vector.broadcast %cst_193 : f32 to vector<16x32xf32>
    %463 = arith.mulf %462, %461 : vector<16x32xf32>
    %cst_194 = arith.constant 0.707106769 : f32
    %464 = vector.broadcast %cst_194 : f32 to vector<16x32xf32>
    %465 = arith.mulf %461, %464 : vector<16x32xf32>
    %466 = math.erf %465 : vector<16x32xf32>
    %cst_195 = arith.constant 1.000000e+00 : f32
    %467 = vector.broadcast %cst_195 : f32 to vector<16x32xf32>
    %468 = arith.addf %467, %466 : vector<16x32xf32>
    %469 = arith.mulf %463, %468 : vector<16x32xf32>
    %c10_196 = arith.constant 10 : index
    %c0_197 = arith.constant 0 : index
    %c0_198 = arith.constant 0 : index
    %470 = vector.load %arg5[%c10_196, %c0_197, %c0_198] : memref<13x32x32xf32, #tpu.memory_space<vmem>>, vector<1x32x32xf32>
    %471 = vector.shape_cast %470 : vector<1x32x32xf32> to vector<32x32xf32>
    %cst_199 = arith.constant dense<0.000000e+00> : vector<16x32xf32>
    %472 = tpu.matmul %469, %471, %cst_199 {dimension_numbers = #tpu.dot_dimension_numbers<[1], [0], [0], [1], [0, 0, 1, 1], [], []>} : vector<16x32xf32>, vector<32x32xf32>, vector<16x32xf32> -> vector<16x32xf32>
    %c17 = arith.constant 17 : index
    %c0_200 = arith.constant 0 : index
    %473 = vector.load %arg6[%c17, %c0_200] : memref<22x32xf32, #tpu.memory_space<vmem>>, vector<1x32xf32>
    %474 = vector.broadcast %473 : vector<1x32xf32> to vector<16x32xf32>
    %475 = arith.addf %472, %474 : vector<16x32xf32>
    %c18 = arith.constant 18 : index
    %c0_201 = arith.constant 0 : index
    %476 = vector.load %arg6[%c18, %c0_201] : memref<22x32xf32, #tpu.memory_space<vmem>>, vector<1x32xf32>
    %c19 = arith.constant 19 : index
    %c0_202 = arith.constant 0 : index
    %477 = vector.load %arg6[%c19, %c0_202] : memref<22x32xf32, #tpu.memory_space<vmem>>, vector<1x32xf32>
    %cst_203 = arith.constant dense<0.000000e+00> : vector<16xf32>
    %478 = vector.multi_reduction <add>, %475, %cst_203 [1] : vector<16x32xf32> to vector<16xf32>
    %479 = vector.shape_cast %478 : vector<16xf32> to vector<16x1xf32>
    %cst_204 = arith.constant 3.200000e+01 : f32
    %480 = vector.broadcast %cst_204 : f32 to vector<16x1xf32>
    %481 = arith.divf %479, %480 : vector<16x1xf32>
    %482 = vector.broadcast %481 : vector<16x1xf32> to vector<16x32xf32>
    %483 = arith.subf %475, %482 : vector<16x32xf32>
    %484 = arith.mulf %483, %483 : vector<16x32xf32>
    %cst_205 = arith.constant dense<0.000000e+00> : vector<16xf32>
    %485 = vector.multi_reduction <add>, %484, %cst_205 [1] : vector<16x32xf32> to vector<16xf32>
    %486 = vector.shape_cast %485 : vector<16xf32> to vector<16x1xf32>
    %cst_206 = arith.constant 3.200000e+01 : f32
    %487 = vector.broadcast %cst_206 : f32 to vector<16x1xf32>
    %488 = arith.divf %486, %487 : vector<16x1xf32>
    %489 = vector.broadcast %481 : vector<16x1xf32> to vector<16x32xf32>
    %490 = arith.subf %475, %489 : vector<16x32xf32>
    %cst_207 = arith.constant 9.99999974E-6 : f32
    %491 = vector.broadcast %cst_207 : f32 to vector<16x1xf32>
    %492 = arith.addf %488, %491 : vector<16x1xf32>
    %493 = math.rsqrt %492 : vector<16x1xf32>
    %494 = vector.broadcast %493 : vector<16x1xf32> to vector<16x32xf32>
    %495 = arith.mulf %490, %494 : vector<16x32xf32>
    %496 = vector.broadcast %476 : vector<1x32xf32> to vector<16x32xf32>
    %497 = arith.mulf %495, %496 : vector<16x32xf32>
    %498 = vector.broadcast %477 : vector<1x32xf32> to vector<16x32xf32>
    %499 = arith.addf %497, %498 : vector<16x32xf32>
    %c11_208 = arith.constant 11 : index
    %c0_209 = arith.constant 0 : index
    %c0_210 = arith.constant 0 : index
    %500 = vector.load %arg5[%c11_208, %c0_209, %c0_210] : memref<13x32x32xf32, #tpu.memory_space<vmem>>, vector<1x32x32xf32>
    %501 = vector.shape_cast %500 : vector<1x32x32xf32> to vector<32x32xf32>
    %cst_211 = arith.constant dense<0.000000e+00> : vector<16x32xf32>
    %502 = tpu.matmul %38, %501, %cst_211 {dimension_numbers = #tpu.dot_dimension_numbers<[1], [0], [0], [1], [0, 0, 1, 1], [], []>} : vector<16x32xf32>, vector<32x32xf32>, vector<16x32xf32> -> vector<16x32xf32>
    %c20 = arith.constant 20 : index
    %c0_212 = arith.constant 0 : index
    %503 = vector.load %arg6[%c20, %c0_212] : memref<22x32xf32, #tpu.memory_space<vmem>>, vector<1x32xf32>
    %504 = vector.broadcast %503 : vector<1x32xf32> to vector<16x32xf32>
    %505 = arith.addf %502, %504 : vector<16x32xf32>
    %c12_213 = arith.constant 12 : index
    %c0_214 = arith.constant 0 : index
    %c0_215 = arith.constant 0 : index
    %506 = vector.load %arg5[%c12_213, %c0_214, %c0_215] : memref<13x32x32xf32, #tpu.memory_space<vmem>>, vector<1x32x32xf32>
    %507 = vector.shape_cast %506 : vector<1x32x32xf32> to vector<32x32xf32>
    %cst_216 = arith.constant dense<0.000000e+00> : vector<16x32xf32>
    %508 = tpu.matmul %75, %507, %cst_216 {dimension_numbers = #tpu.dot_dimension_numbers<[1], [0], [0], [1], [0, 0, 1, 1], [], []>} : vector<16x32xf32>, vector<32x32xf32>, vector<16x32xf32> -> vector<16x32xf32>
    %c21 = arith.constant 21 : index
    %c0_217 = arith.constant 0 : index
    %509 = vector.load %arg6[%c21, %c0_217] : memref<22x32xf32, #tpu.memory_space<vmem>>, vector<1x32xf32>
    %510 = vector.broadcast %509 : vector<1x32xf32> to vector<16x32xf32>
    %511 = arith.addf %508, %510 : vector<16x32xf32>
    %c0_218 = arith.constant 0 : index
    %512 = memref.load %arg7[%c0_218] : memref<1xf32, #tpu.memory_space<smem>>
    %513 = arith.mulf %499, %505 : vector<16x32xf32>
    %cst_219 = arith.constant dense<0.000000e+00> : vector<16xf32>
    %514 = vector.multi_reduction <add>, %513, %cst_219 [1] : vector<16x32xf32> to vector<16xf32>
    %515 = vector.shape_cast %514 : vector<16xf32> to vector<16x1xf32>
    %516 = arith.mulf %505, %505 : vector<16x32xf32>
    %cst_220 = arith.constant dense<0.000000e+00> : vector<16xf32>
    %517 = vector.multi_reduction <add>, %516, %cst_220 [1] : vector<16x32xf32> to vector<16xf32>
    %518 = vector.shape_cast %517 : vector<16xf32> to vector<16x1xf32>
    %cst_221 = arith.constant 9.99999993E-9 : f32
    %519 = vector.broadcast %cst_221 : f32 to vector<16x1xf32>
    %520 = arith.addf %518, %519 : vector<16x1xf32>
    %cst_222 = arith.constant 1.000000e+00 : f32
    %521 = vector.broadcast %cst_222 : f32 to vector<16x1xf32>
    %522 = arith.divf %521, %520 : vector<16x1xf32>
    %523 = vector.broadcast %512 : f32 to vector<16x1xf32>
    %524 = arith.mulf %523, %515 : vector<16x1xf32>
    %525 = arith.mulf %524, %522 : vector<16x1xf32>
    %526 = vector.broadcast %525 : vector<16x1xf32> to vector<16x32xf32>
    %527 = arith.mulf %526, %505 : vector<16x32xf32>
    %528 = arith.subf %499, %527 : vector<16x32xf32>
    %529 = arith.mulf %528, %511 : vector<16x32xf32>
    %cst_223 = arith.constant dense<0.000000e+00> : vector<16xf32>
    %530 = vector.multi_reduction <add>, %529, %cst_223 [1] : vector<16x32xf32> to vector<16xf32>
    %531 = vector.shape_cast %530 : vector<16xf32> to vector<16x1xf32>
    %532 = arith.mulf %511, %511 : vector<16x32xf32>
    %cst_224 = arith.constant dense<0.000000e+00> : vector<16xf32>
    %533 = vector.multi_reduction <add>, %532, %cst_224 [1] : vector<16x32xf32> to vector<16xf32>
    %534 = vector.shape_cast %533 : vector<16xf32> to vector<16x1xf32>
    %cst_225 = arith.constant 9.99999993E-9 : f32
    %535 = vector.broadcast %cst_225 : f32 to vector<16x1xf32>
    %536 = arith.addf %534, %535 : vector<16x1xf32>
    %cst_226 = arith.constant 1.000000e+00 : f32
    %537 = vector.broadcast %cst_226 : f32 to vector<16x1xf32>
    %538 = arith.divf %537, %536 : vector<16x1xf32>
    %539 = vector.broadcast %512 : f32 to vector<16x1xf32>
    %540 = arith.mulf %539, %531 : vector<16x1xf32>
    %541 = arith.mulf %540, %538 : vector<16x1xf32>
    %542 = vector.broadcast %541 : vector<16x1xf32> to vector<16x32xf32>
    %543 = arith.mulf %542, %511 : vector<16x32xf32>
    %544 = arith.subf %528, %543 : vector<16x32xf32>
    %c0_227 = arith.constant 0 : index
    %c0_228 = arith.constant 0 : index
    %545 = vector.load %arg8[%c0_227, %c0_228] : memref<16x32xf32, #tpu.memory_space<vmem>>, vector<16x32xf32>
    tpu.vector_store %arg8[%c0_227, %c0_228], %544 {strides = array<i32>} : memref<16x32xf32, #tpu.memory_space<vmem>>, vector<16x32xf32>,
    return
  }
  func.func @transform_0(%arg0: i32) -> (i32, i32) {
    %c0_i32 = arith.constant 0 : i32
    %c0_i32_0 = arith.constant 0 : i32
    return %arg0, %c0_i32 : i32, i32
  }
  func.func @transform_1(%arg0: i32) -> (i32, i32) {
    %c0_i32 = arith.constant 0 : i32
    %c0_i32_0 = arith.constant 0 : i32
    return %arg0, %c0_i32 : i32, i32
  }
  func.func @transform_2(%arg0: i32) -> (i32, i32) {
    %c0_i32 = arith.constant 0 : i32
    %c0_i32_0 = arith.constant 0 : i32
    %c0_i32_1 = arith.constant 0 : i32
    return %c0_i32, %c0_i32_0 : i32, i32
  }
  func.func @transform_3(%arg0: i32) -> (i32, i32) {
    %c0_i32 = arith.constant 0 : i32
    %c0_i32_0 = arith.constant 0 : i32
    %c0_i32_1 = arith.constant 0 : i32
    return %c0_i32, %c0_i32_0 : i32, i32
  }
  func.func @transform_4(%arg0: i32) -> (i32, i32, i32) {
    %c0_i32 = arith.constant 0 : i32
    %c0_i32_0 = arith.constant 0 : i32
    %c0_i32_1 = arith.constant 0 : i32
    %c0_i32_2 = arith.constant 0 : i32
    return %c0_i32, %c0_i32_0, %c0_i32_1 : i32, i32, i32
  }
  func.func @transform_5(%arg0: i32) -> (i32, i32) {
    %c0_i32 = arith.constant 0 : i32
    %c0_i32_0 = arith.constant 0 : i32
    %c0_i32_1 = arith.constant 0 : i32
    return %c0_i32, %c0_i32_0 : i32, i32
  }
  func.func @transform_6(%arg0: i32) -> i32 {
    %c0_i32 = arith.constant 0 : i32
    %c0_i32_0 = arith.constant 0 : i32
    return %c0_i32 : i32
  }
  func.func @transform_7(%arg0: i32) -> (i32, i32) {
    %c0_i32 = arith.constant 0 : i32
    %c0_i32_0 = arith.constant 0 : i32
    return %arg0, %c0_i32 : i32, i32
  }
}

</mosaic_0001>

<bundles_post_ra>
// kernel: fused_forward.1
= control target key start
LH: loop header
LB: loop body
LE: loop exit
PB: predicated region body
PF: predicated region fallthrough
CT: control target
= control target key end

     0   :  { %13 = vsyncpa [#allocation6], 0  ;;  %s6925_s0 = inlined_call_operand.vmem [shape: f32[16,24], index: 0, kind: input, shape index: {}]   ;;  %s6926_s1 = inlined_call_operand.vmem [shape: f32[16,40], index: 1, kind: input, shape index: {}]   ;;  %s6927_s2 = inlined_call_operand.vmem [shape: f32[24,32], index: 2, kind: input, shape index: {}]   ;;  %s6928_s3 = inlined_call_operand.vmem [shape: f32[40,32], index: 3, kind: input, shape index: {}]   ;;  %s6929_s4 = inlined_call_operand.hbm [shape: f32[13,32,32], index: 4, kind: input, shape index: {}]   ;;  %s6930_s5 = inlined_call_operand.vmem [shape: f32[22,32], index: 5, kind: input, shape index: {}]   ;;  %s6931_s6 = inlined_call_operand.<no memory space> [shape: f32[1], index: 6, kind: input, shape index: {}]   ;;  %s6932_s7 = inlined_call_operand.hbm [shape: f32[16,32], index: 7, kind: output, shape index: {}]  }
   0x1   :  { %14 = vsyncpa [#allocation7], 0  ;;  %s6263_s24 = smov [#allocation5]   ;;  %s6215_s28 = scalar_lea.hbm %s6929_s4, 6656 }
   0x2   :  { %s28_s25 = sshll.u32 %s6263_s24, 4  ;;  %p6216_p0 = scmp.ne.s32.totalorder %s6929_s4, %s6215_s28  ;;  %s29_s25 = int_to_ptr.vmem [resolvable:$true] %s28_s25 }
   0x3   :  { %p6219_p1 = scmp.lt.u32.totalorder %s6215_s28, %s6929_s4 }
   0x5   :  { %p6221_p2 = pnand %p6219_p1, %p6216_p0 }
   0x7   :  { %6224 = shalt.err (!%p6221_p2)
}
   0x8   :  { %s6225_s10 = scalar_lea.vmem %s29_s25, 6656  ;;  %p6230_p4 = scmp.lt.s32.totalorder %s29_s25, %s29_s25 }
   0x9   :  { %p6226_p3 = scmp.ne.s32.totalorder %s29_s25, %s6225_s10  ;;  %p6231_p5 = scmp.lt.s32.totalorder %s6225_s10, %s6225_s10 }
   0xb   :  { %p6232_p6 = por %p6231_p5, %p6230_p4 }
   0xd   :  { %p6233_p7 = pnand %p6232_p6, %p6226_p3 }
   0xf   :  { %6236 = shalt.err (!%p6233_p7)
}
  0x10   :  { %s6264_s11 = smov 128   ;;  %s6265_s12 = smov 8  }
  0x11   :  { %34 = dma.hbm_to_vmem [thread:$0]  %s6929_s4, 6656, %s29_s25, [#allocation6], %s6264_s11, %s6264_s11, %s6265_s12  }
  0x12   :  { %6259 = dma.done.wait [#allocation6], 6656  }
  0x13   :  { %6260 = vsyncadd [#allocation6], 4294960640  ;;  %v46_v0 = vld [vmem:[%s6927_s2] sm:$0xff]  ;;  %v47_v1 = vld [vmem:[%s6927_s2 + $0x8] sm:$0xff]  ;;  %vm54_vm0 = vcmask 195584   ;;  %vm198_vm1 = vcmask 326656  }
  0x14   :  { %v188_v2 = vld [vmem:[%s6928_s3] sm:$0xff]  ;;  %v5980_v3 = vpack.c.bf16 %v47_v1, %v46_v0  ;;  %v189_v4 = vld [vmem:[%s6928_s3 + $0x8] sm:$0xff]  ;;  %v190_v5 = vld [vmem:[%s6928_s3 + $0x10] sm:$0xff]  ;;  %vm138_vm2 = vcmask 261120   ;;  %vm6267_vm3 = vmmov 0   ;;  %vm601_vm4 = vcmask 64512  }
  0x15   :  { %v5984_v6 = vpack.c.bf16 %v189_v4, %v188_v2  ;;  %v48_v7 = vld [vmem:[%s6927_s2 + $0x10] sm:$0xff]  ;;  %v191_v8 = vld [vmem:[%s6928_s3 + $0x18] sm:$0xff]  ;;  %v42_v9 = vld [vmem:[%s6925_s0] sm:$0xff]  ;;  %s6268_s28 = smov 120   ;;  %s6269_s8 = smov 112  }
  0x16   :  { %5981 = vmatprep.subr.bf16.mxu0 %v5980_v3  ;;  %v5988_v10 = vpack.c.bf16 %v191_v8, %v190_v5  ;;  %5603 = vmatprep.mubr.msk.f32.mxu0 %vm54_vm0, %v42_v9  ;;  %v44_v11 = vld [vmem:[%s6926_s1] sm:$0xff]  ;;  %v43_v12 = vld [vmem:[%s6925_s0 + $0x8] sm:$0xff]  ;;  %v423_v54 = vld [vmem:[#allocation5 + $0x30] sm:$0xff]  ;;  %s6270_s2 = smov 104  }
  0x17   :  { %5985 = vmatprep.subr.bf16.mxu1 %v5984_v6  ;;  %5983 = vmatpush3.bf16.msra.mxu0 %v5980_v3  ;;  %v192_v13 = vld [vmem:[%s6928_s3 + $0x20] sm:$0xff]  ;;  %v45_v14 = vld [vmem:[%s6926_s1 + $0x8] sm:$0xff]  ;;  %v424_v55 = vld [vmem:[#allocation5 + $0x38] sm:$0xff] }
  0x18   :  { %5987 = vmatpush3.bf16.msra.mxu1 %v5984_v6  ;;  %5601 = vmatprep.subr.mxu0 %v48_v7  ;;  %v5311_v15 = vld [vmem:[%s6930_s5] ss:$0 sm:$0xff]  ;;  %v5316_v20 = vld [vmem:[%s6930_s5 + $0x3] ss:$0 sm:$0xff]  ;;  %v422_v50 = vld [vmem:[#allocation5 + $0x28] sm:$0xff]  ;;  %v6004_v57 = vpack.c.bf16 %v424_v55, %v423_v54  ;;  %v6266_v55 = vmov 0.0  }
  0x19   :  { %5989 = vmatprep.subr.bf16.mxu1 %v5988_v10  ;;  %5616 = vmatprep.mubr.msk.f32.mxu1 %vm198_vm1, %v44_v11  ;;  %v421_v49 = vld [vmem:[#allocation5 + $0x20] sm:$0xff]  ;;  %v331_v53 = vld [vmem:[#allocation5 + $0x8] sm:$0xff]  ;;  %v332_v58 = vld [vmem:[#allocation5 + $0x10] sm:$0xff] }
  0x1a   :  { %v330_v51 = vld [vmem:[#allocation5] sm:$0xff]  ;;  %v6000_v52 = vpack.c.bf16 %v422_v50, %v421_v49  ;;  %v333_v59 = vld [vmem:[#allocation5 + $0x18] sm:$0xff]  ;;  %v513_v62 = vld [vmem:[#allocation5 + $0x48] sm:$0xff] }
  0x1b   :  { %5602 = vmatpush3.msra.mxu0 %v48_v7  ;;  %v5992_v56 = vpack.c.bf16 %v331_v53, %v330_v51  ;;  %v5996_v60 = vpack.c.bf16 %v333_v59, %v332_v58  ;;  %v512_v61 = vld [vmem:[#allocation5 + $0x40] sm:$0xff]  ;;  %v514_v49 = vld [vmem:[#allocation5 + $0x50] sm:$0xff]  ;;  %v515_v50 = vld [vmem:[#allocation5 + $0x58] sm:$0xff] }
  0x1c   :  { %5991 = vmatpush3.bf16.msra.mxu1 %v5988_v10  ;;  %5604 = vmatmul.mubr.msk.f32.vlgmr.msra.gmra.mrb[0].mxu0 %vm54_vm0, %v43_v12  ;;  %v6387_v63 = vpack.c.bf16 %v513_v62, %v512_v61  ;;  %v6012_v54 = vpack.c.bf16 %v515_v50, %v514_v49 }
  0x1d   :  { %5614 = vmatprep.subr.mxu1 %v192_v13  ;;  %5993 = vmatprep.subr.bf16.mxu0 %v5992_v56 }
  0x1e   :  { %5995 = vmatpush3.bf16.msra.mxu0 %v5992_v56  ;;  %v5324_v56 = vld [vmem:[%s6930_s5 + $0x7] ss:$0 sm:$0xff] }
  0x1f   :  { %5997 = vmatprep.subr.bf16.mxu0 %v5996_v60 }
  0x20   :  { %5615 = vmatpush3.msra.mxu1 %v192_v13  ;;  %v5319_v13 = vld [vmem:[%s6930_s5 + $0x4] ss:$0 sm:$0xff] }
  0x21   :  { %5617 = vmatmul.mubr.msk.f32.vlgmr.msra.gmra.mrb[0].mxu1 %vm198_vm1, %v45_v14  ;;  %6001 = vmatprep.subr.bf16.mxu1 %v6000_v52 }
  0x22   :  { %6003 = vmatpush3.bf16.msra.mxu1 %v6000_v52  ;;  %5999 = vmatpush3.bf16.msra.mxu0 %v5996_v60  ;;  %v5321_v60 = vld [vmem:[%s6930_s5 + $0x6] ss:$0 sm:$0xff] }
  0x23   :  { %6005 = vmatprep.subr.bf16.mxu1 %v6004_v57  ;;  %6009 = vmatprep.subr.bf16.mxu0 %v6387_v63 }
  0x26   :  { %6007 = vmatpush3.bf16.msra.mxu1 %v6004_v57 }
  0x27   :  { %5652 = vmatprep.subr.mxu1 %v6266_v55 }
  0xef   :  { %v5605_v16 = vpop.f32.mrb[0].mxu0 }
  0xf0   :  { %v127_v17 = vpop.f32.mrb[1].mxu0  ;;  %v133_v18 = vadd.f32 %v5605_v16, %v5311_v15 }
  0xf1   :  { %v128_v19 = vadd.f32 %v5311_v15, %v127_v17  ;;  %v5320_v15 = vld [vmem:[%s6930_s5 + $0x5] ss:$0 sm:$0xff] }
  0xf2   :  { %v142_v24 = vsel %vm138_vm2, %v133_v18, 0.0 }
  0xf3   :  { %v139_v21 = vsel %vm138_vm2, %v128_v19, 0.0 }
  0xf4   :  { %v5618_v22 = vpop.f32.mrb[0].mxu1  ;;  %140 = vadd.xlane.f32.xlu1 %v139_v21 }
  0xf5   :  { %v271_v23 = vpop.f32.mrb[1].mxu1  ;;  %v277_v26 = vadd.f32 %v5618_v22, %v5316_v20 }
  0xf6   :  { %v272_v25 = vadd.f32 %v5316_v20, %v271_v23  ;;  %v5315_v23 = vld [vmem:[%s6930_s5 + $0x2] ss:$0 sm:$0xff] }
  0xf7   :  { %v285_v28 = vsel %vm138_vm2, %v277_v26, 0.0 }
  0xf8   :  { %v282_v27 = vsel %vm138_vm2, %v272_v25, 0.0  ;;  %143 = vadd.xlane.f32.xlu1 %v142_v24 }
  0xf9   :  { %283 = vadd.xlane.f32.xlu0 %v282_v27 }
  0xfd   :  { %286 = vadd.xlane.f32.xlu0 %v285_v28 }
 0x181   :  { %v141_v29 = vpop.xlane.xlu1 %140 }
 0x182   :  { %v146_v30 = vmul.f32 0.03125, %v141_v29 }
 0x184   :  { %v6375_v34 = vsub.f32 %v128_v19, %v146_v30 }
 0x185   :  { %v144_v32 = vpop.xlane.xlu1 %143 }
 0x186   :  { %v284_v31 = vpop.xlane.xlu0 %283  ;;  %v147_v36 = vmul.f32 0.03125, %v144_v32  ;;  %v150_v43 = vmul.f32 %v6375_v34, %v6375_v34 }
 0x187   :  { %v288_v33 = vmul.f32 0.03125, %v284_v31 }
 0x188   :  { %v6377_v40 = vsub.f32 %v133_v18, %v147_v36  ;;  %v152_v46 = vsel %vm138_vm2, %v150_v43, 0.0  ;;  %v5314_v18 = vld [vmem:[%s6930_s5 + $0x1] ss:$0 sm:$0xff] }
 0x189   :  { %v290_v35 = vsub.f32 %v272_v25, %v288_v33 }
 0x18a   :  { %v287_v37 = vpop.xlane.xlu0 %286  ;;  %v151_v47 = vmul.f32 %v6377_v40, %v6377_v40 }
 0x18b   :  { %v289_v38 = vmul.f32 0.03125, %v287_v37  ;;  %v292_v39 = vmul.f32 %v290_v35, %v290_v35 }
 0x18c   :  { %v155_v48 = vsel %vm138_vm2, %v151_v47, 0.0 }
 0x18d   :  { %v291_v41 = vsub.f32 %v277_v26, %v289_v38  ;;  %v294_v42 = vsel %vm138_vm2, %v292_v39, 0.0 }
 0x18e   :  { %295 = vadd.xlane.f32.xlu0 %v294_v42 }
 0x18f   :  { %v293_v44 = vmul.f32 %v291_v41, %v291_v41 }
 0x191   :  { %v297_v45 = vsel %vm138_vm2, %v293_v44, 0.0 }
 0x192   :  { %298 = vadd.xlane.f32.xlu1 %v297_v45  ;;  %153 = vadd.xlane.f32.xlu0 %v152_v46 }
 0x196   :  { %156 = vadd.xlane.f32.xlu1 %v155_v48 }
 0x21b   :  { %v296_v0 = vpop.xlane.xlu0 %295 }
 0x21c   :  { %v300_v1 = vmul.f32 0.03125, %v296_v0 }
 0x21e   :  { %v302_v2 = vadd.f32 1e-05, %v300_v1 }
 0x21f   :  { %v154_v3 = vpop.xlane.xlu0 %153  ;;  %v299_v4 = vpop.xlane.xlu1 %298 }
 0x220   :  { %6115 = vrsqrt.f32 %v302_v2  ;;  %v158_v5 = vmul.f32 0.03125, %v154_v3  ;;  %v301_v6 = vmul.f32 0.03125, %v299_v4  ;;  %v5327_v2 = vld [vmem:[%s6930_s5 + $0x8] ss:$0 sm:$0xff] }
 0x222   :  { %v160_v7 = vadd.f32 1e-05, %v158_v5  ;;  %v303_v8 = vadd.f32 1e-05, %v301_v6 }
 0x223   :  { %v157_v9 = vpop.xlane.xlu1 %156 }
 0x224   :  { %6117 = vrsqrt.f32 %v160_v7  ;;  %v159_v10 = vmul.f32 0.03125, %v157_v9 }
 0x225   :  { %6119 = vrsqrt.f32 %v303_v8 }
 0x226   :  { %v161_v11 = vadd.f32 1e-05, %v159_v10 }
 0x228   :  { %6121 = vrsqrt.f32 %v161_v11 }
 0x22a   :  { %v6116_v12 = vpop.eup %6115 }
 0x22b   :  { %v306_v14 = vmul.f32 %v6116_v12, %v290_v35 }
 0x22d   :  { %v312_v16 = vmul.f32 %v5319_v13, %v306_v14 }
 0x22e   :  { %v6118_v17 = vpop.eup %6117 }
 0x22f   :  { %v6120_v19 = vpop.eup %6119  ;;  %v164_v20 = vmul.f32 %v6118_v17, %v6375_v34  ;;  %v318_v21 = vadd.f32 %v5320_v15, %v312_v16 }
 0x230   :  { %v307_v22 = vmul.f32 %v6120_v19, %v291_v41 }
 0x231   :  { %v322_v24 = vmul.f32 0.70710677, %v318_v21  ;;  %v170_v25 = vmul.f32 %v5314_v18, %v164_v20  ;;  %v320_v37 = vmul.f32 0.5, %v318_v21 }
 0x232   :  { %v6122_v26 = vpop.eup %6121  ;;  %v313_v27 = vmul.f32 %v5319_v13, %v307_v22 }
 0x233   :  { %v165_v28 = vmul.f32 %v6122_v26, %v6377_v40  ;;  %6123 = verf.f32 %v322_v24  ;;  %v176_v29 = vadd.f32 %v5315_v23, %v170_v25 }
 0x234   :  { %v319_v30 = vadd.f32 %v5320_v15, %v313_v27 }
 0x235   :  { %v171_v31 = vmul.f32 %v5314_v18, %v165_v28  ;;  %v180_v32 = vmul.f32 0.70710677, %v176_v29  ;;  %v178_v40 = vmul.f32 0.5, %v176_v29 }
 0x236   :  { %v323_v33 = vmul.f32 0.70710677, %v319_v30  ;;  %v321_v44 = vmul.f32 0.5, %v319_v30 }
 0x237   :  { %v177_v35 = vadd.f32 %v5315_v23, %v171_v31  ;;  %6125 = verf.f32 %v180_v32 }
 0x238   :  { %6127 = verf.f32 %v323_v33 }
 0x239   :  { %v181_v34 = vmul.f32 0.70710677, %v177_v35  ;;  %v179_v51 = vmul.f32 0.5, %v177_v35  ;;  %v6492_v35 = vld [vmem:[#allocation5 + $0x68] sm:$0xff] }
 0x23b   :  { %6129 = verf.f32 %v181_v34 }
 0x23d   :  { %v6124_v36 = vpop.eup %6123 }
 0x23e   :  { %v326_v38 = vadd.f32 1.0, %v6124_v36 }
 0x240   :  { %v6404_v39 = vmul.f32 %v326_v38, %v320_v37  ;;  %v6496_v37 = vld [vmem:[#allocation5 + $0x60] sm:$0xff] }
 0x241   :  { %v6126_v41 = vpop.eup %6125 }
 0x242   :  { %v6128_v42 = vpop.eup %6127  ;;  %5638 = vmatprep.mubr.msk.f32.mxu1 %vm138_vm2, %v6404_v39  ;;  %v184_v43 = vadd.f32 1.0, %v6126_v41 }
 0x243   :  { %v327_v45 = vadd.f32 1.0, %v6128_v42 }
 0x244   :  { %v6408_v46 = vmul.f32 %v184_v43, %v178_v40 }
 0x245   :  { %v6130_v47 = vpop.eup %6129  ;;  %v6410_v48 = vmul.f32 %v327_v45, %v321_v44 }
 0x246   :  { %5627 = vmatprep.mubr.msk.f32.mxu0 %vm138_vm2, %v6408_v46  ;;  %v185_v52 = vadd.f32 1.0, %v6130_v47 }
 0x247   :  { %5639 = vmatmul.mubr.msk.f32.vlgmr.msra.gmra.mrb[2].mxu1 %vm138_vm2, %v6410_v48 }
 0x248   :  { %v6416_v53 = vmul.f32 %v185_v52, %v179_v51  ;;  %5654 = vmatprep.mubr.msk.f32.mxu1 %vm6267_vm3, %v6266_v55 }
 0x24a   :  { %5628 = vmatmul.mubr.msk.f32.vlgmr.msra.gmra.mrb[2].mxu0 %vm138_vm2, %v6416_v53 }
 0x24b   :  { %6011 = vmatpush3.bf16.msra.mxu0 %v6387_v63  ;;  %5649 = vmatprep.mubr.msk.f32.mxu0 %vm138_vm2, %v6404_v39 }
 0x24c   :  { %6013 = vmatprep.subr.bf16.mxu0 %v6012_v54 }
 0x24f   :  { %6015 = vmatpush3.bf16.msra.mxu0 %v6012_v54 }
 0x250   :  { %5657 = vmatprep.subr.mxu0 %v6266_v55 }
 0x252   :  { %5650 = vmatmul.mubr.msk.f32.vlgmr.msra.gmra.mrb[4].mxu0 %vm138_vm2, %v6410_v48 }
 0x253   :  { %5659 = vmatprep.mubr.msk.f32.mxu0 %vm6267_vm3, %v6266_v55 }
 0x31a   :  { %v5640_v57 = vpop.f32.mrb[2].mxu1 }
 0x31b   :  { %v6434_v58 = vadd.f32 %v5640_v57, %v5324_v56  ;;  %v502_v59 = vpop.f32.mrb[3].mxu1 }
 0x31c   :  { %v6439_v61 = vadd.f32 %v5324_v56, %v502_v59 }
 0x31d   :  { %v5629_v62 = vpop.f32.mrb[2].mxu0 }
 0x31e   :  { %765 = vrot.lane.b32.xlu0 %v6439_v61, %s6268_s28  ;;  %v6443_v63 = vadd.f32 %v5629_v62, %v5321_v60  ;;  %5653 = vmatpush3.xpose.msk.msra.mxu1 %vm601_vm4, %v6439_v61  ;;  %v411_v0 = vpop.f32.mrb[3].mxu0 }
 0x31f   :  { %v6447_v1 = vadd.f32 %v5321_v60, %v411_v0  ;;  %5662 = vmatprep.subr.mxu1 %v6266_v55  ;;  %v6532_v60 = vld [vmem:[#allocation5 + $0x70] sm:$0xff] }
 0x321   :  { %763 = vrot.lane.b32.xlu1 %v6447_v1, %s6268_s28  ;;  %5655 = vmatmul.mubr.msk.f32.vlgmr.msra.gmra.mrb[4].mxu1 %vm601_vm4, %v6447_v1 }
 0x322   :  { %5664 = vmatprep.mubr.msk.f32.mxu1 %vm6267_vm3, %v6266_v55 }
 0x325   :  { %v5651_v3 = vpop.f32.mrb[4].mxu0 }
 0x326   :  { %v6459_v4 = vadd.f32 %v5651_v3, %v5327_v2  ;;  %v587_v5 = vpop.f32.mrb[5].mxu0 }
 0x327   :  { %v6461_v6 = vadd.f32 %v5327_v2, %v587_v5 }
 0x329   :  { %5658 = vmatpush3.msra.mxu0 %v6461_v6 }
 0x32a   :  { %5667 = vmatprep.subr.mxu0 %v6266_v55 }
 0x390   :  { %v766_v7 = vpop.permute.xlu0 %765 }
 0x391   :  { %5663 = vmatpush3.xpose.msk.msra.mxu1 %vm601_vm4, %v766_v7 }
 0x392   :  { %5672 = vmatprep.subr.mxu1 %v6266_v55 }
 0x393   :  { %v764_v8 = vpop.permute.xlu1 %763 }
 0x394   :  { %5665 = vmatmul.mubr.msk.f32.vlgmr.msra.gmra.mrb[6].mxu1 %vm601_vm4, %v764_v8 }
 0x395   :  { %5674 = vmatprep.mubr.msk.f32.mxu1 %vm6267_vm3, %v6266_v55  ;;  %5673 = vmatpush3.msra.mxu1 %v6492_v35 }
 0x396   :  { %5677 = vmatprep.subr.mxu1 %v6266_v55 }
 0x3f4   :  { %v674_v9 = vpop.f32.mrb[4].mxu1 }
 0x3f5   :  { %v5656_v10 = vpop.f32.mrb[5].mxu1  ;;  %v678_v11 = vsel %vm601_vm4, %v674_v9, -inf }
 0x3f6   :  { %679 = vmax.xlane.f32.xlu1 %v678_v11 }
 0x407   :  { %1078 = vrot.lane.b32.xlu1 %v6439_v61, %s6269_s8 }
 0x467   :  { %v837_v12 = vpop.f32.mrb[6].mxu1 }
 0x468   :  { %v5666_v13 = vpop.f32.mrb[7].mxu1  ;;  %v841_v14 = vsel %vm601_vm4, %v837_v12, -inf }
 0x469   :  { %842 = vmax.xlane.f32.xlu0 %v841_v14 }
 0x483   :  { %v680_v15 = vpop.xlane.xlu1 %679 }
 0x484   :  { %v681_v16 = vsub.f32 %v674_v9, %v680_v15 }
 0x486   :  { %v682_v17 = vmul.f32 1.442695, %v681_v16  ;;  %v6553_v16 = vld [vmem:[#allocation5 + $0x78] sm:$0xff] }
 0x487   :  { %v1079_v29 = vpop.permute.xlu1 %1078 }
 0x488   :  { %6131 = vpow2.f32 %v682_v17 }
 0x492   :  { %v6132_v18 = vpop.eup %6131 }
 0x493   :  { %v684_v19 = vsel %vm601_vm4, %v6132_v18, 0.0 }
 0x494   :  { %685 = vadd.xlane.f32.xlu0 %v684_v19 }
 0x4aa   :  { %854 = vrot.lane.b32.xlu0 %v6461_v6, %s6268_s28 }
 0x4f6   :  { %v843_v20 = vpop.xlane.xlu0 %842 }
 0x4f7   :  { %v844_v21 = vsub.f32 %v837_v12, %v843_v20 }
 0x4f9   :  { %v845_v22 = vmul.f32 1.442695, %v844_v21 }
 0x4fb   :  { %6133 = vpow2.f32 %v845_v22 }
 0x505   :  { %v6134_v23 = vpop.eup %6133 }
 0x506   :  { %v847_v24 = vsel %vm601_vm4, %v6134_v23, 0.0 }
 0x507   :  { %848 = vadd.xlane.f32.xlu1 %v847_v24 }
 0x518   :  { %1076 = vrot.lane.b32.xlu1 %v6447_v1, %s6269_s8 }
 0x521   :  { %v686_v25 = vpop.xlane.xlu0 %685 }
 0x522   :  { %6135 = vrcp.f32 %v686_v25 }
 0x525   :  { %v855_v28 = vpop.permute.xlu0 %854 }
 0x52c   :  { %v6136_v26 = vpop.eup %6135 }
 0x52d   :  { %v689_v27 = vmul.f32 %v6136_v26, %v6132_v18 }
 0x52f   :  { %5660 = vmatmul.mubr.msk.f32.vlgmr.msra.gmra.mrb[6].mxu0 %vm601_vm4, %v689_v27 }
 0x530   :  { %5668 = vmatpush3.msra.mxu0 %v855_v28  ;;  %5669 = vmatprep.mubr.msk.f32.mxu0 %vm6267_vm3, %v6266_v55 }
 0x531   :  { %5682 = vmatprep.subr.mxu0 %v6266_v55 }
 0x594   :  { %v849_v30 = vpop.xlane.xlu1 %848 }
 0x595   :  { %6137 = vrcp.f32 %v849_v30 }
 0x598   :  { %v1077_v33 = vpop.permute.xlu1 %1076 }
 0x59f   :  { %v6138_v31 = vpop.eup %6137 }
 0x5a0   :  { %v852_v32 = vmul.f32 %v6138_v31, %v6134_v23 }
 0x5a2   :  { %5670 = vmatmul.mubr.msk.f32.vlgmr.msra.gmra.mrb[8].mxu0 %vm601_vm4, %v852_v32 }
 0x5a3   :  { %5683 = vmatpush3.xpose.msk.msra.mxu0 %vm601_vm4, %v1079_v29  ;;  %5684 = vmatprep.mubr.msk.f32.mxu0 %vm6267_vm3, %v6266_v55 }
 0x5a4   :  { %5687 = vmatprep.subr.mxu0 %v6266_v55 }
 0x5a6   :  { %5685 = vmatmul.mubr.msk.f32.vlgmr.msra.gmra.mrb[10].mxu0 %vm601_vm4, %v1077_v33 }
 0x5a7   :  { %5689 = vmatprep.mubr.msk.f32.mxu0 %vm6267_vm3, %v6266_v55 }
 0x602   :  { %v759_v34 = vpop.f32.mrb[6].mxu0 }
 0x603   :  { %v5661_v36 = vpop.f32.mrb[7].mxu0 }
 0x675   :  { %v926_v38 = vpop.f32.mrb[8].mxu0 }
 0x676   :  { %v5671_v41 = vpop.f32.mrb[9].mxu0  ;;  %5675 = vmatmul.mubr.msk.f32.vlgmr.msra.gmra.mrb[8].mxu1 %vm601_vm4, %v926_v38 }
 0x677   :  { %5678 = vmatpush3.msra.mxu1 %v6496_v37  ;;  %5679 = vmatprep.mubr.msk.f32.mxu1 %vm6267_vm3, %v6266_v55 }
 0x678   :  { %5692 = vmatprep.subr.mxu1 %v6266_v55 }
 0x679   :  { %v1150_v42 = vpop.f32.mrb[10].mxu0 }
 0x67a   :  { %v5686_v40 = vpop.f32.mrb[11].mxu0  ;;  %v1154_v43 = vsel %vm601_vm4, %v1150_v42, -inf }
 0x67b   :  { %1155 = vmax.xlane.f32.xlu1 %v1154_v43 }
 0x67e   :  { %5680 = vmatmul.mubr.msk.f32.vlgmr.msra.gmra.mrb[8].mxu1 %vm601_vm4, %v759_v34 }
 0x67f   :  { %5694 = vmatprep.mubr.msk.f32.mxu1 %vm6267_vm3, %v6266_v55  ;;  %5693 = vmatpush3.msra.mxu1 %v6532_v60 }
 0x680   :  { %5702 = vmatprep.subr.mxu1 %v6266_v55 }
 0x68c   :  { %1318 = vrot.lane.b32.xlu1 %v6439_v61, %s6270_s2 }
 0x690   :  { %1316 = vrot.lane.b32.xlu1 %v6447_v1, %s6270_s2 }
 0x708   :  { %v1156_v44 = vpop.xlane.xlu1 %1155 }
 0x709   :  { %v1157_v45 = vsub.f32 %v1150_v42, %v1156_v44 }
 0x70b   :  { %v1158_v47 = vmul.f32 1.442695, %v1157_v45 }
 0x70c   :  { %v1319_v56 = vpop.permute.xlu1 %1318 }
 0x70d   :  { %6139 = vpow2.f32 %v1158_v47 }
 0x710   :  { %v1317_v59 = vpop.permute.xlu1 %1316 }
 0x717   :  { %v6140_v49 = vpop.eup %6139 }
 0x718   :  { %v1160_v50 = vsel %vm601_vm4, %v6140_v49, 0.0 }
 0x719   :  { %1161 = vadd.xlane.f32.xlu0 %v1160_v50 }
 0x72f   :  { %1166 = vrot.lane.b32.xlu0 %v6461_v6, %s6269_s8 }
 0x7a6   :  { %v1162_v51 = vpop.xlane.xlu0 %1161 }
 0x7a7   :  { %6141 = vrcp.f32 %v1162_v51 }
 0x7aa   :  { %v1167_v52 = vpop.permute.xlu0 %1166 }
 0x7ab   :  { %5688 = vmatpush3.msra.mxu0 %v1167_v52 }
 0x7ac   :  { %5697 = vmatprep.subr.mxu0 %v6266_v55 }
 0x7b1   :  { %v6142_v54 = vpop.eup %6141 }
 0x7b2   :  { %v1165_v57 = vmul.f32 %v6142_v54, %v6140_v49 }
 0x7b4   :  { %5690 = vmatmul.mubr.msk.f32.vlgmr.msra.gmra.mrb[12].mxu0 %vm601_vm4, %v1165_v57 }
 0x7b5   :  { %5698 = vmatpush3.xpose.msk.msra.mxu0 %vm601_vm4, %v1319_v56  ;;  %5699 = vmatprep.mubr.msk.f32.mxu0 %vm6267_vm3, %v6266_v55 }
 0x7b6   :  { %5712 = vmatprep.subr.mxu0 %v6266_v55 }
 0x7b8   :  { %5700 = vmatmul.mubr.msk.f32.vlgmr.msra.gmra.mrb[14].mxu0 %vm601_vm4, %v1317_v59 }
 0x7b9   :  { %5713 = vmatpush3.xpose.msk.msra.mxu0 %vm601_vm4, %v6434_v58  ;;  %5714 = vmatprep.mubr.msk.f32.mxu0 %vm6267_vm3, %v6266_v55 }
 0x7ba   :  { %5717 = vmatprep.subr.mxu0 %v6266_v55 }
 0x7bc   :  { %5715 = vmatmul.mubr.msk.f32.vlgmr.msra.gmra.mrb[16].mxu0 %vm601_vm4, %v6443_v63 }
 0x7bd   :  { %5718 = vmatpush3.msra.mxu0 %v6459_v4  ;;  %5719 = vmatprep.mubr.msk.f32.mxu0 %vm6267_vm3, %v6266_v55 }
 0x7be   :  { %5727 = vmatprep.subr.mxu0 %v6266_v55 }
 0x887   :  { %v1238_v61 = vpop.f32.mrb[12].mxu0 }
 0x888   :  { %v5691_v62 = vpop.f32.mrb[13].mxu0  ;;  %5695 = vmatmul.mubr.msk.f32.vlgmr.msra.gmra.mrb[8].mxu1 %vm601_vm4, %v1238_v61 }
 0x889   :  { %5704 = vmatprep.mubr.msk.f32.mxu1 %vm6267_vm3, %v6266_v55 }
 0x88b   :  { %v1390_v0 = vpop.f32.mrb[14].mxu0 }
 0x88c   :  { %v5701_v1 = vpop.f32.mrb[15].mxu0  ;;  %v1394_v2 = vsel %vm601_vm4, %v1390_v0, -inf }
 0x88d   :  { %1395 = vmax.xlane.f32.xlu0 %v1394_v2  ;;  %v2514_v2 = vld [vmem:[#allocation5 + $0x88] sm:$0xff] }
 0x88f   :  { %v1629_v3 = vpop.f32.mrb[16].mxu0 }
 0x890   :  { %v5716_v5 = vpop.f32.mrb[17].mxu0 }
 0x8a3   :  { %1406 = vrot.lane.b32.xlu0 %v6461_v6, %s6270_s2  ;;  %v1633_v6 = vsel %vm601_vm4, %v1629_v3, -inf }
 0x8a7   :  { %1718 = vrot.lane.b32.xlu0 %v6443_v63, %s6268_s28 }
 0x91a   :  { %v1396_v7 = vpop.xlane.xlu0 %1395 }
 0x91b   :  { %v1397_v8 = vsub.f32 %v1390_v0, %v1396_v7 }
 0x91d   :  { %v1398_v9 = vmul.f32 1.442695, %v1397_v8  ;;  %v2515_v8 = vld [vmem:[#allocation5 + $0x90] sm:$0xff] }
 0x91e   :  { %v1407_v10 = vpop.permute.xlu0 %1406 }
 0x91f   :  { %6143 = vpow2.f32 %v1398_v9  ;;  %5703 = vmatpush3.msra.mxu1 %v1407_v10  ;;  %v2516_v9 = vld [vmem:[#allocation5 + $0x98] sm:$0xff] }
 0x920   :  { %5707 = vmatprep.subr.mxu1 %v6266_v55  ;;  %v6020_v10 = vpack.c.bf16 %v2516_v9, %v2515_v8 }
 0x922   :  { %v1719_v20 = vpop.permute.xlu0 %1718 }
 0x929   :  { %v6144_v11 = vpop.eup %6143 }
 0x92a   :  { %v1400_v12 = vsel %vm601_vm4, %v6144_v11, 0.0 }
 0x92b   :  { %1401 = vadd.xlane.f32.xlu1 %v1400_v12  ;;  %v2683_v12 = vld [vmem:[#allocation5 + $0xc0] sm:$0xff] }
 0x93c   :  { %1720 = vrot.lane.b32.xlu1 %v6434_v58, %s6268_s28 }
 0x960   :  { %1634 = vmax.xlane.f32.xlu1 %v1633_v6  ;;  %v2684_v6 = vld [vmem:[#allocation5 + $0xc8] sm:$0xff] }
 0x971   :  { %1809 = vrot.lane.b32.xlu1 %v6459_v4, %s6268_s28 }
 0x975   :  { %2031 = vrot.lane.b32.xlu1 %v6443_v63, %s6269_s8 }
 0x9b8   :  { %v1402_v13 = vpop.xlane.xlu1 %1401 }
 0x9b9   :  { %6145 = vrcp.f32 %v1402_v13  ;;  %v6032_v13 = vpack.c.bf16 %v2684_v6, %v2683_v12 }
 0x9bc   :  { %v1721_v18 = vpop.permute.xlu1 %1720 }
 0x9c3   :  { %v6146_v14 = vpop.eup %6145 }
 0x9c4   :  { %v1405_v15 = vmul.f32 %v6146_v14, %v6144_v11  ;;  %v2685_v14 = vld [vmem:[#allocation5 + $0xd0] sm:$0xff] }
 0x9c6   :  { %5705 = vmatmul.mubr.msk.f32.vlgmr.msra.gmra.mrb[10].mxu1 %vm601_vm4, %v1405_v15  ;;  %v2686_v15 = vld [vmem:[#allocation5 + $0xd8] sm:$0xff] }
 0x9c7   :  { %5708 = vmatpush3.msra.mxu1 %v6553_v16  ;;  %5709 = vmatprep.mubr.msk.f32.mxu1 %vm6267_vm3, %v6266_v55 }
 0x9c8   :  { %5722 = vmatprep.subr.mxu1 %v6266_v55 }
 0x9ed   :  { %v1635_v21 = vpop.xlane.xlu1 %1634 }
 0x9ee   :  { %v1636_v22 = vsub.f32 %v1629_v3, %v1635_v21 }
 0x9f0   :  { %v1637_v23 = vmul.f32 1.442695, %v1636_v22 }
 0x9f1   :  { %v1810_v42 = vpop.permute.xlu1 %1809 }
 0x9f2   :  { %6147 = vpow2.f32 %v1637_v23  ;;  %v5362_v23 = vld [vmem:[%s6930_s5 + $0xa] ss:$0 sm:$0xff] }
 0x9f5   :  { %v2032_v47 = vpop.permute.xlu1 %2031 }
 0x9fc   :  { %v6148_v29 = vpop.eup %6147 }
 0x9fd   :  { %v1639_v30 = vsel %vm601_vm4, %v6148_v29, 0.0 }
 0xa99   :  { %v1478_v17 = vpop.f32.mrb[10].mxu1 }
 0xa9a   :  { %v5706_v19 = vpop.f32.mrb[11].mxu1  ;;  %5710 = vmatmul.mubr.msk.f32.vlgmr.msra.gmra.mrb[8].mxu1 %vm601_vm4, %v1478_v17  ;;  %v6036_v17 = vpack.c.bf16 %v2686_v15, %v2685_v14 }
 0xa9b   :  { %5723 = vmatpush3.xpose.msk.msra.mxu1 %vm601_vm4, %v1721_v18  ;;  %5724 = vmatprep.mubr.msk.f32.mxu1 %vm6267_vm3, %v6266_v55 }
 0xa9c   :  { %5732 = vmatprep.subr.mxu1 %v6266_v55 }
 0xa9e   :  { %5725 = vmatmul.mubr.msk.f32.vlgmr.msra.gmra.mrb[12].mxu1 %vm601_vm4, %v1719_v20 }
 0xa9f   :  { %5733 = vmatpush3.msra.mxu1 %v6492_v35  ;;  %5734 = vmatprep.mubr.msk.f32.mxu1 %vm6267_vm3, %v6266_v55 }
 0xaa0   :  { %5737 = vmatprep.subr.mxu1 %v6266_v55 }
 0xb6d   :  { %v1551_v24 = vpop.f32.mrb[8].mxu1 }
 0xb6e   :  { %1556 = vst.msk [vmem:[#allocation2] sm:$0xff] %vm138_vm2, %v1551_v24  ;;  %v5711_v25 = vpop.f32.mrb[9].mxu1 }
 0xb71   :  { %v1792_v26 = vpop.f32.mrb[12].mxu1 }
 0xb72   :  { %v5726_v27 = vpop.f32.mrb[13].mxu1  ;;  %v1796_v28 = vsel %vm601_vm4, %v1792_v26, -inf }
 0xb73   :  { %1797 = vmax.xlane.f32.xlu0 %v1796_v28  ;;  %v5368_v27 = vld [vmem:[%s6930_s5 + $0xc] ss:$0 sm:$0xff] }
 0xb77   :  { %1640 = vadd.xlane.f32.xlu0 %v1639_v30 }
 0xc00   :  { %v1798_v31 = vpop.xlane.xlu0 %1797 }
 0xc01   :  { %v1799_v32 = vsub.f32 %v1792_v26, %v1798_v31 }
 0xc03   :  { %v1800_v33 = vmul.f32 1.442695, %v1799_v32 }
 0xc04   :  { %v1641_v35 = vpop.xlane.xlu0 %1640 }
 0xc05   :  { %6149 = vpow2.f32 %v1800_v33 }
 0xc06   :  { %6151 = vrcp.f32 %v1641_v35 }
 0xc0f   :  { %v6150_v34 = vpop.eup %6149 }
 0xc10   :  { %v6152_v36 = vpop.eup %6151  ;;  %v1802_v38 = vsel %vm601_vm4, %v6150_v34, 0.0 }
 0xc11   :  { %v1644_v41 = vmul.f32 %v6152_v36, %v6148_v29  ;;  %1803 = vadd.xlane.f32.xlu0 %v1802_v38 }
 0xc13   :  { %5720 = vmatmul.mubr.msk.f32.vlgmr.msra.gmra.mrb[18].mxu0 %vm601_vm4, %v1644_v41 }
 0xc14   :  { %5728 = vmatpush3.msra.mxu0 %v1810_v42  ;;  %5729 = vmatprep.mubr.msk.f32.mxu0 %vm6267_vm3, %v6266_v55 }
 0xc15   :  { %5742 = vmatprep.subr.mxu0 %v6266_v55 }
 0xc27   :  { %2033 = vrot.lane.b32.xlu0 %v6434_v58, %s6269_s8 }
 0xc9e   :  { %v1804_v40 = vpop.xlane.xlu0 %1803 }
 0xc9f   :  { %6153 = vrcp.f32 %v1804_v40 }
 0xca2   :  { %v2034_v45 = vpop.permute.xlu0 %2033 }
 0xca9   :  { %v6154_v43 = vpop.eup %6153 }
 0xcaa   :  { %v1807_v44 = vmul.f32 %v6154_v43, %v6150_v34  ;;  %v2598_v43 = vld [vmem:[#allocation5 + $0xa0] sm:$0xff] }
 0xcac   :  { %5730 = vmatmul.mubr.msk.f32.vlgmr.msra.gmra.mrb[20].mxu0 %vm601_vm4, %v1807_v44  ;;  %v2599_v44 = vld [vmem:[#allocation5 + $0xa8] sm:$0xff] }
 0xcad   :  { %5743 = vmatpush3.xpose.msk.msra.mxu0 %vm601_vm4, %v2034_v45  ;;  %5744 = vmatprep.mubr.msk.f32.mxu0 %vm6267_vm3, %v6266_v55  ;;  %v6024_v45 = vpack.c.bf16 %v2599_v44, %v2598_v43 }
 0xcae   :  { %5747 = vmatprep.subr.mxu0 %v6266_v55 }
 0xcb0   :  { %5745 = vmatmul.mubr.msk.f32.vlgmr.msra.gmra.mrb[22].mxu0 %vm601_vm4, %v2032_v47  ;;  %v2601_v47 = vld [vmem:[#allocation5 + $0xb8] sm:$0xff] }
 0xcb1   :  { %5749 = vmatprep.mubr.msk.f32.mxu0 %vm6267_vm3, %v6266_v55 }
 0xce6   :  { %v1714_v49 = vpop.f32.mrb[18].mxu0 }
 0xce7   :  { %v5721_v50 = vpop.f32.mrb[19].mxu0 }
 0xd7f   :  { %v1881_v51 = vpop.f32.mrb[20].mxu0 }
 0xd80   :  { %v5731_v52 = vpop.f32.mrb[21].mxu0  ;;  %5735 = vmatmul.mubr.msk.f32.vlgmr.msra.gmra.mrb[14].mxu1 %vm601_vm4, %v1881_v51 }
 0xd81   :  { %5738 = vmatpush3.msra.mxu1 %v6496_v37  ;;  %5739 = vmatprep.mubr.msk.f32.mxu1 %vm6267_vm3, %v6266_v55 }
 0xd82   :  { %5752 = vmatprep.subr.mxu1 %v6266_v55 }
 0xd83   :  { %v2105_v54 = vpop.f32.mrb[22].mxu0 }
 0xd84   :  { %v5746_v56 = vpop.f32.mrb[23].mxu0  ;;  %v2109_v57 = vsel %vm601_vm4, %v2105_v54, -inf }
 0xd85   :  { %2110 = vmax.xlane.f32.xlu1 %v2109_v57 }
 0xd88   :  { %5740 = vmatmul.mubr.msk.f32.vlgmr.msra.gmra.mrb[14].mxu1 %vm601_vm4, %v1714_v49 }
 0xd89   :  { %5753 = vmatpush3.msra.mxu1 %v6532_v60  ;;  %5754 = vmatprep.mubr.msk.f32.mxu1 %vm6267_vm3, %v6266_v55 }
 0xd8a   :  { %5762 = vmatprep.subr.mxu1 %v6266_v55 }
 0xd96   :  { %2273 = vrot.lane.b32.xlu1 %v6434_v58, %s6270_s2  ;;  %v2513_v58 = vld [vmem:[#allocation5 + $0x80] sm:$0xff] }
 0xd97   :  { %v6016_v7 = vpack.c.bf16 %v2514_v2, %v2513_v58 }
 0xd9a   :  { %2271 = vrot.lane.b32.xlu1 %v6443_v63, %s6270_s2 }
 0xe12   :  { %v2111_v37 = vpop.xlane.xlu1 %2110 }
 0xe13   :  { %v2112_v59 = vsub.f32 %v2105_v54, %v2111_v37  ;;  %v5365_v54 = vld [vmem:[%s6930_s5 + $0xb] ss:$0 sm:$0xff] }
 0xe15   :  { %v2113_v61 = vmul.f32 1.442695, %v2112_v59 }
 0xe16   :  { %v2274_v3 = vpop.permute.xlu1 %2273 }
 0xe17   :  { %6155 = vpow2.f32 %v2113_v61 }
 0xe1a   :  { %v2272_v11 = vpop.permute.xlu1 %2271 }
 0xe21   :  { %v6156_v62 = vpop.eup %6155 }
 0xe22   :  { %v2115_v0 = vsel %vm601_vm4, %v6156_v62, 0.0 }
 0xe23   :  { %2116 = vadd.xlane.f32.xlu0 %v2115_v0 }
 0xe39   :  { %2121 = vrot.lane.b32.xlu0 %v6459_v4, %s6269_s8 }
 0xeb0   :  { %v2117_v60 = vpop.xlane.xlu0 %2116 }
 0xeb1   :  { %6157 = vrcp.f32 %v2117_v60 }
 0xeb4   :  { %v2122_v1 = vpop.permute.xlu0 %2121 }
 0xeb5   :  { %5748 = vmatpush3.msra.mxu0 %v2122_v1 }
 0xeb6   :  { %5757 = vmatprep.subr.mxu0 %v6266_v55 }
 0xebb   :  { %v6158_v63 = vpop.eup %6157 }
 0xebc   :  { %v2120_v5 = vmul.f32 %v6158_v63, %v6156_v62 }
 0xebe   :  { %5750 = vmatmul.mubr.msk.f32.vlgmr.msra.gmra.mrb[24].mxu0 %vm601_vm4, %v2120_v5 }
 0xebf   :  { %5758 = vmatpush3.xpose.msk.msra.mxu0 %vm601_vm4, %v2274_v3  ;;  %5759 = vmatprep.mubr.msk.f32.mxu0 %vm6267_vm3, %v6266_v55 }
 0xec0   :  { %6017 = vmatprep.subr.bf16.mxu0 %v6016_v7 }
 0xec2   :  { %5760 = vmatmul.mubr.msk.f32.vlgmr.msra.gmra.mrb[26].mxu0 %vm601_vm4, %v2272_v11 }
 0xec3   :  { %6019 = vmatpush3.bf16.msra.mxu0 %v6016_v7  ;;  %5780 = vmatprep.mubr.msk.f32.mxu0 %vm138_vm2, %v6404_v39 }
 0xec4   :  { %6021 = vmatprep.subr.bf16.mxu0 %v6020_v10 }
 0xec7   :  { %6023 = vmatpush3.bf16.msra.mxu0 %v6020_v10 }
 0xec8   :  { %6033 = vmatprep.subr.bf16.mxu0 %v6032_v13 }
 0xeca   :  { %5781 = vmatmul.mubr.msk.f32.vlgmr.msra.gmra.mrb[28].mxu0 %vm138_vm2, %v6410_v48 }
 0xecb   :  { %6035 = vmatpush3.bf16.msra.mxu0 %v6032_v13  ;;  %5802 = vmatprep.mubr.msk.f32.mxu0 %vm138_vm2, %v6408_v46 }
 0xecc   :  { %6037 = vmatprep.subr.bf16.mxu0 %v6036_v17 }
 0xecf   :  { %6039 = vmatpush3.bf16.msra.mxu0 %v6036_v17 }
 0xed0   :  { %5810 = vmatprep.subr.mxu0 %v6266_v55 }
 0xed2   :  { %5803 = vmatmul.mubr.msk.f32.vlgmr.msra.gmra.mrb[30].mxu0 %vm138_vm2, %v6416_v53 }
 0xed3   :  { %5812 = vmatprep.mubr.msk.f32.mxu0 %vm6267_vm3, %v6266_v55 }
 0xf91   :  { %v2193_v18 = vpop.f32.mrb[24].mxu0 }
 0xf92   :  { %v5751_v19 = vpop.f32.mrb[25].mxu0  ;;  %5755 = vmatmul.mubr.msk.f32.vlgmr.msra.gmra.mrb[14].mxu1 %vm601_vm4, %v2193_v18 }
 0xf93   :  { %5764 = vmatprep.mubr.msk.f32.mxu1 %vm6267_vm3, %v6266_v55 }
 0xf95   :  { %v2345_v20 = vpop.f32.mrb[26].mxu0 }
 0xf96   :  { %v5761_v21 = vpop.f32.mrb[27].mxu0  ;;  %v2349_v22 = vsel %vm601_vm4, %v2345_v20, -inf }
 0xf97   :  { %2350 = vmax.xlane.f32.xlu1 %v2349_v22 }
 0xf9d   :  { %v5782_v24 = vpop.f32.mrb[28].mxu0 }
 0xf9e   :  { %v6630_v25 = vadd.f32 %v5782_v24, %v5362_v23  ;;  %v2588_v26 = vpop.f32.mrb[29].mxu0 }
 0xf9f   :  { %v6669_v61 = vadd.f32 %v5362_v23, %v2588_v26  ;;  %v6705_v26 = vld [vmem:[#allocation5 + $0xe8] sm:$0xff] }
 0xfa5   :  { %v5804_v28 = vpop.f32.mrb[30].mxu0 }
 0xfa6   :  { %v6635_v29 = vadd.f32 %v5804_v28, %v5368_v27  ;;  %v2758_v30 = vpop.f32.mrb[31].mxu0 }
 0xfa7   :  { %v6637_v31 = vadd.f32 %v5368_v27, %v2758_v30  ;;  %v6709_v30 = vld [vmem:[#allocation5 + $0xe0] sm:$0xff] }
 0xfa9   :  { %5811 = vmatpush3.msra.mxu0 %v6637_v31 }
 0xfaa   :  { %5820 = vmatprep.subr.mxu0 %v6266_v55 }
0x1024   :  { %v2351_v32 = vpop.xlane.xlu1 %2350 }
0x1025   :  { %v2352_v33 = vsub.f32 %v2345_v20, %v2351_v32 }
0x1027   :  { %v2353_v35 = vmul.f32 1.442695, %v2352_v33 }
0x1029   :  { %6159 = vpow2.f32 %v2353_v35 }
0x1033   :  { %v6160_v34 = vpop.eup %6159 }
0x1034   :  { %v2355_v36 = vsel %vm601_vm4, %v6160_v34, 0.0 }
0x1035   :  { %2356 = vadd.xlane.f32.xlu0 %v2355_v36 }
0x104b   :  { %2361 = vrot.lane.b32.xlu0 %v6459_v4, %s6270_s2  ;;  %v2600_v4 = vld [vmem:[#allocation5 + $0xb0] sm:$0xff] }
0x104c   :  { %v6028_v49 = vpack.c.bf16 %v2601_v47, %v2600_v4 }
0x10c2   :  { %v2357_v38 = vpop.xlane.xlu0 %2356 }
0x10c3   :  { %6161 = vrcp.f32 %v2357_v38 }
0x10c6   :  { %v2362_v41 = vpop.permute.xlu0 %2361 }
0x10c7   :  { %5763 = vmatpush3.msra.mxu1 %v2362_v41 }
0x10c8   :  { %5767 = vmatprep.subr.mxu1 %v6266_v55 }
0x10cd   :  { %v6162_v42 = vpop.eup %6161 }
0x10ce   :  { %v2360_v40 = vmul.f32 %v6162_v42, %v6160_v34 }
0x10d0   :  { %5765 = vmatmul.mubr.msk.f32.vlgmr.msra.gmra.mrb[16].mxu1 %vm601_vm4, %v2360_v40 }
0x10d1   :  { %5768 = vmatpush3.msra.mxu1 %v6553_v16  ;;  %5769 = vmatprep.mubr.msk.f32.mxu1 %vm6267_vm3, %v6266_v55 }
0x10d2   :  { %6025 = vmatprep.subr.bf16.mxu1 %v6024_v45 }
0x11a3   :  { %v2433_v50 = vpop.f32.mrb[16].mxu1 }
0x11a4   :  { %v5766_v51 = vpop.f32.mrb[17].mxu1  ;;  %5770 = vmatmul.mubr.msk.f32.vlgmr.msra.gmra.mrb[14].mxu1 %vm601_vm4, %v2433_v50 }
0x11a5   :  { %6027 = vmatpush3.bf16.msra.mxu1 %v6024_v45  ;;  %5791 = vmatprep.mubr.msk.f32.mxu1 %vm138_vm2, %v6408_v46  ;;  %v6745_v51 = vld [vmem:[#allocation5 + $0xf0] sm:$0xff] }
0x11a6   :  { %6029 = vmatprep.subr.bf16.mxu1 %v6028_v49 }
0x11a9   :  { %6031 = vmatpush3.bf16.msra.mxu1 %v6028_v49 }
0x11aa   :  { %5805 = vmatprep.subr.mxu1 %v6266_v55 }
0x11ac   :  { %5792 = vmatmul.mubr.msk.f32.vlgmr.msra.gmra.mrb[18].mxu1 %vm138_vm2, %v6416_v53 }
0x11ad   :  { %5807 = vmatprep.mubr.msk.f32.mxu1 %vm6267_vm3, %v6266_v55 }
0x1277   :  { %v2506_v16 = vpop.f32.mrb[14].mxu1 }
0x1278   :  { %2511 = vst.msk [vmem:[#allocation2 + $0x8] sm:$0xff] %vm138_vm2, %v2506_v16  ;;  %v5771_v52 = vpop.f32.mrb[15].mxu1 }
0x127f   :  { %v5793_v56 = vpop.f32.mrb[18].mxu1 }
0x1280   :  { %v6661_v57 = vadd.f32 %v5793_v56, %v5365_v54  ;;  %v2673_v37 = vpop.f32.mrb[19].mxu1 }
0x1281   :  { %v6663_v59 = vadd.f32 %v5365_v54, %v2673_v37 }
0x1283   :  { %2935 = vrot.lane.b32.xlu1 %v6663_v59, %s6268_s28  ;;  %5806 = vmatpush3.xpose.msk.msra.mxu1 %vm601_vm4, %v6663_v59 }
0x1284   :  { %5815 = vmatprep.subr.mxu1 %v6266_v55 }
0x1286   :  { %5808 = vmatmul.mubr.msk.f32.vlgmr.msra.gmra.mrb[20].mxu1 %vm601_vm4, %v6669_v61 }
0x1287   :  { %2933 = vrot.lane.b32.xlu1 %v6669_v61, %s6268_s28  ;;  %5817 = vmatprep.mubr.msk.f32.mxu1 %vm6267_vm3, %v6266_v55 }
0x12f5   :  { %v2936_v62 = vpop.permute.xlu1 %2935 }
0x12f6   :  { %5816 = vmatpush3.xpose.msk.msra.mxu1 %vm601_vm4, %v2936_v62 }
0x12f7   :  { %5825 = vmatprep.subr.mxu1 %v6266_v55 }
0x12f9   :  { %v2934_v0 = vpop.permute.xlu1 %2933 }
0x12fa   :  { %5818 = vmatmul.mubr.msk.f32.vlgmr.msra.gmra.mrb[22].mxu1 %vm601_vm4, %v2934_v0 }
0x12fb   :  { %5827 = vmatprep.mubr.msk.f32.mxu1 %vm6267_vm3, %v6266_v55  ;;  %5826 = vmatpush3.msra.mxu1 %v6705_v26 }
0x12fc   :  { %5830 = vmatprep.subr.mxu1 %v6266_v55 }
0x1359   :  { %v2844_v60 = vpop.f32.mrb[20].mxu1 }
0x135a   :  { %v5809_v1 = vpop.f32.mrb[21].mxu1  ;;  %v2848_v58 = vsel %vm601_vm4, %v2844_v60, -inf }
0x135b   :  { %2849 = vmax.xlane.f32.xlu0 %v2848_v58 }
0x13cd   :  { %v3007_v2 = vpop.f32.mrb[22].mxu1 }
0x13ce   :  { %v5819_v63 = vpop.f32.mrb[23].mxu1  ;;  %v3011_v3 = vsel %vm601_vm4, %v3007_v2, -inf }
0x13cf   :  { %3012 = vmax.xlane.f32.xlu1 %v3011_v3 }
0x13e0   :  { %3248 = vrot.lane.b32.xlu1 %v6663_v59, %s6269_s8 }
0x13e4   :  { %3246 = vrot.lane.b32.xlu1 %v6669_v61, %s6269_s8 }
0x13e8   :  { %v2850_v5 = vpop.xlane.xlu0 %2849 }
0x13e9   :  { %v2851_v7 = vsub.f32 %v2844_v60, %v2850_v5 }
0x13eb   :  { %v2852_v8 = vmul.f32 1.442695, %v2851_v7  ;;  %v6766_v7 = vld [vmem:[#allocation5 + $0xf8] sm:$0xff] }
0x13ed   :  { %6163 = vpow2.f32 %v2852_v8 }
0x13f7   :  { %v6164_v9 = vpop.eup %6163 }
0x13f8   :  { %v2854_v10 = vsel %vm601_vm4, %v6164_v9, 0.0 }
0x13f9   :  { %2855 = vadd.xlane.f32.xlu0 %v2854_v10 }
0x145c   :  { %v3013_v11 = vpop.xlane.xlu1 %3012 }
0x145d   :  { %v3014_v12 = vsub.f32 %v3007_v2, %v3013_v11 }
0x145f   :  { %v3015_v6 = vmul.f32 1.442695, %v3014_v12 }
0x1460   :  { %v3249_v22 = vpop.permute.xlu1 %3248 }
0x1461   :  { %6165 = vpow2.f32 %v3015_v6 }
0x1464   :  { %v3247_v24 = vpop.permute.xlu1 %3246 }
0x146b   :  { %v6166_v13 = vpop.eup %6165 }
0x146c   :  { %v3017_v14 = vsel %vm601_vm4, %v6166_v13, 0.0 }
0x146d   :  { %3018 = vadd.xlane.f32.xlu0 %v3017_v14 }
0x1483   :  { %3024 = vrot.lane.b32.xlu0 %v6637_v31, %s6268_s28 }
0x1486   :  { %v2856_v15 = vpop.xlane.xlu0 %2855 }
0x1487   :  { %6167 = vrcp.f32 %v2856_v15 }
0x1491   :  { %v6168_v17 = vpop.eup %6167 }
0x1492   :  { %v2859_v18 = vmul.f32 %v6168_v17, %v6164_v9 }
0x1494   :  { %5813 = vmatmul.mubr.msk.f32.vlgmr.msra.gmra.mrb[32].mxu0 %vm601_vm4, %v2859_v18 }
0x1495   :  { %5822 = vmatprep.mubr.msk.f32.mxu0 %vm6267_vm3, %v6266_v55 }
0x14fa   :  { %v3019_v19 = vpop.xlane.xlu0 %3018 }
0x14fb   :  { %6169 = vrcp.f32 %v3019_v19 }
0x14fe   :  { %v3025_v20 = vpop.permute.xlu0 %3024 }
0x14ff   :  { %5821 = vmatpush3.msra.mxu0 %v3025_v20 }
0x1500   :  { %5835 = vmatprep.subr.mxu0 %v6266_v55 }
0x1505   :  { %v6170_v21 = vpop.eup %6169 }
0x1506   :  { %v3022_v23 = vmul.f32 %v6170_v21, %v6166_v13 }
0x1508   :  { %5823 = vmatmul.mubr.msk.f32.vlgmr.msra.gmra.mrb[34].mxu0 %vm601_vm4, %v3022_v23 }
0x1509   :  { %5836 = vmatpush3.xpose.msk.msra.mxu0 %vm601_vm4, %v3249_v22  ;;  %5837 = vmatprep.mubr.msk.f32.mxu0 %vm6267_vm3, %v6266_v55 }
0x150a   :  { %5840 = vmatprep.subr.mxu0 %v6266_v55 }
0x150c   :  { %5838 = vmatmul.mubr.msk.f32.vlgmr.msra.gmra.mrb[36].mxu0 %vm601_vm4, %v3247_v24 }
0x150d   :  { %5842 = vmatprep.mubr.msk.f32.mxu0 %vm6267_vm3, %v6266_v55 }
0x1567   :  { %v2929_v27 = vpop.f32.mrb[32].mxu0 }
0x1568   :  { %v5814_v28 = vpop.f32.mrb[33].mxu0 }
0x15db   :  { %v3096_v32 = vpop.f32.mrb[34].mxu0 }
0x15dc   :  { %v5824_v33 = vpop.f32.mrb[35].mxu0  ;;  %5828 = vmatmul.mubr.msk.f32.vlgmr.msra.gmra.mrb[24].mxu1 %vm601_vm4, %v3096_v32 }
0x15dd   :  { %5831 = vmatpush3.msra.mxu1 %v6709_v30  ;;  %5832 = vmatprep.mubr.msk.f32.mxu1 %vm6267_vm3, %v6266_v55 }
0x15de   :  { %5845 = vmatprep.subr.mxu1 %v6266_v55 }
0x15df   :  { %v3320_v35 = vpop.f32.mrb[36].mxu0 }
0x15e0   :  { %v5839_v34 = vpop.f32.mrb[37].mxu0  ;;  %v3324_v36 = vsel %vm601_vm4, %v3320_v35, -inf }
0x15e1   :  { %3325 = vmax.xlane.f32.xlu1 %v3324_v36 }
0x15e4   :  { %5833 = vmatmul.mubr.msk.f32.vlgmr.msra.gmra.mrb[24].mxu1 %vm601_vm4, %v2929_v27 }
0x15e5   :  { %5847 = vmatprep.mubr.msk.f32.mxu1 %vm6267_vm3, %v6266_v55  ;;  %5846 = vmatpush3.msra.mxu1 %v6745_v51 }
0x15e6   :  { %5855 = vmatprep.subr.mxu1 %v6266_v55 }
0x15f2   :  { %3488 = vrot.lane.b32.xlu1 %v6663_v59, %s6270_s2 }
0x15f6   :  { %3486 = vrot.lane.b32.xlu1 %v6669_v61, %s6270_s2 }
0x166e   :  { %v3326_v38 = vpop.xlane.xlu1 %3325 }
0x166f   :  { %v3327_v41 = vsub.f32 %v3320_v35, %v3326_v38 }
0x1671   :  { %v3328_v42 = vmul.f32 1.442695, %v3327_v41 }
0x1672   :  { %v3489_v47 = vpop.permute.xlu1 %3488 }
0x1673   :  { %6171 = vpow2.f32 %v3328_v42 }
0x1676   :  { %v3487_v50 = vpop.permute.xlu1 %3486 }
0x167d   :  { %v6172_v40 = vpop.eup %6171 }
0x167e   :  { %v3330_v43 = vsel %vm601_vm4, %v6172_v40, 0.0 }
0x167f   :  { %3331 = vadd.xlane.f32.xlu0 %v3330_v43 }
0x1695   :  { %3336 = vrot.lane.b32.xlu0 %v6637_v31, %s6269_s8 }
0x170c   :  { %v3332_v44 = vpop.xlane.xlu0 %3331 }
0x170d   :  { %6173 = vrcp.f32 %v3332_v44 }
0x1710   :  { %v3337_v45 = vpop.permute.xlu0 %3336 }
0x1711   :  { %5841 = vmatpush3.msra.mxu0 %v3337_v45 }
0x1712   :  { %5850 = vmatprep.subr.mxu0 %v6266_v55 }
0x1717   :  { %v6174_v4 = vpop.eup %6173 }
0x1718   :  { %v3335_v49 = vmul.f32 %v6174_v4, %v6172_v40 }
0x171a   :  { %5843 = vmatmul.mubr.msk.f32.vlgmr.msra.gmra.mrb[38].mxu0 %vm601_vm4, %v3335_v49 }
0x171b   :  { %5851 = vmatpush3.xpose.msk.msra.mxu0 %vm601_vm4, %v3489_v47  ;;  %5852 = vmatprep.mubr.msk.f32.mxu0 %vm6267_vm3, %v6266_v55 }
0x171c   :  { %5865 = vmatprep.subr.mxu0 %v6266_v55 }
0x171e   :  { %5853 = vmatmul.mubr.msk.f32.vlgmr.msra.gmra.mrb[40].mxu0 %vm601_vm4, %v3487_v50 }
0x171f   :  { %5866 = vmatpush3.xpose.msk.msra.mxu0 %vm601_vm4, %v6661_v57  ;;  %5867 = vmatprep.mubr.msk.f32.mxu0 %vm6267_vm3, %v6266_v55 }
0x1720   :  { %5870 = vmatprep.subr.mxu0 %v6266_v55 }
0x1722   :  { %5868 = vmatmul.mubr.msk.f32.vlgmr.msra.gmra.mrb[42].mxu0 %vm601_vm4, %v6630_v25 }
0x1723   :  { %5871 = vmatpush3.msra.mxu0 %v6635_v29  ;;  %5872 = vmatprep.mubr.msk.f32.mxu0 %vm6267_vm3, %v6266_v55 }
0x1724   :  { %5880 = vmatprep.subr.mxu0 %v6266_v55 }
0x17ed   :  { %v3408_v16 = vpop.f32.mrb[38].mxu0 }
0x17ee   :  { %v5844_v52 = vpop.f32.mrb[39].mxu0  ;;  %5848 = vmatmul.mubr.msk.f32.vlgmr.msra.gmra.mrb[24].mxu1 %vm601_vm4, %v3408_v16 }
0x17ef   :  { %5857 = vmatprep.mubr.msk.f32.mxu1 %vm6267_vm3, %v6266_v55 }
0x17f1   :  { %v3560_v54 = vpop.f32.mrb[40].mxu0 }
0x17f2   :  { %v5854_v56 = vpop.f32.mrb[41].mxu0  ;;  %v3564_v37 = vsel %vm601_vm4, %v3560_v54, -inf }
0x17f3   :  { %3565 = vmax.xlane.f32.xlu0 %v3564_v37 }
0x17f5   :  { %v3799_v59 = vpop.f32.mrb[42].mxu0 }
0x17f6   :  { %v5869_v61 = vpop.f32.mrb[43].mxu0 }
0x17f7   :  { %v5404_v61 = vld [vmem:[%s6930_s5 + $0xd] ss:$0 sm:$0xff] }
0x1809   :  { %3576 = vrot.lane.b32.xlu0 %v6637_v31, %s6270_s2  ;;  %v3803_v31 = vsel %vm601_vm4, %v3799_v59, -inf }
0x180d   :  { %3888 = vrot.lane.b32.xlu0 %v6630_v25, %s6268_s28 }
0x1880   :  { %v3566_v62 = vpop.xlane.xlu0 %3565 }
0x1881   :  { %v3567_v0 = vsub.f32 %v3560_v54, %v3566_v62 }
0x1883   :  { %v3568_v60 = vmul.f32 1.442695, %v3567_v0 }
0x1884   :  { %v3577_v1 = vpop.permute.xlu0 %3576 }
0x1885   :  { %6175 = vpow2.f32 %v3568_v60  ;;  %5856 = vmatpush3.msra.mxu1 %v3577_v1 }
0x1886   :  { %5860 = vmatprep.subr.mxu1 %v6266_v55 }
0x1888   :  { %v3889_v11 = vpop.permute.xlu0 %3888 }
0x188f   :  { %v6176_v58 = vpop.eup %6175 }
0x1890   :  { %v3570_v2 = vsel %vm601_vm4, %v6176_v58, 0.0 }
0x1891   :  { %3571 = vadd.xlane.f32.xlu1 %v3570_v2 }
0x18a2   :  { %3890 = vrot.lane.b32.xlu1 %v6661_v57, %s6268_s28 }
0x18c6   :  { %3804 = vmax.xlane.f32.xlu1 %v3803_v31 }
0x18d7   :  { %3979 = vrot.lane.b32.xlu1 %v6635_v29, %s6268_s28 }
0x18db   :  { %4201 = vrot.lane.b32.xlu1 %v6630_v25, %s6269_s8 }
0x191e   :  { %v3572_v63 = vpop.xlane.xlu1 %3571 }
0x191f   :  { %6177 = vrcp.f32 %v3572_v63 }
0x1922   :  { %v3891_v9 = vpop.permute.xlu1 %3890 }
0x1929   :  { %v6178_v3 = vpop.eup %6177 }
0x192a   :  { %v3575_v5 = vmul.f32 %v6178_v3, %v6176_v58 }
0x192c   :  { %5858 = vmatmul.mubr.msk.f32.vlgmr.msra.gmra.mrb[26].mxu1 %vm601_vm4, %v3575_v5 }
0x192d   :  { %5861 = vmatpush3.msra.mxu1 %v6766_v7  ;;  %5862 = vmatprep.mubr.msk.f32.mxu1 %vm6267_vm3, %v6266_v55 }
0x192e   :  { %5875 = vmatprep.subr.mxu1 %v6266_v55 }
0x1953   :  { %v3805_v12 = vpop.xlane.xlu1 %3804 }
0x1954   :  { %v3806_v6 = vsub.f32 %v3799_v59, %v3805_v12 }
0x1956   :  { %v3807_v13 = vmul.f32 1.442695, %v3806_v6 }
0x1957   :  { %v3980_v35 = vpop.permute.xlu1 %3979 }
0x1958   :  { %6179 = vpow2.f32 %v3807_v13 }
0x195b   :  { %v4202_v42 = vpop.permute.xlu1 %4201 }
0x1962   :  { %v6180_v20 = vpop.eup %6179 }
0x1963   :  { %v3809_v21 = vsel %vm601_vm4, %v6180_v20, 0.0 }
0x19ff   :  { %v3648_v8 = vpop.f32.mrb[26].mxu1 }
0x1a00   :  { %v5859_v10 = vpop.f32.mrb[27].mxu1  ;;  %5863 = vmatmul.mubr.msk.f32.vlgmr.msra.gmra.mrb[24].mxu1 %vm601_vm4, %v3648_v8 }
0x1a01   :  { %5876 = vmatpush3.xpose.msk.msra.mxu1 %vm601_vm4, %v3891_v9  ;;  %5877 = vmatprep.mubr.msk.f32.mxu1 %vm6267_vm3, %v6266_v55 }
0x1a02   :  { %5885 = vmatprep.subr.mxu1 %v6266_v55 }
0x1a04   :  { %5878 = vmatmul.mubr.msk.f32.vlgmr.msra.gmra.mrb[28].mxu1 %vm601_vm4, %v3889_v11 }
0x1a05   :  { %5886 = vmatpush3.msra.mxu1 %v6705_v26  ;;  %5887 = vmatprep.mubr.msk.f32.mxu1 %vm6267_vm3, %v6266_v55 }
0x1a06   :  { %5890 = vmatprep.subr.mxu1 %v6266_v55 }
0x1ad3   :  { %v3721_v14 = vpop.f32.mrb[24].mxu1 }
0x1ad4   :  { %3726 = vst.msk [vmem:[#allocation3] sm:$0xff] %vm138_vm2, %v3721_v14  ;;  %v5864_v15 = vpop.f32.mrb[25].mxu1 }
0x1ad5   :  { %v4707_v15 = vld [vmem:[#allocation5 + $0x128] sm:$0xff] }
0x1ad7   :  { %v3962_v17 = vpop.f32.mrb[28].mxu1 }
0x1ad8   :  { %v5879_v18 = vpop.f32.mrb[29].mxu1  ;;  %v3966_v19 = vsel %vm601_vm4, %v3962_v17, -inf }
0x1ad9   :  { %3967 = vmax.xlane.f32.xlu0 %v3966_v19  ;;  %v4709_v19 = vld [vmem:[#allocation5 + $0x138] sm:$0xff] }
0x1adb   :  { %v4691_v59 = vld [vmem:[#allocation3] sm:$0xff] }
0x1adc   :  { %v4698_v0 = vadd.f32 %v5404_v61, %v4691_v59 }
0x1add   :  { %3810 = vadd.xlane.f32.xlu0 %v3809_v21  ;;  %v4701_v21 = vld [vmem:[#allocation5 + $0x100] sm:$0xff] }
0x1b66   :  { %v3968_v22 = vpop.xlane.xlu0 %3967 }
0x1b67   :  { %v3969_v23 = vsub.f32 %v3962_v17, %v3968_v22  ;;  %v4708_v17 = vld [vmem:[#allocation5 + $0x130] sm:$0xff]  ;;  %v4702_v22 = vld [vmem:[#allocation5 + $0x108] sm:$0xff] }
0x1b69   :  { %v3970_v24 = vmul.f32 1.442695, %v3969_v23  ;;  %v6048_v23 = vpack.c.bf16 %v4702_v22, %v4701_v21 }
0x1b6a   :  { %v3811_v26 = vpop.xlane.xlu0 %3810 }
0x1b6b   :  { %6181 = vpow2.f32 %v3970_v24  ;;  %v4703_v24 = vld [vmem:[#allocation5 + $0x110] sm:$0xff] }
0x1b6c   :  { %6183 = vrcp.f32 %v3811_v26  ;;  %v4704_v26 = vld [vmem:[#allocation5 + $0x118] sm:$0xff] }
0x1b75   :  { %v6182_v27 = vpop.eup %6181 }
0x1b76   :  { %v6184_v28 = vpop.eup %6183  ;;  %v3972_v32 = vsel %vm601_vm4, %v6182_v27, 0.0 }
0x1b77   :  { %v3814_v33 = vmul.f32 %v6184_v28, %v6180_v20  ;;  %3973 = vadd.xlane.f32.xlu0 %v3972_v32  ;;  %v6044_v20 = vpack.c.bf16 %v4709_v19, %v4708_v17  ;;  %v5403_v28 = vld [vmem:[%s6930_s5 + $0x9] ss:$0 sm:$0xff]  ;;  %v5411_v17 = vld [vmem:[%s6930_s5 + $0x10] ss:$0 sm:$0xff] }
0x1b79   :  { %5873 = vmatmul.mubr.msk.f32.vlgmr.msra.gmra.mrb[44].mxu0 %vm601_vm4, %v3814_v33 }
0x1b7a   :  { %5881 = vmatpush3.msra.mxu0 %v3980_v35  ;;  %5882 = vmatprep.mubr.msk.f32.mxu0 %vm6267_vm3, %v6266_v55  ;;  %v6052_v35 = vpack.c.bf16 %v4704_v26, %v4703_v24 }
0x1b7b   :  { %5895 = vmatprep.subr.mxu0 %v6266_v55 }
0x1b8d   :  { %4203 = vrot.lane.b32.xlu0 %v6661_v57, %s6269_s8 }
0x1c04   :  { %v3974_v34 = vpop.xlane.xlu0 %3973 }
0x1c05   :  { %6185 = vrcp.f32 %v3974_v34 }
0x1c08   :  { %v4204_v41 = vpop.permute.xlu0 %4203 }
0x1c0f   :  { %v6186_v36 = vpop.eup %6185 }
0x1c10   :  { %v3977_v38 = vmul.f32 %v6186_v36, %v6182_v27  ;;  %v4682_v27 = vld [vmem:[#allocation2] sm:$0xff] }
0x1c11   :  { %v4689_v34 = vadd.f32 %v5403_v28, %v4682_v27  ;;  %v5146_v36 = vld [vmem:[#allocation5 + $0x180] sm:$0xff] }
0x1c12   :  { %5883 = vmatmul.mubr.msk.f32.vlgmr.msra.gmra.mrb[46].mxu0 %vm601_vm4, %v3977_v38  ;;  %v5147_v38 = vld [vmem:[#allocation5 + $0x188] sm:$0xff] }
0x1c13   :  { %5896 = vmatpush3.xpose.msk.msra.mxu0 %vm601_vm4, %v4204_v41  ;;  %5897 = vmatprep.mubr.msk.f32.mxu0 %vm6267_vm3, %v6266_v55  ;;  %v6072_v41 = vpack.c.bf16 %v5147_v38, %v5146_v36 }
0x1c14   :  { %5900 = vmatprep.subr.mxu0 %v6266_v55 }
0x1c16   :  { %5898 = vmatmul.mubr.msk.f32.vlgmr.msra.gmra.mrb[48].mxu0 %vm601_vm4, %v4202_v42  ;;  %v4683_v42 = vld [vmem:[#allocation2 + $0x8] sm:$0xff] }
0x1c17   :  { %5902 = vmatprep.mubr.msk.f32.mxu0 %vm6267_vm3, %v6266_v55 }
0x1c4c   :  { %v3884_v40 = vpop.f32.mrb[44].mxu0 }
0x1c4d   :  { %v5874_v43 = vpop.f32.mrb[45].mxu0 }
0x1c4e   :  { %v5149_v43 = vld [vmem:[#allocation5 + $0x198] sm:$0xff] }
0x1ce5   :  { %v4051_v44 = vpop.f32.mrb[46].mxu0 }
0x1ce6   :  { %v5884_v45 = vpop.f32.mrb[47].mxu0  ;;  %5888 = vmatmul.mubr.msk.f32.vlgmr.msra.gmra.mrb[30].mxu1 %vm601_vm4, %v4051_v44  ;;  %v4690_v44 = vadd.f32 %v5403_v28, %v4683_v42  ;;  %v5412_v42 = vld [vmem:[%s6930_s5 + $0x11] ss:$0 sm:$0xff] }
0x1ce7   :  { %5891 = vmatpush3.msra.mxu1 %v6709_v30  ;;  %5892 = vmatprep.mubr.msk.f32.mxu1 %vm6267_vm3, %v6266_v55 }
0x1ce8   :  { %5905 = vmatprep.subr.mxu1 %v6266_v55 }
0x1ce9   :  { %v4275_v4 = vpop.f32.mrb[48].mxu0 }
0x1cea   :  { %v5899_v47 = vpop.f32.mrb[49].mxu0  ;;  %v4279_v49 = vsel %vm601_vm4, %v4275_v4, -inf }
0x1ceb   :  { %4280 = vmax.xlane.f32.xlu1 %v4279_v49 }
0x1cee   :  { %5893 = vmatmul.mubr.msk.f32.vlgmr.msra.gmra.mrb[30].mxu1 %vm601_vm4, %v3884_v40  ;;  %v5148_v40 = vld [vmem:[#allocation5 + $0x190] sm:$0xff] }
0x1cef   :  { %5906 = vmatpush3.msra.mxu1 %v6745_v51  ;;  %5907 = vmatprep.mubr.msk.f32.mxu1 %vm6267_vm3, %v6266_v55  ;;  %v6076_v45 = vpack.c.bf16 %v5149_v43, %v5148_v40 }
0x1cf0   :  { %5915 = vmatprep.subr.mxu1 %v6266_v55 }
0x1cfc   :  { %4443 = vrot.lane.b32.xlu1 %v6661_v57, %s6270_s2 }
0x1d00   :  { %4441 = vrot.lane.b32.xlu1 %v6630_v25, %s6270_s2 }
0x1d78   :  { %v4281_v30 = vpop.xlane.xlu1 %4280 }
0x1d79   :  { %v4282_v50 = vsub.f32 %v4275_v4, %v4281_v30  ;;  %v5409_v4 = vld [vmem:[%s6930_s5 + $0xe] ss:$0 sm:$0xff] }
0x1d7b   :  { %v4283_v16 = vmul.f32 1.442695, %v4282_v50 }
0x1d7c   :  { %v4444_v37 = vpop.permute.xlu1 %4443 }
0x1d7d   :  { %6187 = vpow2.f32 %v4283_v16 }
0x1d80   :  { %v4442_v62 = vpop.permute.xlu1 %4441 }
0x1d87   :  { %v6188_v52 = vpop.eup %6187 }
0x1d88   :  { %v4285_v54 = vsel %vm601_vm4, %v6188_v52, 0.0 }
0x1d89   :  { %4286 = vadd.xlane.f32.xlu0 %v4285_v54 }
0x1d9f   :  { %4291 = vrot.lane.b32.xlu0 %v6635_v29, %s6269_s8 }
0x1e16   :  { %v4287_v51 = vpop.xlane.xlu0 %4286 }
0x1e17   :  { %6189 = vrcp.f32 %v4287_v51 }
0x1e1a   :  { %v4292_v56 = vpop.permute.xlu0 %4291 }
0x1e1b   :  { %5901 = vmatpush3.msra.mxu0 %v4292_v56 }
0x1e1c   :  { %5910 = vmatprep.subr.mxu0 %v6266_v55 }
0x1e21   :  { %v6190_v57 = vpop.eup %6189 }
0x1e22   :  { %v4290_v25 = vmul.f32 %v6190_v57, %v6188_v52 }
0x1e24   :  { %5903 = vmatmul.mubr.msk.f32.vlgmr.msra.gmra.mrb[50].mxu0 %vm601_vm4, %v4290_v25 }
0x1e25   :  { %5911 = vmatpush3.xpose.msk.msra.mxu0 %vm601_vm4, %v4444_v37  ;;  %5912 = vmatprep.mubr.msk.f32.mxu0 %vm6267_vm3, %v6266_v55 }
0x1e28   :  { %5913 = vmatmul.mubr.msk.f32.vlgmr.msra.gmra.mrb[52].mxu0 %vm601_vm4, %v4442_v62 }
0x1e29   :  { %5933 = vmatprep.mubr.msk.f32.mxu0 %vm138_vm2, %v4698_v0 }
0x1ef7   :  { %v4363_v60 = vpop.f32.mrb[50].mxu0 }
0x1ef8   :  { %v5904_v1 = vpop.f32.mrb[51].mxu0  ;;  %5908 = vmatmul.mubr.msk.f32.vlgmr.msra.gmra.mrb[30].mxu1 %vm601_vm4, %v4363_v60  ;;  %v4930_v60 = vld [vmem:[#allocation5 + $0x140] sm:$0xff] }
0x1ef9   :  { %5917 = vmatprep.mubr.msk.f32.mxu1 %vm6267_vm3, %v6266_v55  ;;  %v4931_v1 = vld [vmem:[#allocation5 + $0x148] sm:$0xff] }
0x1efb   :  { %v4515_v58 = vpop.f32.mrb[52].mxu0 }
0x1efc   :  { %v5914_v2 = vpop.f32.mrb[53].mxu0  ;;  %v4519_v31 = vsel %vm601_vm4, %v4515_v58, -inf }
0x1efd   :  { %4520 = vmax.xlane.f32.xlu1 %v4519_v31  ;;  %v6056_v2 = vpack.c.bf16 %v4931_v1, %v4930_v60  ;;  %v4933_v31 = vld [vmem:[#allocation5 + $0x158] sm:$0xff] }
0x1f8a   :  { %v4521_v63 = vpop.xlane.xlu1 %4520 }
0x1f8b   :  { %v4522_v3 = vsub.f32 %v4515_v58, %v4521_v63  ;;  %v4932_v58 = vld [vmem:[#allocation5 + $0x150] sm:$0xff] }
0x1f8c   :  { %v6060_v63 = vpack.c.bf16 %v4933_v31, %v4932_v58 }
0x1f8d   :  { %v4523_v5 = vmul.f32 1.442695, %v4522_v3  ;;  %v5061_v3 = vld [vmem:[#allocation5 + $0x160] sm:$0xff] }
0x1f8f   :  { %6191 = vpow2.f32 %v4523_v5  ;;  %v5062_v5 = vld [vmem:[#allocation5 + $0x168] sm:$0xff] }
0x1f99   :  { %v6192_v8 = vpop.eup %6191 }
0x1f9a   :  { %v4525_v9 = vsel %vm601_vm4, %v6192_v8, 0.0 }
0x1f9b   :  { %4526 = vadd.xlane.f32.xlu0 %v4525_v9 }
0x1fb1   :  { %4531 = vrot.lane.b32.xlu0 %v6635_v29, %s6270_s2  ;;  %v4706_v29 = vld [vmem:[#allocation5 + $0x120] sm:$0xff] }
0x1fb2   :  { %v6040_v18 = vpack.c.bf16 %v4707_v15, %v4706_v29  ;;  %v5410_v29 = vld [vmem:[%s6930_s5 + $0xf] ss:$0 sm:$0xff] }
0x1fb4   :  { %6041 = vmatprep.subr.bf16.mxu0 %v6040_v18 }
0x1fb5   :  { %6043 = vmatpush3.bf16.msra.mxu0 %v6040_v18 }
0x1fb6   :  { %6045 = vmatprep.subr.bf16.mxu0 %v6044_v20 }
0x1fb9   :  { %6047 = vmatpush3.bf16.msra.mxu0 %v6044_v20 }
0x1fba   :  { %6049 = vmatprep.subr.bf16.mxu0 %v6048_v23 }
0x2028   :  { %v4527_v10 = vpop.xlane.xlu0 %4526 }
0x2029   :  { %6193 = vrcp.f32 %v4527_v10 }
0x202c   :  { %v4532_v11 = vpop.permute.xlu0 %4531 }
0x202d   :  { %5916 = vmatpush3.msra.mxu1 %v4532_v11 }
0x202e   :  { %5920 = vmatprep.subr.mxu1 %v6266_v55 }
0x2033   :  { %v6194_v12 = vpop.eup %6193 }
0x2034   :  { %v4530_v6 = vmul.f32 %v6194_v12, %v6192_v8  ;;  %v6064_v8 = vpack.c.bf16 %v5062_v5, %v5061_v3 }
0x2036   :  { %5918 = vmatmul.mubr.msk.f32.vlgmr.msra.gmra.mrb[32].mxu1 %vm601_vm4, %v4530_v6 }
0x2037   :  { %5921 = vmatpush3.msra.mxu1 %v6766_v7  ;;  %5922 = vmatprep.mubr.msk.f32.mxu1 %vm6267_vm3, %v6266_v55 }
0x2038   :  { %6057 = vmatprep.subr.bf16.mxu1 %v6056_v2 }
0x2109   :  { %v4603_v13 = vpop.f32.mrb[32].mxu1 }
0x210a   :  { %v5919_v14 = vpop.f32.mrb[33].mxu1  ;;  %5923 = vmatmul.mubr.msk.f32.vlgmr.msra.gmra.mrb[30].mxu1 %vm601_vm4, %v4603_v13 }
0x210b   :  { %6059 = vmatpush3.bf16.msra.mxu1 %v6056_v2 }
0x210c   :  { %6061 = vmatprep.subr.bf16.mxu1 %v6060_v63 }
0x210f   :  { %6063 = vmatpush3.bf16.msra.mxu1 %v6060_v63 }
0x2110   :  { %6065 = vmatprep.subr.bf16.mxu1 %v6064_v8 }
0x21dd   :  { %v4676_v7 = vpop.f32.mrb[30].mxu1 }
0x21de   :  { %4681 = vst.msk [vmem:[#allocation3 + $0x8] sm:$0xff] %vm138_vm2, %v4676_v7  ;;  %v5924_v55 = vpop.f32.mrb[31].mxu1 }
0x21e5   :  { %v4692_v32 = vld [vmem:[#allocation3 + $0x8] sm:$0xff] }
0x21e6   :  { %v4699_v33 = vadd.f32 %v5404_v61, %v4692_v32 }
0x21e8   :  { %5934 = vmatmul.mubr.msk.f32.vlgmr.msra.gmra.mrb[54].mxu0 %vm138_vm2, %v4699_v33  ;;  %v5063_v33 = vld [vmem:[#allocation5 + $0x170] sm:$0xff] }
0x21e9   :  { %6051 = vmatpush3.bf16.msra.mxu0 %v6048_v23  ;;  %5944 = vmatprep.mubr.msk.f32.mxu0 %vm138_vm2, %v4689_v34 }
0x21ea   :  { %6053 = vmatprep.subr.bf16.mxu0 %v6052_v35 }
0x21ed   :  { %6055 = vmatpush3.bf16.msra.mxu0 %v6052_v35  ;;  %v5064_v35 = vld [vmem:[#allocation5 + $0x178] sm:$0xff] }
0x21ee   :  { %6073 = vmatprep.subr.bf16.mxu0 %v6072_v41 }
0x21f0   :  { %5945 = vmatmul.mubr.msk.f32.vlgmr.msra.gmra.mrb[54].mxu0 %vm138_vm2, %v4690_v44 }
0x21f1   :  { %6075 = vmatpush3.bf16.msra.mxu0 %v6072_v41  ;;  %5977 = vmatprep.mubr.msk.f32.mxu0 %vm138_vm2, %v6404_v39  ;;  %v6068_v41 = vpack.c.bf16 %v5064_v35, %v5063_v33 }
0x21f2   :  { %6077 = vmatprep.subr.bf16.mxu0 %v6076_v45 }
0x21f5   :  { %6079 = vmatpush3.bf16.msra.mxu0 %v6076_v45 }
0x21f8   :  { %5978 = vmatmul.mubr.msk.f32.vlgmr.msra.gmra.mrb[56].mxu0 %vm138_vm2, %v6410_v48 }
0x22c3   :  { %v5946_v47 = vpop.f32.mrb[54].mxu0 }
0x22c4   :  { %v4863_v49 = vpop.f32.mrb[55].mxu0  ;;  %v4878_v50 = vadd.f32 %v5946_v47, %v5409_v4 }
0x22c5   :  { %v4877_v30 = vadd.f32 %v5409_v4, %v4863_v49 }
0x22c6   :  { %v4884_v39 = vsel %vm138_vm2, %v4878_v50, 0.0 }
0x22c7   :  { %v4881_v16 = vsel %vm138_vm2, %v4877_v30, 0.0 }
0x22c8   :  { %4882 = vadd.xlane.f32.xlu1 %v4881_v16 }
0x22cb   :  { %v6857_v52 = vpop.f32.mrb[56].mxu0 }
0x22cc   :  { %v6860_v54 = vpop.f32.mrb[57].mxu0  ;;  %4885 = vadd.xlane.f32.xlu1 %v4884_v39 }
0x2355   :  { %v4883_v51 = vpop.xlane.xlu1 %4882 }
0x2356   :  { %v4887_v48 = vmul.f32 0.03125, %v4883_v51 }
0x2358   :  { %v4889_v56 = vsub.f32 %v4877_v30, %v4887_v48  ;;  %v5417_v48 = vld [vmem:[%s6930_s5 + $0x14] ss:$0 sm:$0xff] }
0x2359   :  { %v4886_v57 = vpop.xlane.xlu1 %4885 }
0x235a   :  { %v4888_v37 = vmul.f32 0.03125, %v4886_v57  ;;  %v4891_v25 = vmul.f32 %v4889_v56, %v4889_v56 }
0x235c   :  { %v4890_v59 = vsub.f32 %v4878_v50, %v4888_v37  ;;  %v4893_v61 = vsel %vm138_vm2, %v4891_v25, 0.0 }
0x235d   :  { %4894 = vadd.xlane.f32.xlu1 %v4893_v61 }
0x235e   :  { %v4892_v62 = vmul.f32 %v4890_v59, %v4890_v59 }
0x2360   :  { %v4896_v0 = vsel %vm138_vm2, %v4892_v62, 0.0 }
0x2361   :  { %4897 = vadd.xlane.f32.xlu1 %v4896_v0 }
0x23ea   :  { %v4895_v9 = vpop.xlane.xlu1 %4894 }
0x23eb   :  { %v4899_v10 = vmul.f32 0.03125, %v4895_v9  ;;  %v5415_v9 = vld [vmem:[%s6930_s5 + $0x12] ss:$0 sm:$0xff] }
0x23ed   :  { %v4901_v11 = vadd.f32 1e-05, %v4899_v10 }
0x23ee   :  { %v4898_v12 = vpop.xlane.xlu1 %4897 }
0x23ef   :  { %6195 = vrsqrt.f32 %v4901_v11  ;;  %v4900_v6 = vmul.f32 0.03125, %v4898_v12  ;;  %v5416_v11 = vld [vmem:[%s6930_s5 + $0x13] ss:$0 sm:$0xff] }
0x23f1   :  { %v4902_v13 = vadd.f32 1e-05, %v4900_v6 }
0x23f3   :  { %6197 = vrsqrt.f32 %v4902_v13 }
0x23f9   :  { %v6196_v14 = vpop.eup %6195 }
0x23fa   :  { %v4905_v15 = vmul.f32 %v6196_v14, %v4889_v56 }
0x23fc   :  { %v4911_v18 = vmul.f32 %v5410_v29, %v4905_v15 }
0x23fd   :  { %v6198_v19 = vpop.eup %6197 }
0x23fe   :  { %v4906_v20 = vmul.f32 %v6198_v19, %v4890_v59  ;;  %v4917_v21 = vadd.f32 %v5411_v17, %v4911_v18 }
0x2400   :  { %v4912_v22 = vmul.f32 %v5410_v29, %v4906_v20  ;;  %v4921_v23 = vmul.f32 0.70710677, %v4917_v21  ;;  %v4919_v26 = vmul.f32 0.5, %v4917_v21  ;;  %v5420_v29 = vld [vmem:[%s6930_s5 + $0x15] ss:$0 sm:$0xff] }
0x2401   :  { %v5222_v18 = vadd.f32 %v5420_v29, %v6860_v54 }
0x2402   :  { %v4918_v7 = vadd.f32 %v5411_v17, %v4912_v22  ;;  %6199 = verf.f32 %v4921_v23  ;;  %v5227_v22 = vadd.f32 %v6857_v52, %v5420_v29  ;;  %v5253_v52 = vstv %s6931_s6  ;;  %s6271_s6 = smov [#allocation8]  }
0x2403   :  { %s5299_s10 = sshll.u32 %s6271_s6, 4  ;;  %s5300_s10 = int_to_ptr.vmem [resolvable:$true] %s5299_s10 }
0x2404   :  { %v4922_v55 = vmul.f32 0.70710677, %v4918_v7  ;;  %v4920_v34 = vmul.f32 0.5, %v4918_v7  ;;  %v5270_v7 = vmul.f32 %v5222_v18, %v5222_v18  ;;  %s6237_s13 = scalar_lea.vmem %s5300_s10, 256  ;;  %p6242_p9 = scmp.lt.s32.totalorder %s5300_s10, %s5300_s10 }
0x2405   :  { %p6238_p8 = scmp.ne.s32.totalorder %s5300_s10, %s6237_s13  ;;  %p6243_p10 = scmp.lt.s32.totalorder %s6237_s13, %s6237_s13 }
0x2406   :  { %6201 = verf.f32 %v4922_v55  ;;  %v5272_v55 = vsel %vm138_vm2, %v5270_v7, 0.0 }
0x2407   :  { %p6244_p11 = por %p6243_p10, %p6242_p9 }
0x2409   :  { %p6245_p12 = pnand %p6244_p11, %p6238_p8 }
0x240c   :  { %v6200_v24 = vpop.eup %6199 }
0x240d   :  { %v4925_v27 = vadd.f32 1.0, %v6200_v24  ;;  %v5271_v24 = vmul.f32 %v5227_v22, %v5227_v22 }
0x240f   :  { %v4927_v28 = vmul.f32 %v4925_v27, %v4919_v26  ;;  %v5275_v26 = vsel %vm138_vm2, %v5271_v24, 0.0 }
0x2410   :  { %v6202_v32 = vpop.eup %6201 }
0x2411   :  { %5955 = vmatprep.mubr.msk.f32.mxu1 %vm138_vm2, %v4927_v28  ;;  %v4926_v36 = vadd.f32 1.0, %v6202_v32 }
0x2413   :  { %v4928_v38 = vmul.f32 %v4926_v36, %v4920_v34 }
0x2415   :  { %5956 = vmatmul.mubr.msk.f32.vlgmr.msra.gmra.mrb[34].mxu1 %vm138_vm2, %v4928_v38 }
0x2416   :  { %6067 = vmatpush3.bf16.msra.mxu1 %v6064_v8  ;;  %5966 = vmatprep.mubr.msk.f32.mxu1 %vm138_vm2, %v6408_v46 }
0x2417   :  { %6069 = vmatprep.subr.bf16.mxu1 %v6068_v41 }
0x241a   :  { %6071 = vmatpush3.bf16.msra.mxu1 %v6068_v41 }
0x241d   :  { %5967 = vmatmul.mubr.msk.f32.vlgmr.msra.gmra.mrb[36].mxu1 %vm138_vm2, %v6416_v53 }
0x24e8   :  { %v5957_v40 = vpop.f32.mrb[34].mxu1 }
0x24e9   :  { %v5017_v43 = vadd.f32 %v5957_v40, %v5412_v42  ;;  %v5011_v44 = vpop.f32.mrb[35].mxu1 }
0x24ea   :  { %v5012_v45 = vadd.f32 %v5412_v42, %v5011_v44 }
0x24eb   :  { %v5025_v4 = vsel %vm138_vm2, %v5017_v43, 0.0 }
0x24ec   :  { %5026 = vadd.xlane.f32.xlu0 %v5025_v4  ;;  %v5022_v47 = vsel %vm138_vm2, %v5012_v45, 0.0 }
0x24ed   :  { %5023 = vadd.xlane.f32.xlu1 %v5022_v47 }
0x24f0   :  { %v5968_v46 = vpop.f32.mrb[36].mxu1 }
0x24f1   :  { %v5136_v49 = vpop.f32.mrb[37].mxu1  ;;  %v5142_v59 = vadd.f32 %v5968_v46, %v5417_v48 }
0x24f2   :  { %v5137_v57 = vadd.f32 %v5417_v48, %v5136_v49 }
0x24f3   :  { %v5240_v60 = vmul.f32 %v5142_v59, %v5142_v59 }
0x24f4   :  { %v5239_v62 = vmul.f32 %v5137_v57, %v5137_v57 }
0x24f5   :  { %v5244_v1 = vsel %vm138_vm2, %v5240_v60, 0.0 }
0x24f6   :  { %v5241_v0 = vsel %vm138_vm2, %v5239_v62, 0.0 }
0x2579   :  { %v5027_v30 = vpop.xlane.xlu0 %5026 }
0x257a   :  { %v5029_v50 = vmul.f32 0.03125, %v5027_v30  ;;  %v5024_v16 = vpop.xlane.xlu1 %5023 }
0x257b   :  { %v5028_v53 = vmul.f32 0.03125, %v5024_v16 }
0x257c   :  { %v5031_v39 = vsub.f32 %v5017_v43, %v5029_v50 }
0x257d   :  { %v5030_v51 = vsub.f32 %v5012_v45, %v5028_v53 }
0x257e   :  { %v5033_v25 = vmul.f32 %v5031_v39, %v5031_v39 }
0x257f   :  { %v5032_v56 = vmul.f32 %v5030_v51, %v5030_v51 }
0x2580   :  { %v5037_v61 = vsel %vm138_vm2, %v5033_v25, 0.0 }
0x2581   :  { %v5034_v37 = vsel %vm138_vm2, %v5032_v56, 0.0 }
0x2582   :  { %5035 = vadd.xlane.f32.xlu1 %v5034_v37 }
0x2586   :  { %5038 = vadd.xlane.f32.xlu1 %v5037_v61 }
0x258a   :  { %5242 = vadd.xlane.f32.xlu1 %v5241_v0 }
0x258e   :  { %5245 = vadd.xlane.f32.xlu1 %v5244_v1 }
0x260f   :  { %v5036_v58 = vpop.xlane.xlu1 %5035 }
0x2610   :  { %v5040_v2 = vmul.f32 0.03125, %v5036_v58 }
0x2612   :  { %v5042_v31 = vadd.f32 1e-05, %v5040_v2 }
0x2613   :  { %v5039_v63 = vpop.xlane.xlu1 %5038 }
0x2614   :  { %6203 = vrsqrt.f32 %v5042_v31  ;;  %v5041_v3 = vmul.f32 0.03125, %v5039_v63 }
0x2616   :  { %v5043_v5 = vadd.f32 1e-05, %v5041_v3 }
0x2617   :  { %v5243_v27 = vpop.xlane.xlu1 %5242 }
0x2618   :  { %6205 = vrsqrt.f32 %v5043_v5  ;;  %v5247_v54 = vadd.f32 1e-08, %v5243_v27 }
0x261a   :  { %6207 = vrcp.f32 %v5247_v54 }
0x261b   :  { %v5246_v28 = vpop.xlane.xlu1 %5245 }
0x261c   :  { %v5248_v32 = vadd.f32 1e-08, %v5246_v28 }
0x261e   :  { %v6204_v8 = vpop.eup %6203  ;;  %6209 = vrcp.f32 %v5248_v32 }
0x261f   :  { %v5046_v10 = vmul.f32 %v6204_v8, %v5030_v51 }
0x2621   :  { %v5052_v12 = vmul.f32 %v5415_v9, %v5046_v10 }
0x2622   :  { %v6206_v6 = vpop.eup %6205 }
0x2623   :  { %v5058_v13 = vadd.f32 %v5416_v11, %v5052_v12  ;;  %v5047_v14 = vmul.f32 %v6206_v6, %v5031_v39 }
0x2624   :  { %v6208_v34 = vpop.eup %6207 }
0x2625   :  { %v5231_v15 = vmul.f32 %v5137_v57, %v5058_v13  ;;  %v5053_v17 = vmul.f32 %v5415_v9, %v5047_v14 }
0x2627   :  { %v5233_v19 = vsel %vm138_vm2, %v5231_v15, 0.0  ;;  %v5059_v20 = vadd.f32 %v5416_v11, %v5053_v17 }
0x2628   :  { %5234 = vadd.xlane.f32.xlu1 %v5233_v19  ;;  %v6210_v40 = vpop.eup %6209 }
0x2629   :  { %v5232_v21 = vmul.f32 %v5142_v59, %v5059_v20 }
0x262b   :  { %v5236_v23 = vsel %vm138_vm2, %v5232_v21, 0.0 }
0x262c   :  { %5237 = vadd.xlane.f32.xlu1 %v5236_v23 }
0x2630   :  { %5273 = vadd.xlane.f32.xlu1 %v5272_v55 }
0x2634   :  { %5276 = vadd.xlane.f32.xlu1 %v5275_v26 }
0x26b5   :  { %v5235_v33 = vpop.xlane.xlu1 %5234 }
0x26b6   :  { %v5254_v35 = vmul.f32 %v5253_v52, %v5235_v33 }
0x26b8   :  { %v5256_v36 = vmul.f32 %v6208_v34, %v5254_v35 }
0x26b9   :  { %v5238_v38 = vpop.xlane.xlu1 %5237 }
0x26ba   :  { %v5258_v41 = vmul.f32 %v5256_v36, %v5137_v57  ;;  %v5255_v42 = vmul.f32 %v5253_v52, %v5238_v38 }
0x26bc   :  { %v5257_v43 = vmul.f32 %v6210_v40, %v5255_v42  ;;  %v5260_v44 = vsub.f32 %v5058_v13, %v5258_v41 }
0x26bd   :  { %v5274_v50 = vpop.xlane.xlu1 %5273 }
0x26be   :  { %v5259_v45 = vmul.f32 %v5257_v43, %v5142_v59  ;;  %v5262_v4 = vmul.f32 %v5260_v44, %v5222_v18  ;;  %v5278_v16 = vadd.f32 1e-08, %v5274_v50 }
0x26c0   :  { %v5264_v47 = vsel %vm138_vm2, %v5262_v4, 0.0  ;;  %v5261_v46 = vsub.f32 %v5059_v20, %v5259_v45  ;;  %6211 = vrcp.f32 %v5278_v16 }
0x26c1   :  { %5265 = vadd.xlane.f32.xlu0 %v5264_v47  ;;  %v5277_v53 = vpop.xlane.xlu1 %5276 }
0x26c2   :  { %v5263_v49 = vmul.f32 %v5261_v46, %v5227_v22  ;;  %v5279_v39 = vadd.f32 1e-08, %v5277_v53 }
0x26c4   :  { %v5267_v30 = vsel %vm138_vm2, %v5263_v49, 0.0  ;;  %6213 = vrcp.f32 %v5279_v39 }
0x26c5   :  { %5268 = vadd.xlane.f32.xlu1 %v5267_v30 }
0x26ca   :  { %v6212_v56 = vpop.eup %6211 }
0x26ce   :  { %v6214_v61 = vpop.eup %6213 }
0x274e   :  { %v5266_v51 = vpop.xlane.xlu0 %5265 }
0x274f   :  { %v5284_v48 = vmul.f32 %v5266_v51, %v5253_v52 }
0x2751   :  { %v5286_v57 = vmul.f32 %v6212_v56, %v5284_v48 }
0x2752   :  { %v5269_v37 = vpop.xlane.xlu1 %5268 }
0x2753   :  { %v5288_v25 = vmul.f32 %v5286_v57, %v5222_v18  ;;  %v5285_v59 = vmul.f32 %v5269_v37, %v5253_v52 }
0x2755   :  { %v5290_v62 = vsub.f32 %v5260_v44, %v5288_v25  ;;  %v5287_v0 = vmul.f32 %v6214_v61, %v5285_v59 }
0x2757   :  { %5292 = vst.msk [vmem:[#allocation8] sm:$0xff] %vm138_vm2, %v5290_v62  ;;  %v5289_v60 = vmul.f32 %v5287_v0, %v5227_v22 }
0x2759   :  { %v5291_v1 = vsub.f32 %v5261_v46, %v5289_v60 }
0x275b   :  { %5293 = vst.msk [vmem:[#allocation8 + $0x8] sm:$0xff] %vm138_vm2, %v5291_v1 }
0x275c   :  { %6248 = shalt.err (!%p6245_p12)
}
0x275d   :  { %s6249_s16 = scalar_lea.hbm %s6932_s7, 256 }
0x275e   :  { %p6250_p13 = scmp.ne.s32.totalorder %s6932_s7, %s6249_s16  ;;  %p6253_p0 = scmp.lt.u32.totalorder %s6249_s16, %s6932_s7 }
0x2760   :  { %p6255_p1 = pnand %p6253_p0, %p6250_p13 }
0x2762   :  { %6258 = shalt.err (!%p6255_p1)
}
0x2763   :  { %5305 = dma.vmem_to_hbm [thread:$0]  %s5300_s10, 256, %s6932_s7, [#allocation7], %s6264_s11, %s6264_s11, %s6265_s12  }
0x2764   :  { %6261 = dma.done.wait [#allocation7], 256  }
0x2765   :  { %6262 = vsyncadd [#allocation7], 4294967040 }
0x2766   :  { %5309 = vsyncpa [#allocation6], 1 }
0x2767   :  { %5310 = vsyncpa [#allocation7], 1 }

</bundles_post_ra>
